<compile_context>
chip_gen: v6e
topology: v6e:2x2x1
jax: 0.10.0
libtpu: 0.0.40
codegen_flags: <defaults>
</compile_context>

<pallas_src>
import functools

import numpy as np
import jax
import jax.numpy as jnp
from jax.experimental import pallas as pl
from jax.experimental.pallas import tpu as pltpu


# --------------------------- JAX-side input prep ----------------------------

def _build_subpixel_inputs(x_nhwc, weight, K, s, p, compute_dtype):
    """Sub-pixel (stride x stride) decomposition; needs K % s == 0, (K-2p) % s == 0.

    Returns
      ximg:   (G, N, Hs+T-1, Ws+T-1, Cin)  haloed per-group images (bf16)
      w_taps: (G, T*T, Cin, Cout)          per-group per-tap weights (bf16)
      T, Hs, Ws
    Group g = rh*s + rw owns output pixels with (oh % s, ow % s) == (rh, rw);
    inside the kernel tap (th, tw) reads ximg[g, n, (T-1-th)+j, (T-1-tw)+i, :].
    """
    N, H, W, Cin = x_nhwc.shape
    Cout = weight.shape[1]
    T = K // s
    Hout = (H - 1) * s - 2 * p + K
    Wout = (W - 1) * s - 2 * p + K
    Hs, Ws = Hout // s, Wout // s
    Hp, Wp = Hs + T - 1, Ws + T - 1
    dhs = [(r + p) // s for r in range(s)]
    dws = [(r + p) // s for r in range(s)]
    off_h = [d - (T - 1) for d in dhs]          # window origin in x coordinates
    off_w = [d - (T - 1) for d in dws]
    plo_h = max(0, -min(off_h)); phi_h = max(0, max(off_h) + Hp - H)
    plo_w = max(0, -min(off_w)); phi_w = max(0, max(off_w) + Wp - W)
    # One universal zero-pad shared by all groups (jnp.pad fuses into producer).
    xp = jnp.pad(x_nhwc.astype(compute_dtype),
                 ((0, 0), (plo_h, phi_h), (plo_w, phi_w), (0, 0)))
    w = weight.astype(compute_dtype)
    imgs, wtaps = [], []
    for rh in range(s):
        ch = (rh + p) % s
        h0 = off_h[rh] + plo_h
        for rw_ in range(s):
            cw = (rw_ + p) % s
            w0 = off_w[rw_] + plo_w
            imgs.append(xp[:, h0:h0 + Hp, w0:w0 + Wp, :])
            # Tap (th, tw) pairs with kernel index (ch + th*s, cw + tw*s); no flip.
            wsub = w[:, :, ch::s, cw::s]                          # (Cin, Cout, T, T)
            wtaps.append(jnp.transpose(wsub, (2, 3, 0, 1)).reshape(T * T, Cin, Cout))
    return jnp.stack(imgs, 0), jnp.stack(wtaps, 0), T, Hs, Ws


def _build_dilated_inputs(x_nhwc, weight, K, s, p, compute_dtype):
    """Fallback: zero-dilated + padded image, one group, T = K taps.

    The spatial flip of the transposed conv is absorbed by the (T-1-th, T-1-tw)
    tap-window origin used in the kernel, so the weights stay in natural order.
    """
    N, H, W, Cin = x_nhwc.shape
    Cout = weight.shape[1]
    assert p <= K - 1, "dilated fallback requires padding <= kernel_size - 1"
    Hout = (H - 1) * s - 2 * p + K
    Wout = (W - 1) * s - 2 * p + K
    Hd, Wd = (H - 1) * s + 1, (W - 1) * s + 1
    pk = K - 1 - p
    xz = x_nhwc.astype(compute_dtype)[:, :, None, :, None, :]    # (N,H,1,W,1,C)
    if s > 1:
        xz = jnp.pad(xz, ((0, 0), (0, 0), (0, s - 1), (0, 0), (0, s - 1), (0, 0)))
    xz = xz.reshape(N, H * s, W * s, Cin)[:, :Hd, :Wd, :]
    ximg = jnp.pad(xz, ((0, 0), (pk, pk), (pk, pk), (0, 0)))[None]  # (1,N,Hout+K-1,...)
    w_taps = jnp.transpose(weight.astype(compute_dtype),
                           (2, 3, 0, 1)).reshape(1, K * K, Cin, Cout)
    return ximg, w_taps, K, Hout, Wout


# --------------------------------- forward ----------------------------------

def dcgan_block_forward(x_nchw, weight, gamma, beta, *, stride, padding, use_bn,
                        eps=1e-5, compute_dtype=jnp.bfloat16):
    """x_nchw: (N, Cin, H, W); weight: (Cin, Cout, K, K) (ConvTranspose2d, bias=False)."""
    N, Cin, H, W = x_nchw.shape
    _, Cout, K, _ = weight.shape
    s, p = stride, padding
    Hout = (H - 1) * s - 2 * p + K
    Wout = (W - 1) * s - 2 * p + K
    out_dtype = x_nchw.dtype

    x = jnp.transpose(x_nchw, (0, 2, 3, 1))                       # NHWC

    if K % s == 0 and (K - 2 * p) % s == 0:
        ximg, w_taps, T, Hs, Ws = _build_subpixel_inputs(x, weight, K, s, p, compute_dtype)
        s_eff = s
    else:
        ximg, w_taps, T, Hs, Ws = _build_dilated_inputs(x, weight, K, s, p, compute_dtype)
        s_eff = 1
    G = ximg.shape[0]
    Hp, Wp = Hs + T - 1, Ws + T - 1
    HW = Hs * Ws
    taps = [(th, tw) for th in range(T) for tw in range(T)]

    # ----------------------------- kernels (closures over static dims) -------
    def accumulate(x_ref, w_ref):
        # In-VMEM "im2col": each tap window is a static slice of the haloed
        # image block; per-tap MXU matmul with f32 accumulation.
        acc = None
        for t, (th, tw) in enumerate(taps):
            xt = x_ref[T - 1 - th:T - 1 - th + Hs, T - 1 - tw:T - 1 - tw + Ws, :]
            c = jnp.dot(xt.reshape(HW, Cin), w_ref[t],
                        preferred_element_type=jnp.float32)
            acc = c if acc is None else acc + c
        return acc                                                  # (HW, Cout) f32

    def conv_relu_kernel(x_ref, w_ref, o_ref):
        o_ref[...] = jnp.maximum(accumulate(x_ref, w_ref), 0.0).astype(o_ref.dtype)

    def conv_stats_kernel(x_ref, w_ref, st_ref):
        acc = accumulate(x_ref, w_ref)
        # Per-channel sum / sum-of-squares via a ones-row MXU matmul (XLU stays free).
        ones = jnp.ones((1, HW), jnp.float32)
        st_ref[0:1, :] = jnp.dot(ones, acc, preferred_element_type=jnp.float32)
        st_ref[1:2, :] = jnp.dot(ones, acc * acc, preferred_element_type=jnp.float32)

    def conv_bn_relu_kernel(x_ref, w_ref, s_ref, b_ref, o_ref):
        acc = accumulate(x_ref, w_ref)
        o_ref[...] = jnp.maximum(acc * s_ref[...] + b_ref[...], 0.0).astype(o_ref.dtype)

    # ------------------------------ specs / grid ------------------------------
    x_spec = pl.BlockSpec((None, None, Hp, Wp, Cin), lambda g, n: (g, n, 0, 0, 0))
    w_spec = pl.BlockSpec((None, T * T, Cin, Cout), lambda g, n: (g, 0, 0, 0))
    o_spec = pl.BlockSpec((None, None, HW, Cout), lambda g, n: (g, n, 0, 0))
    cparams = pltpu.CompilerParams(dimension_semantics=("parallel", "parallel"))

    if use_bn:
        # Pass 1: stats only (no activation round trip through HBM).
        stats = pl.pallas_call(
            conv_stats_kernel,
            out_shape=jax.ShapeDtypeStruct((G, N, 2, Cout), jnp.float32),
            grid=(G, N),
            in_specs=[x_spec, w_spec],
            out_specs=pl.BlockSpec((None, None, 2, Cout), lambda g, n: (g, n, 0, 0)),
            compiler_params=cparams,
        )(ximg, w_taps)

        # Tiny glue: fold global batch stats + gamma/beta into one scale & bias.
        Mtrue = G * N * HW                                         # == N*Hout*Wout
        mean = stats[:, :, 0, :].sum(axis=(0, 1)) / Mtrue
        var = jnp.maximum(stats[:, :, 1, :].sum(axis=(0, 1)) / Mtrue - mean * mean, 0.0)
        scale = gamma.astype(jnp.float32) * jax.lax.rsqrt(var + eps)
        bias = beta.astype(jnp.float32) - mean * scale

        # Pass 2: recompute the matmul (mem-bound regime -> MXU slack) fused
        # with the folded BN FMA and ReLU; single output write.
        out_g = pl.pallas_call(
            conv_bn_relu_kernel,
            out_shape=jax.ShapeDtypeStruct((G, N, HW, Cout), out_dtype),
            grid=(G, N),
            in_specs=[x_spec, w_spec,
                      pl.BlockSpec((1, Cout), lambda g, n: (0, 0)),
                      pl.BlockSpec((1, Cout), lambda g, n: (0, 0))],
            out_specs=o_spec,
            compiler_params=cparams,
        )(ximg, w_taps, scale.reshape(1, Cout), bias.reshape(1, Cout))
    else:
        out_g = pl.pallas_call(
            conv_relu_kernel,
            out_shape=jax.ShapeDtypeStruct((G, N, HW, Cout), out_dtype),
            grid=(G, N),
            in_specs=[x_spec, w_spec],
            out_specs=o_spec,
            compiler_params=cparams,
        )(ximg, w_taps)

    # Single-pass epilogue: interleave the s x s sub-grids and go NHWC -> NCHW.
    out = out_g.reshape(s_eff, s_eff, N, Hs, Ws, Cout)
    out = jnp.transpose(out, (2, 5, 3, 0, 4, 1)).reshape(N, Cout, Hout, Wout)
    return out


# --------------- independent numpy reference (scatter formulation) ----------

def ref_forward(x, w, gamma, beta, stride, padding, use_bn, eps=1e-5):
    x = np.asarray(x, np.float32)
    w = np.asarray(w, np.float32)
    N, Cin, H, W = x.shape
    _, Cout, K, _ = w.shape
    Hout = (H - 1) * stride - 2 * padding + K
    Wout = (W - 1) * stride - 2 * padding + K
    full = np.zeros((N, Cout, (H - 1) * stride + K, (W - 1) * stride + K), np.float32)
    for ci in range(Cin):
        for kh in range(K):
            for kw in range(K):
                full[:, :, kh:kh + (H - 1) * stride + 1:stride,
                           kw:kw + (W - 1) * stride + 1:stride] += (
                    x[:, ci:ci + 1, :, :] * w[ci, :, kh, kw][None, :, None, None])
    y = full[:, :, padding:padding + Hout, padding:padding + Wout]
    if use_bn:
        mean = y.mean(axis=(0, 2, 3), keepdims=True)
        var = y.var(axis=(0, 2, 3), keepdims=True)   # biased, training-mode BN
        y = (y - mean) / np.sqrt(var + eps) * np.asarray(gamma).reshape(1, -1, 1, 1) \
            + np.asarray(beta).reshape(1, -1, 1, 1)
    return np.maximum(y, 0.0)


if __name__ == "__main__":
    configs = [
        # (Cin, Cout, K, stride, pad, use_bn, N, H, W)
        (4, 8, 4, 2, 1, True,  2, 16, 16),   # standard DCGAN up-block -> sub-pixel path
        (4, 6, 4, 1, 0, False, 2, 13, 13),   # stride-1 / no-BN block (Identity)
        (4, 8, 6, 4, 1, True,  2, 4, 4),     # K % stride != 0 -> dilated fallback
    ]
    key = jax.random.PRNGKey(0)
    for idx, (Cin, Cout, K, s, p, bn, N, H, W) in enumerate(configs):
        key, k1, k2 = jax.random.split(key, 3)
        x = jax.random.normal(k1, (N, Cin, H, W), jnp.float32)
        # ConvTranspose2d weight (Cin, Cout, K, K), bias=False; DCGAN N(0, 0.02) init.
        weight = jax.random.normal(k2, (Cin, Cout, K, K), jnp.float32) * 0.02
        gamma = jnp.ones((Cout,), jnp.float32) if bn else None    # BatchNorm2d defaults
        beta = jnp.zeros((Cout,), jnp.float32) if bn else None

        fwd = jax.jit(functools.partial(dcgan_block_forward, stride=s, padding=p,
                                        use_bn=bn))
        out = jax.block_until_ready(fwd(x, weight, gamma, beta))

        Hout = (H - 1) * s - 2 * p + K
        Wout = (W - 1) * s - 2 * p + K
        assert out.shape == (N, Cout, Hout, Wout), (idx, out.shape)

        ref = ref_forward(x, weight, gamma, beta, s, p, bn)
        # bf16 MXU operands with f32 accumulation -> loose tolerance vs f32 reference.
        np.testing.assert_allclose(np.asarray(out, np.float32), ref, rtol=5e-2, atol=5e-2)
    print("KERNEL_OK")
</pallas_src>

<mosaic_0001>
module attributes {stable_mosaic.version = 11 : i64} {
  func.func @conv_stats_kernel(%arg0: i32, %arg1: i32, %arg2: memref<1x1x17x17x4xbf16, #tpu.memory_space<vmem>>, %arg3: memref<1x4x4x8xbf16, #tpu.memory_space<vmem>>, %arg4: memref<1x1x2x8xf32, #tpu.memory_space<vmem>>) attributes {dimension_semantics = [#tpu.dimension_semantics<parallel>, #tpu.dimension_semantics<parallel>], iteration_bounds = array<i64: 4, 2>, scalar_prefetch = 0 : i64, scratch_operands = 0 : i64, tpu.core_type = #tpu.core_type<tc>, window_params = [{transform_indices = @transform_0, window_bounds = array<i64: 1, 1, 17, 17, 4>}, {transform_indices = @transform_1, window_bounds = array<i64: 1, 4, 4, 8>}, {transform_indices = @transform_2, window_bounds = array<i64: 1, 1, 2, 8>}]} {
    %c0 = arith.constant 0 : index
    %c0_0 = arith.constant 0 : index
    %c1 = arith.constant 1 : index
    %c1_1 = arith.constant 1 : index
    %c0_2 = arith.constant 0 : index
    %0 = vector.load %arg2[%c0, %c0_0, %c1, %c1_1, %c0_2] : memref<1x1x17x17x4xbf16, #tpu.memory_space<vmem>>, vector<1x1x16x16x4xbf16>
    %1 = vector.shape_cast %0 : vector<1x1x16x16x4xbf16> to vector<16x16x4xbf16>
    %2 = vector.shape_cast %1 : vector<16x16x4xbf16> to vector<256x4xbf16>
    %c0_3 = arith.constant 0 : index
    %c0_4 = arith.constant 0 : index
    %c0_5 = arith.constant 0 : index
    %c0_6 = arith.constant 0 : index
    %3 = vector.load %arg3[%c0_3, %c0_4, %c0_5, %c0_6] : memref<1x4x4x8xbf16, #tpu.memory_space<vmem>>, vector<1x1x4x8xbf16>
    %4 = vector.shape_cast %3 : vector<1x1x4x8xbf16> to vector<4x8xbf16>
    %cst = arith.constant dense<0.000000e+00> : vector<256x8xf32>
    %5 = tpu.matmul %2, %4, %cst {dimension_numbers = #tpu.dot_dimension_numbers<[1], [0], [0], [1], [0, 0, 1, 1], [], []>} : vector<256x4xbf16>, vector<4x8xbf16>, vector<256x8xf32> -> vector<256x8xf32>
    %c0_7 = arith.constant 0 : index
    %c0_8 = arith.constant 0 : index
    %c1_9 = arith.constant 1 : index
    %c0_10 = arith.constant 0 : index
    %c0_11 = arith.constant 0 : index
    %6 = vector.load %arg2[%c0_7, %c0_8, %c1_9, %c0_10, %c0_11] : memref<1x1x17x17x4xbf16, #tpu.memory_space<vmem>>, vector<1x1x16x16x4xbf16>
    %7 = vector.shape_cast %6 : vector<1x1x16x16x4xbf16> to vector<16x16x4xbf16>
    %8 = vector.shape_cast %7 : vector<16x16x4xbf16> to vector<256x4xbf16>
    %c0_12 = arith.constant 0 : index
    %c1_13 = arith.constant 1 : index
    %c0_14 = arith.constant 0 : index
    %c0_15 = arith.constant 0 : index
    %9 = vector.load %arg3[%c0_12, %c1_13, %c0_14, %c0_15] : memref<1x4x4x8xbf16, #tpu.memory_space<vmem>>, vector<1x1x4x8xbf16>
    %10 = vector.shape_cast %9 : vector<1x1x4x8xbf16> to vector<4x8xbf16>
    %cst_16 = arith.constant dense<0.000000e+00> : vector<256x8xf32>
    %11 = tpu.matmul %8, %10, %cst_16 {dimension_numbers = #tpu.dot_dimension_numbers<[1], [0], [0], [1], [0, 0, 1, 1], [], []>} : vector<256x4xbf16>, vector<4x8xbf16>, vector<256x8xf32> -> vector<256x8xf32>
    %12 = arith.addf %5, %11 : vector<256x8xf32>
    %c0_17 = arith.constant 0 : index
    %c0_18 = arith.constant 0 : index
    %c0_19 = arith.constant 0 : index
    %c1_20 = arith.constant 1 : index
    %c0_21 = arith.constant 0 : index
    %13 = vector.load %arg2[%c0_17, %c0_18, %c0_19, %c1_20, %c0_21] : memref<1x1x17x17x4xbf16, #tpu.memory_space<vmem>>, vector<1x1x16x16x4xbf16>
    %14 = vector.shape_cast %13 : vector<1x1x16x16x4xbf16> to vector<16x16x4xbf16>
    %15 = vector.shape_cast %14 : vector<16x16x4xbf16> to vector<256x4xbf16>
    %c0_22 = arith.constant 0 : index
    %c2 = arith.constant 2 : index
    %c0_23 = arith.constant 0 : index
    %c0_24 = arith.constant 0 : index
    %16 = vector.load %arg3[%c0_22, %c2, %c0_23, %c0_24] : memref<1x4x4x8xbf16, #tpu.memory_space<vmem>>, vector<1x1x4x8xbf16>
    %17 = vector.shape_cast %16 : vector<1x1x4x8xbf16> to vector<4x8xbf16>
    %cst_25 = arith.constant dense<0.000000e+00> : vector<256x8xf32>
    %18 = tpu.matmul %15, %17, %cst_25 {dimension_numbers = #tpu.dot_dimension_numbers<[1], [0], [0], [1], [0, 0, 1, 1], [], []>} : vector<256x4xbf16>, vector<4x8xbf16>, vector<256x8xf32> -> vector<256x8xf32>
    %19 = arith.addf %12, %18 : vector<256x8xf32>
    %c0_26 = arith.constant 0 : index
    %c0_27 = arith.constant 0 : index
    %c0_28 = arith.constant 0 : index
    %c0_29 = arith.constant 0 : index
    %c0_30 = arith.constant 0 : index
    %20 = vector.load %arg2[%c0_26, %c0_27, %c0_28, %c0_29, %c0_30] : memref<1x1x17x17x4xbf16, #tpu.memory_space<vmem>>, vector<1x1x16x16x4xbf16>
    %21 = vector.shape_cast %20 : vector<1x1x16x16x4xbf16> to vector<16x16x4xbf16>
    %22 = vector.shape_cast %21 : vector<16x16x4xbf16> to vector<256x4xbf16>
    %c0_31 = arith.constant 0 : index
    %c3 = arith.constant 3 : index
    %c0_32 = arith.constant 0 : index
    %c0_33 = arith.constant 0 : index
    %23 = vector.load %arg3[%c0_31, %c3, %c0_32, %c0_33] : memref<1x4x4x8xbf16, #tpu.memory_space<vmem>>, vector<1x1x4x8xbf16>
    %24 = vector.shape_cast %23 : vector<1x1x4x8xbf16> to vector<4x8xbf16>
    %cst_34 = arith.constant dense<0.000000e+00> : vector<256x8xf32>
    %25 = tpu.matmul %22, %24, %cst_34 {dimension_numbers = #tpu.dot_dimension_numbers<[1], [0], [0], [1], [0, 0, 1, 1], [], []>} : vector<256x4xbf16>, vector<4x8xbf16>, vector<256x8xf32> -> vector<256x8xf32>
    %26 = arith.addf %19, %25 : vector<256x8xf32>
    %cst_35 = arith.constant 1.000000e+00 : f32
    %27 = vector.broadcast %cst_35 : f32 to vector<1x256xf32>
    %cst_36 = arith.constant dense<0.000000e+00> : vector<1x8xf32>
    %28 = tpu.matmul %27, %26, %cst_36 {dimension_numbers = #tpu.dot_dimension_numbers<[1], [0], [0], [1], [0, 0, 1, 1], [], []>} : vector<1x256xf32>, vector<256x8xf32>, vector<1x8xf32> -> vector<1x8xf32>
    %c0_37 = arith.constant 0 : index
    %c0_38 = arith.constant 0 : index
    %c0_39 = arith.constant 0 : index
    %c0_40 = arith.constant 0 : index
    %29 = vector.load %arg4[%c0_37, %c0_38, %c0_39, %c0_40] : memref<1x1x2x8xf32, #tpu.memory_space<vmem>>, vector<1x1x1x8xf32>
    %30 = vector.shape_cast %29 : vector<1x1x1x8xf32> to vector<1x8xf32>
    %31 = vector.shape_cast %28 : vector<1x8xf32> to vector<1x1x1x8xf32>
    tpu.vector_store %arg4[%c0_37, %c0_38, %c0_39, %c0_40], %31 {strides = array<i32>} : memref<1x1x2x8xf32, #tpu.memory_space<vmem>>, vector<1x1x1x8xf32>,
    %32 = arith.mulf %26, %26 : vector<256x8xf32>
    %cst_41 = arith.constant dense<0.000000e+00> : vector<1x8xf32>
    %33 = tpu.matmul %27, %32, %cst_41 {dimension_numbers = #tpu.dot_dimension_numbers<[1], [0], [0], [1], [0, 0, 1, 1], [], []>} : vector<1x256xf32>, vector<256x8xf32>, vector<1x8xf32> -> vector<1x8xf32>
    %c0_42 = arith.constant 0 : index
    %c0_43 = arith.constant 0 : index
    %c1_44 = arith.constant 1 : index
    %c0_45 = arith.constant 0 : index
    %34 = vector.load %arg4[%c0_42, %c0_43, %c1_44, %c0_45] : memref<1x1x2x8xf32, #tpu.memory_space<vmem>>, vector<1x1x1x8xf32>
    %35 = vector.shape_cast %34 : vector<1x1x1x8xf32> to vector<1x8xf32>
    %36 = vector.shape_cast %33 : vector<1x8xf32> to vector<1x1x1x8xf32>
    tpu.vector_store %arg4[%c0_42, %c0_43, %c1_44, %c0_45], %36 {strides = array<i32>} : memref<1x1x2x8xf32, #tpu.memory_space<vmem>>, vector<1x1x1x8xf32>,
    return
  }
  func.func @transform_0(%arg0: i32, %arg1: i32) -> (i32, i32, i32, i32, i32) {
    %c0_i32 = arith.constant 0 : i32
    %c0_i32_0 = arith.constant 0 : i32
    %c0_i32_1 = arith.constant 0 : i32
    %c0_i32_2 = arith.constant 0 : i32
    return %arg0, %arg1, %c0_i32, %c0_i32_0, %c0_i32_1 : i32, i32, i32, i32, i32
  }
  func.func @transform_1(%arg0: i32, %arg1: i32) -> (i32, i32, i32, i32) {
    %c0_i32 = arith.constant 0 : i32
    %c0_i32_0 = arith.constant 0 : i32
    %c0_i32_1 = arith.constant 0 : i32
    %c0_i32_2 = arith.constant 0 : i32
    return %arg0, %c0_i32, %c0_i32_0, %c0_i32_1 : i32, i32, i32, i32
  }
  func.func @transform_2(%arg0: i32, %arg1: i32) -> (i32, i32, i32, i32) {
    %c0_i32 = arith.constant 0 : i32
    %c0_i32_0 = arith.constant 0 : i32
    %c0_i32_1 = arith.constant 0 : i32
    return %arg0, %arg1, %c0_i32, %c0_i32_0 : i32, i32, i32, i32
  }
}

module attributes {stable_mosaic.version = 11 : i64} {
  func.func @conv_bn_relu_kernel(%arg0: i32, %arg1: i32, %arg2: memref<1x1x17x17x4xbf16, #tpu.memory_space<vmem>>, %arg3: memref<1x4x4x8xbf16, #tpu.memory_space<vmem>>, %arg4: memref<1x8xf32, #tpu.memory_space<vmem>>, %arg5: memref<1x8xf32, #tpu.memory_space<vmem>>, %arg6: memref<1x1x256x8xf32, #tpu.memory_space<vmem>>) attributes {dimension_semantics = [#tpu.dimension_semantics<parallel>, #tpu.dimension_semantics<parallel>], iteration_bounds = array<i64: 4, 2>, scalar_prefetch = 0 : i64, scratch_operands = 0 : i64, tpu.core_type = #tpu.core_type<tc>, window_params = [{transform_indices = @transform_0, window_bounds = array<i64: 1, 1, 17, 17, 4>}, {transform_indices = @transform_1, window_bounds = array<i64: 1, 4, 4, 8>}, {pipeline_mode = #tpu.pipeline_mode<synchronous>, transform_indices = @transform_2, window_bounds = array<i64: 1, 8>}, {pipeline_mode = #tpu.pipeline_mode<synchronous>, transform_indices = @transform_3, window_bounds = array<i64: 1, 8>}, {transform_indices = @transform_4, window_bounds = array<i64: 1, 1, 256, 8>}]} {
    %c0 = arith.constant 0 : index
    %c0_0 = arith.constant 0 : index
    %c1 = arith.constant 1 : index
    %c1_1 = arith.constant 1 : index
    %c0_2 = arith.constant 0 : index
    %0 = vector.load %arg2[%c0, %c0_0, %c1, %c1_1, %c0_2] : memref<1x1x17x17x4xbf16, #tpu.memory_space<vmem>>, vector<1x1x16x16x4xbf16>
    %1 = vector.shape_cast %0 : vector<1x1x16x16x4xbf16> to vector<16x16x4xbf16>
    %2 = vector.shape_cast %1 : vector<16x16x4xbf16> to vector<256x4xbf16>
    %c0_3 = arith.constant 0 : index
    %c0_4 = arith.constant 0 : index
    %c0_5 = arith.constant 0 : index
    %c0_6 = arith.constant 0 : index
    %3 = vector.load %arg3[%c0_3, %c0_4, %c0_5, %c0_6] : memref<1x4x4x8xbf16, #tpu.memory_space<vmem>>, vector<1x1x4x8xbf16>
    %4 = vector.shape_cast %3 : vector<1x1x4x8xbf16> to vector<4x8xbf16>
    %cst = arith.constant dense<0.000000e+00> : vector<256x8xf32>
    %5 = tpu.matmul %2, %4, %cst {dimension_numbers = #tpu.dot_dimension_numbers<[1], [0], [0], [1], [0, 0, 1, 1], [], []>} : vector<256x4xbf16>, vector<4x8xbf16>, vector<256x8xf32> -> vector<256x8xf32>
    %c0_7 = arith.constant 0 : index
    %c0_8 = arith.constant 0 : index
    %c1_9 = arith.constant 1 : index
    %c0_10 = arith.constant 0 : index
    %c0_11 = arith.constant 0 : index
    %6 = vector.load %arg2[%c0_7, %c0_8, %c1_9, %c0_10, %c0_11] : memref<1x1x17x17x4xbf16, #tpu.memory_space<vmem>>, vector<1x1x16x16x4xbf16>
    %7 = vector.shape_cast %6 : vector<1x1x16x16x4xbf16> to vector<16x16x4xbf16>
    %8 = vector.shape_cast %7 : vector<16x16x4xbf16> to vector<256x4xbf16>
    %c0_12 = arith.constant 0 : index
    %c1_13 = arith.constant 1 : index
    %c0_14 = arith.constant 0 : index
    %c0_15 = arith.constant 0 : index
    %9 = vector.load %arg3[%c0_12, %c1_13, %c0_14, %c0_15] : memref<1x4x4x8xbf16, #tpu.memory_space<vmem>>, vector<1x1x4x8xbf16>
    %10 = vector.shape_cast %9 : vector<1x1x4x8xbf16> to vector<4x8xbf16>
    %cst_16 = arith.constant dense<0.000000e+00> : vector<256x8xf32>
    %11 = tpu.matmul %8, %10, %cst_16 {dimension_numbers = #tpu.dot_dimension_numbers<[1], [0], [0], [1], [0, 0, 1, 1], [], []>} : vector<256x4xbf16>, vector<4x8xbf16>, vector<256x8xf32> -> vector<256x8xf32>
    %12 = arith.addf %5, %11 : vector<256x8xf32>
    %c0_17 = arith.constant 0 : index
    %c0_18 = arith.constant 0 : index
    %c0_19 = arith.constant 0 : index
    %c1_20 = arith.constant 1 : index
    %c0_21 = arith.constant 0 : index
    %13 = vector.load %arg2[%c0_17, %c0_18, %c0_19, %c1_20, %c0_21] : memref<1x1x17x17x4xbf16, #tpu.memory_space<vmem>>, vector<1x1x16x16x4xbf16>
    %14 = vector.shape_cast %13 : vector<1x1x16x16x4xbf16> to vector<16x16x4xbf16>
    %15 = vector.shape_cast %14 : vector<16x16x4xbf16> to vector<256x4xbf16>
    %c0_22 = arith.constant 0 : index
    %c2 = arith.constant 2 : index
    %c0_23 = arith.constant 0 : index
    %c0_24 = arith.constant 0 : index
    %16 = vector.load %arg3[%c0_22, %c2, %c0_23, %c0_24] : memref<1x4x4x8xbf16, #tpu.memory_space<vmem>>, vector<1x1x4x8xbf16>
    %17 = vector.shape_cast %16 : vector<1x1x4x8xbf16> to vector<4x8xbf16>
    %cst_25 = arith.constant dense<0.000000e+00> : vector<256x8xf32>
    %18 = tpu.matmul %15, %17, %cst_25 {dimension_numbers = #tpu.dot_dimension_numbers<[1], [0], [0], [1], [0, 0, 1, 1], [], []>} : vector<256x4xbf16>, vector<4x8xbf16>, vector<256x8xf32> -> vector<256x8xf32>
    %19 = arith.addf %12, %18 : vector<256x8xf32>
    %c0_26 = arith.constant 0 : index
    %c0_27 = arith.constant 0 : index
    %c0_28 = arith.constant 0 : index
    %c0_29 = arith.constant 0 : index
    %c0_30 = arith.constant 0 : index
    %20 = vector.load %arg2[%c0_26, %c0_27, %c0_28, %c0_29, %c0_30] : memref<1x1x17x17x4xbf16, #tpu.memory_space<vmem>>, vector<1x1x16x16x4xbf16>
    %21 = vector.shape_cast %20 : vector<1x1x16x16x4xbf16> to vector<16x16x4xbf16>
    %22 = vector.shape_cast %21 : vector<16x16x4xbf16> to vector<256x4xbf16>
    %c0_31 = arith.constant 0 : index
    %c3 = arith.constant 3 : index
    %c0_32 = arith.constant 0 : index
    %c0_33 = arith.constant 0 : index
    %23 = vector.load %arg3[%c0_31, %c3, %c0_32, %c0_33] : memref<1x4x4x8xbf16, #tpu.memory_space<vmem>>, vector<1x1x4x8xbf16>
    %24 = vector.shape_cast %23 : vector<1x1x4x8xbf16> to vector<4x8xbf16>
    %cst_34 = arith.constant dense<0.000000e+00> : vector<256x8xf32>
    %25 = tpu.matmul %22, %24, %cst_34 {dimension_numbers = #tpu.dot_dimension_numbers<[1], [0], [0], [1], [0, 0, 1, 1], [], []>} : vector<256x4xbf16>, vector<4x8xbf16>, vector<256x8xf32> -> vector<256x8xf32>
    %26 = arith.addf %19, %25 : vector<256x8xf32>
    %c0_35 = arith.constant 0 : index
    %c0_36 = arith.constant 0 : index
    %27 = vector.load %arg4[%c0_35, %c0_36] : memref<1x8xf32, #tpu.memory_space<vmem>>, vector<1x8xf32>
    %28 = vector.broadcast %27 : vector<1x8xf32> to vector<256x8xf32>
    %29 = arith.mulf %26, %28 : vector<256x8xf32>
    %c0_37 = arith.constant 0 : index
    %c0_38 = arith.constant 0 : index
    %30 = vector.load %arg5[%c0_37, %c0_38] : memref<1x8xf32, #tpu.memory_space<vmem>>, vector<1x8xf32>
    %31 = vector.broadcast %30 : vector<1x8xf32> to vector<256x8xf32>
    %32 = arith.addf %29, %31 : vector<256x8xf32>
    %cst_39 = arith.constant 0.000000e+00 : f32
    %33 = vector.broadcast %cst_39 : f32 to vector<256x8xf32>
    %34 = arith.maximumf %32, %33 : vector<256x8xf32>
    %c0_40 = arith.constant 0 : index
    %c0_41 = arith.constant 0 : index
    %c0_42 = arith.constant 0 : index
    %c0_43 = arith.constant 0 : index
    %35 = vector.load %arg6[%c0_40, %c0_41, %c0_42, %c0_43] : memref<1x1x256x8xf32, #tpu.memory_space<vmem>>, vector<1x1x256x8xf32>
    %36 = vector.shape_cast %35 : vector<1x1x256x8xf32> to vector<256x8xf32>
    %37 = vector.shape_cast %34 : vector<256x8xf32> to vector<1x1x256x8xf32>
    tpu.vector_store %arg6[%c0_40, %c0_41, %c0_42, %c0_43], %37 {strides = array<i32>} : memref<1x1x256x8xf32, #tpu.memory_space<vmem>>, vector<1x1x256x8xf32>,
    return
  }
  func.func @transform_0(%arg0: i32, %arg1: i32) -> (i32, i32, i32, i32, i32) {
    %c0_i32 = arith.constant 0 : i32
    %c0_i32_0 = arith.constant 0 : i32
    %c0_i32_1 = arith.constant 0 : i32
    %c0_i32_2 = arith.constant 0 : i32
    return %arg0, %arg1, %c0_i32, %c0_i32_0, %c0_i32_1 : i32, i32, i32, i32, i32
  }
  func.func @transform_1(%arg0: i32, %arg1: i32) -> (i32, i32, i32, i32) {
    %c0_i32 = arith.constant 0 : i32
    %c0_i32_0 = arith.constant 0 : i32
    %c0_i32_1 = arith.constant 0 : i32
    %c0_i32_2 = arith.constant 0 : i32
    return %arg0, %c0_i32, %c0_i32_0, %c0_i32_1 : i32, i32, i32, i32
  }
  func.func @transform_2(%arg0: i32, %arg1: i32) -> (i32, i32) {
    %c0_i32 = arith.constant 0 : i32
    %c0_i32_0 = arith.constant 0 : i32
    %c0_i32_1 = arith.constant 0 : i32
    return %c0_i32, %c0_i32_0 : i32, i32
  }
  func.func @transform_3(%arg0: i32, %arg1: i32) -> (i32, i32) {
    %c0_i32 = arith.constant 0 : i32
    %c0_i32_0 = arith.constant 0 : i32
    %c0_i32_1 = arith.constant 0 : i32
    return %c0_i32, %c0_i32_0 : i32, i32
  }
  func.func @transform_4(%arg0: i32, %arg1: i32) -> (i32, i32, i32, i32) {
    %c0_i32 = arith.constant 0 : i32
    %c0_i32_0 = arith.constant 0 : i32
    %c0_i32_1 = arith.constant 0 : i32
    return %arg0, %arg1, %c0_i32, %c0_i32_0 : i32, i32, i32, i32
  }
}

</mosaic_0001>

<bundles_post_ra>
// kernel: dcgan_block_forward.2
= control target key start
LH: loop header
LB: loop body
LE: loop exit
PB: predicated region body
PF: predicated region fallthrough
CT: control target
= control target key end

     0   :  { %s3153_s9 = smov 0   ;;  %s3155_s10 = smov 0   ;;  %s3900_s0 = inlined_call_operand.vmem [shape: bf16[4,2,17,17,4], index: 0, kind: input, shape index: {}]   ;;  %s3901_s1 = inlined_call_operand.vmem [shape: bf16[4,4,4,8], index: 1, kind: input, shape index: {}]   ;;  %s3902_s2 = inlined_call_operand.vmem [shape: f32[4,2,2,8], index: 2, kind: output, shape index: {}]  }
   0x1   :  { %s3157_s11 = smov 0   ;;  %s3159_s12 = smov 0  }
   0x2   :  { %s3161_s13 = smov 0  }
   0x3 LB: > { %s21_s14 = sadd.s32 1, %s3127_s11  ;;  %s24_s15 = sadd.s32 1, %s3131_s12  ;;  %s3135_s13 = sphi %s3161_s13, %s12_s13   ;;  %s3131_s12 = sphi %s3159_s12, %s3977_s12   ;;  %s3127_s11 = sphi %s3157_s11, %s3976_s11   ;;  %s3123_s10 = sphi %s3155_s10, %s3975_s10   ;;  %s3119_s9 = sphi %s3153_s9, %s3974_s9  }
   0x4   : > { %p22_p0 = scmp.ge.s32.totalorder %s21_s14, 2  ;;  %p2556_p1 = scmp.ge.s32.totalorder %s3135_s13, 1 }
   0x5   : > { %p142_p2 = scmp.lt.s32.totalorder %s3135_s13, 9 }
   0x6   : > { %s3979_s14 = smov (%p22_p0, %s21_s14), 0  ;;  %s3981_s15 = smov (!%p22_p0, %s24_s15), %s3131_s12 }
   0x7   : > { %p143_p3 = pnand %p2556_p1, %p142_p2  ;;  %p26_p4 = scmp.ge.s32.totalorder %s3981_s15, 4 }
   0x9   : > { %s3983_s15 = smov (%p26_p4, %s3981_s15), 0  ;;  %146 = sbr.rel (%p143_p3) target bundleno = 603 (0x25b), region = 28 }
   0xe   : > { %p176_p5 = scmp.lt.s32.totalorder %s3123_s10, 3  ;;  %p178_p6 = scmp.lt.s32.totalorder %s3119_s9, 1  ;;  %vm767_vm0 = vcmask 1041408   ;;  %vm718_vm1 = vcmask 31744   ;;  %vm248_vm2 = vsmask.f32 3328 }
   0xf   : > { %vm249_vm3 = vsmask.f32 7440  ;;  %vm2346_vm5 = vcmask 57344  }
  0x10   : > { %s3985_s10 = smov (!%p176_p5, %s3123_s10), 3  ;;  %s3987_s9 = smov (!%p178_p6, %s3119_s9), 1  ;;  %vm3238_vm4 = vmor %vm248_vm2, %vm249_vm3 }
  0x11   : > { %s3023_s16 = smul.u32 102, %s3985_s10  ;;  %s2743_s17 = sshll.u32 %s3985_s10, 3 }
  0x12   : > { %s3022_s18 = smul.u32 51, %s3987_s9  ;;  %s189_s21 = scalar_lea.vmem %s3901_s1, %s2743_s17 }
  0x13   : > { %v2610_v0 = vld [vmem:[%s189_s21 + $0x2] sm:$0x3]  ;;  %v635_v1 = vld [vmem:[%s189_s21] sm:$0x3]  ;;  %v2675_v2 = vld [vmem:[%s189_s21 + $0x4] sm:$0x3] }
  0x14   : > { %s182_s22 = sadd.s32 %s3023_s16, %s3022_s18  ;;  %3018 = vmatprep.subr.msk.bf16.mxu0 %vm767_vm0, %v2610_v0  ;;  %v769_v3 = vsel %vm767_vm0, %v2610_v0, 0  ;;  %3019 = vmatprep.subr.msk.bf16.mxu1 %vm767_vm0, %v635_v1  ;;  %v1029_v4 = vsel %vm767_vm0, %v635_v1, 0  ;;  %v2708_v5 = vld [vmem:[%s189_s21 + $0x6] sm:$0x3]  ;;  %v1723_v6 = vsel %vm767_vm0, %v2675_v2, 0  ;;  %s2560_s27 = sshll.u32 %s3985_s10, 1 }
  0x15   : > { %s2557_s23 = sshll.u32 %s182_s22, 2  ;;  %2883 = vmatpush3.bf16.msra.mxu0 %v769_v3  ;;  %2917 = vmatpush3.bf16.msra.mxu1 %v1029_v4  ;;  %v3206_v7 = vsel %vm767_vm0, %v2708_v5, 0  ;;  %s195_s28 = sadd.s32 %s2560_s27, %s3987_s9 }
  0x16   : > { %s3200_s26 = scalar_lea.vmem %s3900_s0, %s2557_s23  ;;  %3020 = vmatprep.subr.msk.bf16.mxu0 %vm767_vm0, %v2675_v2  ;;  %3021 = vmatprep.subr.msk.bf16.mxu1 %vm767_vm0, %v2708_v5  ;;  %s2561_s29 = sshll.u32 %s195_s28, 1 }
  0x17   : > { %v2562_v8 = vld [vmem:[%s3200_s26 + $0xc] sm:$0xf]  ;;  %v2563_v9 = vld [vmem:[%s3200_s26 + $0x10] sm:$0xf]  ;;  %v2565_v10 = vld [vmem:[%s3200_s26 + $0x18] sm:$0xf]  ;;  %s197_s4 = scalar_lea.vmem %s3902_s2, %s2561_s29 }
  0x18   : > { %v252_v11 = vshrl.u32 %v2562_v8, 16  ;;  %v255_v12 = vshll.u32 %v2562_v8, 16  ;;  %v261_v13 = vshll.u32 %v2563_v9, 16  ;;  %v265_v14 = vshrl.u32 %v2563_v9, 16  ;;  %v2566_v15 = vld [vmem:[%s3200_s26 + $0x1c] sm:$0xf] }
  0x19   : > { %v2611_v16 = vcombine.low %v2562_v8, %v2563_v9  ;;  %v276_v17 = vshrl.u32 %v2565_v10, 16  ;;  %v279_v18 = vshll.u32 %v2565_v10, 16  ;;  %v285_v19 = vshll.u32 %v2566_v15, 16  ;;  %v2568_v20 = vld [vmem:[%s3200_s26 + $0x24] sm:$0xf] }
  0x1a   : > { %v254_v21 = vrot.slane %v252_v11, 4  ;;  %v257_v22 = vrot.slane %v255_v12, 5  ;;  %v263_v23 = vrot.slane %v261_v13, 5  ;;  %v267_v24 = vrot.slane %v265_v14, 4  ;;  %v2569_v25 = vld [vmem:[%s3200_s26 + $0x28] sm:$0xf] }
  0x1b   : > { %2884 = vmatprep.mubr.msk.bf16.mxu0 %vm718_vm1, %v2611_v16  ;;  %v278_v26 = vrot.slane %v276_v17, 4  ;;  %v281_v27 = vrot.slane %v279_v18, 5  ;;  %v287_v28 = vrot.slane %v285_v19, 5  ;;  %v289_v29 = vshrl.u32 %v2566_v15, 16  ;;  %v2571_v30 = vld [vmem:[%s3200_s26 + $0x30] sm:$0xf] }
  0x1c   : > { %v2612_v31 = vcombine.low %v2565_v10, %v2566_v15  ;;  %v300_v32 = vshrl.u32 %v2568_v20, 16  ;;  %v303_v33 = vshll.u32 %v2568_v20, 16  ;;  %v309_v34 = vshll.u32 %v2569_v25, 16  ;;  %v2572_v35 = vld [vmem:[%s3200_s26 + $0x34] sm:$0xf] }
  0x1d   : > { %v291_v36 = vrot.slane %v289_v29, 4  ;;  %v313_v37 = vshrl.u32 %v2569_v25, 16  ;;  %v2613_v38 = vcombine.low %v2568_v20, %v2569_v25  ;;  %v324_v39 = vshrl.u32 %v2571_v30, 16  ;;  %v2564_v44 = vld [vmem:[%s3200_s26 + $0x14] sm:$0x1] }
  0x1e   : > { %2885 = vmatmul.mubr.msk.bf16.vlgmr.msra.gmra.mxu0 %vm718_vm1, %v2612_v31  ;;  %v3218_v40 = vrot.slane %v300_v32, 4  ;;  %v3220_v41 = vrot.slane %v303_v33, 5  ;;  %v3222_v42 = vrot.slane %v309_v34, 5  ;;  %v327_v43 = vshll.u32 %v2571_v30, 16  ;;  %v2567_v49 = vld [vmem:[%s3200_s26 + $0x20] sm:$0x1] }
  0x1f   : > { %v3225_v45 = vrot.slane %v313_v37, 4  ;;  %2888 = vmatprep.mubr.msk.bf16.mxu0 %vm718_vm1, %v2613_v38  ;;  %v3228_v46 = vrot.slane %v324_v39, 4  ;;  %v333_v47 = vshll.u32 %v2572_v35, 16  ;;  %v337_v48 = vshrl.u32 %v2572_v35, 16  ;;  %2951 = vmatpush3.bf16.msra.mxu0 %v1723_v6  ;;  %v2574_v54 = vld [vmem:[%s3200_s26 + $0x3c] sm:$0xf] }
  0x20   : > { %v3231_v50 = vrot.slane %v327_v43, 5  ;;  %v2614_v51 = vcombine.low %v2571_v30, %v2572_v35  ;;  %v258_v52 = vor.u32 %v257_v22, %v254_v21  ;;  %v268_v53 = vor.u32 %v267_v24, %v263_v23  ;;  %v2575_v60 = vld [vmem:[%s3200_s26 + $0x40] sm:$0xf]  ;;  %v2577_v10 = vld [vmem:[%s3200_s26 + $0x48] sm:$0xf] }
  0x21   : > { %v3234_v55 = vrot.slane %v333_v47, 5  ;;  %v339_v56 = vrot.slane %v337_v48, 4  ;;  %v271_v58 = vshll.u32 %v2564_v44, 16  ;;  %v282_v59 = vor.u32 %v281_v27, %v278_v26  ;;  %v2578_v15 = vld [vmem:[%s3200_s26 + $0x4c] sm:$0xf] }
  0x22   : > { %v259_v61 = vrot.slane %v258_v52, 4  ;;  %v269_v62 = vrot.slane %v268_v53, 4  ;;  %v292_v63 = vor.u32 %v291_v36, %v287_v28  ;;  %v295_v0 = vshll.u32 %v2567_v49, 16  ;;  %v2570_v24 = vld [vmem:[%s3200_s26 + $0x2c] sm:$0x1] }
  0x23   : > { %v273_v1 = vrot.slane %v271_v58, 5  ;;  %v283_v2 = vrot.slane %v282_v59, 4  ;;  %v348_v3 = vshrl.u32 %v2574_v54, 16  ;;  %v351_v4 = vshll.u32 %v2574_v54, 16  ;;  %v2573_v29 = vld [vmem:[%s3200_s26 + $0x38] sm:$0x1] }
  0x24   : > { %v264_v5 = vsel %vm3238_vm4, %v259_v61, %v263_v23  ;;  %v293_v6 = vrot.slane %v292_v63, 4  ;;  %v297_v8 = vrot.slane %v295_v0, 5  ;;  %v357_v9 = vshll.u32 %v2575_v60, 16  ;;  %v2580_v34 = vld [vmem:[%s3200_s26 + $0x54] sm:$0xf] }
  0x25   : > { %v274_v11 = vsel %vm3238_vm4, %v269_v62, %v273_v1  ;;  %v288_v12 = vsel %vm3238_vm4, %v283_v2, %v287_v28  ;;  %v3250_v13 = vrot.slane %v348_v3, 4  ;;  %v3252_v14 = vrot.slane %v351_v4, 5  ;;  %v2581_v39 = vld [vmem:[%s3200_s26 + $0x58] sm:$0xf]  ;;  %v2576_v3 = vld [vmem:[%s3200_s26 + $0x44] sm:$0x1] }
  0x26   : > { %2889 = vmatmul.mubr.msk.bf16.gmra.mxu0 %vm718_vm1, %v2614_v51  ;;  %v2643_v16 = vcombine.low %v264_v5, %v274_v11  ;;  %v298_v17 = vsel %vm3238_vm4, %v293_v6, %v297_v8  ;;  %v3258_v18 = vrot.slane %v357_v9, 5  ;;  %v361_v19 = vshrl.u32 %v2575_v60, 16  ;;  %v2579_v8 = vld [vmem:[%s3200_s26 + $0x50] sm:$0x1] }
  0x27   : > { %v2644_v20 = vcombine.low %v288_v12, %v298_v17  ;;  %v2615_v21 = vcombine.low %v2574_v54, %v2575_v60  ;;  %v372_v22 = vshrl.u32 %v2577_v10, 16  ;;  %v375_v23 = vshll.u32 %v2577_v10, 16 }
  0x28   : > { %2918 = vmatprep.mubr.msk.bf16.mxu1 %vm718_vm1, %v2643_v16  ;;  %v3262_v25 = vrot.slane %v361_v19, 4  ;;  %v381_v26 = vshll.u32 %v2578_v15, 16  ;;  %v385_v27 = vshrl.u32 %v2578_v15, 16  ;;  %v2616_v28 = vcombine.low %v2577_v10, %v2578_v15  ;;  %v2586_v15 = vld [vmem:[%s3200_s26 + $0x6c] sm:$0xf] }
  0x29   : > { %2919 = vmatmul.mubr.msk.bf16.vlgmr.msra.gmra.mxu1 %vm718_vm1, %v2644_v20  ;;  %2892 = vmatprep.mubr.msk.bf16.mxu0 %vm718_vm1, %v2615_v21  ;;  %v374_v30 = vrot.slane %v372_v22, 4  ;;  %v377_v31 = vrot.slane %v375_v23, 5  ;;  %v306_v32 = vor.u32 %v3220_v41, %v3218_v40  ;;  %v316_v33 = vor.u32 %v3225_v45, %v3222_v42  ;;  %v2587_v21 = vld [vmem:[%s3200_s26 + $0x70] sm:$0xf] }
  0x2a   : > { %v3272_v35 = vrot.slane %v381_v26, 5  ;;  %v387_v36 = vrot.slane %v385_v27, 4  ;;  %v319_v37 = vshll.u32 %v2570_v24, 16  ;;  %v330_v38 = vor.u32 %v3231_v50, %v3228_v46  ;;  %2985 = vmatpush3.bf16.msra.mxu1 %v3206_v7  ;;  %v2583_v50 = vld [vmem:[%s3200_s26 + $0x60] sm:$0xf] }
  0x2b   : > { %v307_v43 = vrot.slane %v306_v32, 4  ;;  %v317_v44 = vrot.slane %v316_v33, 4  ;;  %v340_v47 = vor.u32 %v339_v56, %v3234_v55  ;;  %v343_v40 = vshll.u32 %v2573_v29, 16 }
  0x2c   : > { %v321_v41 = vrot.slane %v319_v37, 5  ;;  %v331_v45 = vrot.slane %v330_v38, 4  ;;  %v396_v48 = vshrl.u32 %v2580_v34, 16  ;;  %v399_v49 = vshll.u32 %v2580_v34, 16  ;;  %v2590_v38 = vld [vmem:[%s3200_s26 + $0x7c] sm:$0xf] }
  0x2d   : > { %v312_v51 = vsel %vm3238_vm4, %v307_v43, %v3222_v42  ;;  %v341_v52 = vrot.slane %v340_v47, 4  ;;  %v345_v53 = vrot.slane %v343_v40, 5  ;;  %v405_v46 = vshll.u32 %v2581_v39, 16  ;;  %v2584_v42 = vld [vmem:[%s3200_s26 + $0x64] sm:$0xf] }
  0x2e   : > { %2893 = vmatmul.mubr.msk.bf16.gmra.mxu0 %vm718_vm1, %v2616_v28  ;;  %v322_v7 = vsel %vm3238_vm4, %v317_v44, %v321_v41  ;;  %v336_v54 = vsel %vm3238_vm4, %v331_v45, %v3234_v55  ;;  %v3289_v56 = vrot.slane %v396_v48, 4  ;;  %v3291_v58 = vrot.slane %v399_v49, 5  ;;  %v2582_v48 = vld [vmem:[%s3200_s26 + $0x5c] sm:$0x1] }
  0x2f   : > { %v2645_v59 = vcombine.low %v312_v51, %v322_v7  ;;  %v346_v60 = vsel %vm3238_vm4, %v341_v52, %v345_v53  ;;  %v3296_v61 = vrot.slane %v405_v46, 5  ;;  %v409_v62 = vshrl.u32 %v2581_v39, 16  ;;  %v2585_v53 = vld [vmem:[%s3200_s26 + $0x68] sm:$0x1] }
  0x30   : > { %v2646_v63 = vcombine.low %v336_v54, %v346_v60  ;;  %v2617_v0 = vcombine.low %v2580_v34, %v2581_v39  ;;  %v420_v1 = vshrl.u32 %v2583_v50, 16  ;;  %v423_v2 = vshll.u32 %v2583_v50, 16 }
  0x31   : > { %2922 = vmatprep.mubr.msk.bf16.mxu1 %vm718_vm1, %v2645_v59  ;;  %v3300_v55 = vrot.slane %v409_v62, 4  ;;  %v429_v4 = vshll.u32 %v2584_v42, 16  ;;  %v433_v5 = vshrl.u32 %v2584_v42, 16  ;;  %v2618_v6 = vcombine.low %v2583_v50, %v2584_v42  ;;  %v2592_v42 = vld [vmem:[%s3200_s26 + $0x84] sm:$0xf] }
  0x32   : > { %2923 = vmatmul.mubr.msk.bf16.gmra.mxu1 %vm718_vm1, %v2646_v63  ;;  %2896 = vmatprep.mubr.msk.bf16.mxu0 %vm718_vm1, %v2617_v0  ;;  %v422_v9 = vrot.slane %v420_v1, 4  ;;  %v425_v10 = vrot.slane %v423_v2, 5  ;;  %v354_v11 = vor.u32 %v3252_v14, %v3250_v13  ;;  %v364_v12 = vor.u32 %v3262_v25, %v3258_v18  ;;  %v2593_v0 = vld [vmem:[%s3200_s26 + $0x88] sm:$0xf] }
  0x33   : > { %v3310_v16 = vrot.slane %v429_v4, 5  ;;  %v435_v17 = vrot.slane %v433_v5, 4  ;;  %v367_v19 = vshll.u32 %v2576_v3, 16  ;;  %v378_v20 = vor.u32 %v377_v31, %v374_v30  ;;  %v2589_v31 = vld [vmem:[%s3200_s26 + $0x78] sm:$0xf] }
  0x34   : > { %v355_v22 = vrot.slane %v354_v11, 4  ;;  %v365_v23 = vrot.slane %v364_v12, 4  ;;  %v388_v24 = vor.u32 %v387_v36, %v3272_v35  ;;  %v391_v26 = vshll.u32 %v2579_v8, 16  ;;  %v2595_v11 = vld [vmem:[%s3200_s26 + $0x90] sm:$0xf] }
  0x35   : > { %v369_v27 = vrot.slane %v367_v19, 5  ;;  %v379_v28 = vrot.slane %v378_v20, 4  ;;  %v444_v13 = vshrl.u32 %v2586_v15, 16  ;;  %v447_v14 = vshll.u32 %v2586_v15, 16  ;;  %v2596_v20 = vld [vmem:[%s3200_s26 + $0x94] sm:$0xf] }
  0x36   : > { %2897 = vmatmul.mubr.msk.bf16.gmra.mxu0 %vm718_vm1, %v2618_v6  ;;  %v360_v25 = vsel %vm3238_vm4, %v355_v22, %v3258_v18  ;;  %v389_v29 = vrot.slane %v388_v24, 4  ;;  %v393_v32 = vrot.slane %v391_v26, 5  ;;  %v453_v30 = vshll.u32 %v2587_v21, 16  ;;  %v2588_v24 = vld [vmem:[%s3200_s26 + $0x74] sm:$0x1] }
  0x37   : > { %v370_v33 = vsel %vm3238_vm4, %v365_v23, %v369_v27  ;;  %v384_v34 = vsel %vm3238_vm4, %v379_v28, %v3272_v35  ;;  %v3324_v36 = vrot.slane %v444_v13, 4  ;;  %v3326_v37 = vrot.slane %v447_v14, 5  ;;  %v2591_v26 = vld [vmem:[%s3200_s26 + $0x80] sm:$0x1] }
  0x38   : > { %v2647_v39 = vcombine.low %v360_v25, %v370_v33  ;;  %v394_v18 = vsel %vm3238_vm4, %v389_v29, %v393_v32  ;;  %v3331_v43 = vrot.slane %v453_v30, 5  ;;  %v457_v44 = vshrl.u32 %v2587_v21, 16 }
  0x39   : > { %v2648_v47 = vcombine.low %v384_v34, %v394_v18  ;;  %v2619_v40 = vcombine.low %v2586_v15, %v2587_v21  ;;  %v468_v41 = vshrl.u32 %v2589_v31, 16  ;;  %v471_v45 = vshll.u32 %v2589_v31, 16 }
  0x3a   : > { %2926 = vmatprep.mubr.msk.bf16.mxu1 %vm718_vm1, %v2647_v39  ;;  %v3335_v35 = vrot.slane %v457_v44, 4  ;;  %v477_v49 = vshll.u32 %v2590_v38, 16  ;;  %v481_v51 = vshrl.u32 %v2590_v38, 16  ;;  %v2620_v52 = vcombine.low %v2589_v31, %v2590_v38  ;;  %v2598_v38 = vld [vmem:[%s3200_s26 + $0x9c] sm:$0xf] }
  0x3b   : > { %2927 = vmatmul.mubr.msk.bf16.gmra.mxu1 %vm718_vm1, %v2648_v47  ;;  %2900 = vmatprep.mubr.msk.bf16.mxu0 %vm718_vm1, %v2619_v40  ;;  %v470_v46 = vrot.slane %v468_v41, 4  ;;  %v473_v50 = vrot.slane %v471_v45, 5  ;;  %v402_v7 = vor.u32 %v3291_v58, %v3289_v56  ;;  %v412_v54 = vor.u32 %v3300_v55, %v3296_v61  ;;  %v2599_v40 = vld [vmem:[%s3200_s26 + $0xa0] sm:$0xf] }
  0x3c   : > { %v3345_v59 = vrot.slane %v477_v49, 5  ;;  %v483_v60 = vrot.slane %v481_v51, 4  ;;  %v415_v62 = vshll.u32 %v2582_v48, 16  ;;  %v426_v63 = vor.u32 %v425_v10, %v422_v9 }
  0x3d   : > { %v403_v1 = vrot.slane %v402_v7, 4  ;;  %v413_v2 = vrot.slane %v412_v54, 4  ;;  %v436_v3 = vor.u32 %v435_v17, %v3310_v16  ;;  %v439_v4 = vshll.u32 %v2585_v53, 16 }
  0x3e   : > { %2901 = vmatmul.mubr.msk.bf16.gmra.mxu0 %vm718_vm1, %v2620_v52  ;;  %v417_v56 = vrot.slane %v415_v62, 5  ;;  %v427_v58 = vrot.slane %v426_v63, 4  ;;  %v492_v5 = vshrl.u32 %v2592_v42, 16  ;;  %v495_v55 = vshll.u32 %v2592_v42, 16  ;;  %v2602_v63 = vld [vmem:[%s3200_s26 + $0xac] sm:$0xf] }
  0x3f   : > { %v408_v6 = vsel %vm3238_vm4, %v403_v1, %v3296_v61  ;;  %v437_v8 = vrot.slane %v436_v3, 4  ;;  %v441_v9 = vrot.slane %v439_v4, 5  ;;  %v501_v10 = vshll.u32 %v2593_v0, 16 }
  0x40   : > { %v418_v12 = vsel %vm3238_vm4, %v413_v2, %v417_v56  ;;  %v432_v15 = vsel %vm3238_vm4, %v427_v58, %v3310_v16  ;;  %v3359_v17 = vrot.slane %v492_v5, 4  ;;  %v3361_v19 = vrot.slane %v495_v55, 5  ;;  %v2594_v5 = vld [vmem:[%s3200_s26 + $0x8c] sm:$0x1] }
  0x41   : > { %v2649_v21 = vcombine.low %v408_v6, %v418_v12  ;;  %v442_v61 = vsel %vm3238_vm4, %v437_v8, %v441_v9  ;;  %v3366_v22 = vrot.slane %v501_v10, 5  ;;  %v505_v23 = vshrl.u32 %v2593_v0, 16  ;;  %v2597_v9 = vld [vmem:[%s3200_s26 + $0x98] sm:$0x1] }
  0x42   : > { %v2650_v27 = vcombine.low %v432_v15, %v442_v61  ;;  %v2621_v28 = vcombine.low %v2592_v42, %v2593_v0  ;;  %v516_v13 = vshrl.u32 %v2595_v11, 16  ;;  %v519_v14 = vshll.u32 %v2595_v11, 16 }
  0x43   : > { %2930 = vmatprep.mubr.msk.bf16.mxu1 %vm718_vm1, %v2649_v21  ;;  %v3371_v16 = vrot.slane %v505_v23, 4  ;;  %v525_v25 = vshll.u32 %v2596_v20, 16  ;;  %v529_v29 = vshrl.u32 %v2596_v20, 16  ;;  %v2622_v32 = vcombine.low %v2595_v11, %v2596_v20  ;;  %v2604_v20 = vld [vmem:[%s3200_s26 + $0xb4] sm:$0xf] }
  0x44   : > { %2931 = vmatmul.mubr.msk.bf16.gmra.mxu1 %vm718_vm1, %v2650_v27  ;;  %2904 = vmatprep.mubr.msk.bf16.mxu0 %vm718_vm1, %v2621_v28  ;;  %v3375_v30 = vrot.slane %v516_v13, 4  ;;  %v521_v31 = vrot.slane %v519_v14, 5  ;;  %v450_v33 = vor.u32 %v3326_v37, %v3324_v36  ;;  %v460_v34 = vor.u32 %v3335_v35, %v3331_v43 }
  0x45   : > { %v3382_v39 = vrot.slane %v525_v25, 5  ;;  %v3384_v18 = vrot.slane %v529_v29, 4  ;;  %v463_v44 = vshll.u32 %v2588_v24, 16  ;;  %v474_v47 = vor.u32 %v473_v50, %v470_v46  ;;  %v2601_v50 = vld [vmem:[%s3200_s26 + $0xa8] sm:$0xf] }
  0x46   : > { %2905 = vmatmul.mubr.msk.bf16.gmra.mxu0 %vm718_vm1, %v2622_v32  ;;  %v451_v41 = vrot.slane %v450_v33, 4  ;;  %v461_v45 = vrot.slane %v460_v34, 4  ;;  %v484_v48 = vor.u32 %v483_v60, %v3345_v59  ;;  %v487_v36 = vshll.u32 %v2591_v26, 16  ;;  %v2605_v26 = vld [vmem:[%s3200_s26 + $0xb8] sm:$0xf] }
  0x47   : > { %v465_v37 = vrot.slane %v463_v44, 5  ;;  %v475_v49 = vrot.slane %v474_v47, 4  ;;  %v540_v35 = vshrl.u32 %v2598_v38, 16  ;;  %v543_v51 = vshll.u32 %v2598_v38, 16  ;;  %v2608_v32 = vld [vmem:[%s3200_s26 + $0xc4] sm:$0xf] }
  0x48   : > { %v456_v52 = vsel %vm3238_vm4, %v451_v41, %v3331_v43  ;;  %v485_v53 = vrot.slane %v484_v48, 4  ;;  %v489_v7 = vrot.slane %v487_v36, 5  ;;  %v549_v46 = vshll.u32 %v2599_v40, 16 }
  0x49   : > { %v466_v54 = vsel %vm3238_vm4, %v461_v45, %v465_v37  ;;  %v480_v42 = vsel %vm3238_vm4, %v475_v49, %v3345_v59  ;;  %v3398_v60 = vrot.slane %v540_v35, 4  ;;  %v3400_v62 = vrot.slane %v543_v51, 5  ;;  %v2600_v35 = vld [vmem:[%s3200_s26 + $0xa4] sm:$0x1]  ;;  %v2603_v51 = vld [vmem:[%s3200_s26 + $0xb0] sm:$0x1] }
  0x4a   : > { %v2651_v0 = vcombine.low %v456_v52, %v466_v54  ;;  %v490_v43 = vsel %vm3238_vm4, %v485_v53, %v489_v7  ;;  %v3405_v1 = vrot.slane %v549_v46, 5  ;;  %v553_v2 = vshrl.u32 %v2599_v40, 16  ;;  %v1192_v46 = vld [vmem:[%s3200_s26] sm:$0xf] }
  0x4b   : > { %v2652_v3 = vcombine.low %v480_v42, %v490_v43  ;;  %v2623_v4 = vcombine.low %v2598_v38, %v2599_v40  ;;  %v564_v56 = vshrl.u32 %v2601_v50, 16  ;;  %v567_v58 = vshll.u32 %v2601_v50, 16 }
  0x4c   : > { %2934 = vmatprep.mubr.msk.bf16.mxu1 %vm718_vm1, %v2651_v0  ;;  %v3409_v59 = vrot.slane %v553_v2, 4  ;;  %v573_v55 = vshll.u32 %v2602_v63, 16  ;;  %v577_v6 = vshrl.u32 %v2602_v63, 16  ;;  %v2624_v8 = vcombine.low %v2601_v50, %v2602_v63  ;;  %v1193_v0 = vld [vmem:[%s3200_s26 + $0x4] sm:$0xf] }
  0x4d   : > { %2935 = vmatmul.mubr.msk.bf16.gmra.mxu1 %vm718_vm1, %v2652_v3  ;;  %2908 = vmatprep.mubr.msk.bf16.mxu0 %vm718_vm1, %v2623_v4  ;;  %v566_v10 = vrot.slane %v564_v56, 4  ;;  %v569_v11 = vrot.slane %v567_v58, 5  ;;  %v498_v12 = vor.u32 %v3361_v19, %v3359_v17  ;;  %v508_v15 = vor.u32 %v3371_v16, %v3366_v22  ;;  %v2607_v19 = vld [vmem:[%s3200_s26 + $0xc0] sm:$0xf] }
  0x4e   : > { %v3419_v21 = vrot.slane %v573_v55, 5  ;;  %v579_v61 = vrot.slane %v577_v6, 4  ;;  %2909 = vmatmul.mubr.msk.bf16.gmra.mxu0 %vm718_vm1, %v2624_v8  ;;  %v511_v23 = vshll.u32 %v2594_v5, 16  ;;  %v522_v24 = vor.u32 %v521_v31, %v3375_v30 }
  0x4f   : > { %v499_v27 = vrot.slane %v498_v12, 4  ;;  %v509_v28 = vrot.slane %v508_v15, 4  ;;  %v532_v13 = vor.u32 %v3384_v18, %v3382_v39  ;;  %v535_v17 = vshll.u32 %v2597_v9, 16  ;;  %v1194_v15 = vld [vmem:[%s3200_s26 + $0x8] sm:$0x1] }
  0x50   : > { %v513_v14 = vrot.slane %v511_v23, 5  ;;  %v523_v16 = vrot.slane %v522_v24, 4  ;;  %v588_v25 = vshrl.u32 %v2604_v20, 16  ;;  %v591_v29 = vshll.u32 %v2604_v20, 16  ;;  %v2606_v24 = vld [vmem:[%s3200_s26 + $0xbc] sm:$0x1] }
  0x51   : > { %v504_v33 = vsel %vm3238_vm4, %v499_v27, %v3366_v22  ;;  %v533_v34 = vrot.slane %v532_v13, 4  ;;  %v537_v30 = vrot.slane %v535_v17, 5  ;;  %v597_v31 = vshll.u32 %v2605_v26, 16  ;;  %v1196_v17 = vld [vmem:[%s3200_s26 + $0x10] sm:$0xf] }
  0x52   : > { %v514_v38 = vsel %vm3238_vm4, %v509_v28, %v513_v14  ;;  %v528_v18 = vsel %vm3238_vm4, %v523_v16, %v3382_v39  ;;  %v3436_v44 = vrot.slane %v588_v25, 4  ;;  %v3438_v47 = vrot.slane %v591_v29, 5  ;;  %v1197_v29 = vld [vmem:[%s3200_s26 + $0x14] sm:$0x1] }
  0x53   : > { %v2653_v40 = vcombine.low %v504_v33, %v514_v38  ;;  %v538_v22 = vsel %vm3238_vm4, %v533_v34, %v537_v30  ;;  %v3442_v41 = vrot.slane %v597_v31, 5  ;;  %v601_v45 = vshrl.u32 %v2605_v26, 16 }
  0x54   : > { %v2654_v48 = vcombine.low %v528_v18, %v538_v22  ;;  %v2625_v36 = vcombine.low %v2604_v20, %v2605_v26  ;;  %v612_v37 = vshrl.u32 %v2607_v19, 16  ;;  %v615_v49 = vshll.u32 %v2607_v19, 16  ;;  %v1195_v26 = vld [vmem:[%s3200_s26 + $0xc] sm:$0xf] }
  0x55   : > { %2938 = vmatprep.mubr.msk.bf16.mxu1 %vm718_vm1, %v2653_v40  ;;  %v603_v39 = vrot.slane %v601_v45, 4  ;;  %v621_v52 = vshll.u32 %v2608_v32, 16  ;;  %v625_v53 = vshrl.u32 %v2608_v32, 16  ;;  %v2626_v7 = vcombine.low %v2607_v19, %v2608_v32 }
  0x56   : > { %2939 = vmatmul.mubr.msk.bf16.gmra.mxu1 %vm718_vm1, %v2654_v48  ;;  %2912 = vmatprep.mubr.msk.bf16.mxu0 %vm718_vm1, %v2625_v36  ;;  %v3450_v50 = vrot.slane %v612_v37, 4  ;;  %v3452_v54 = vrot.slane %v615_v49, 5  ;;  %v546_v42 = vor.u32 %v3400_v62, %v3398_v60  ;;  %v556_v63 = vor.u32 %v3409_v59, %v3405_v1 }
  0x57   : > { %v3459_v43 = vrot.slane %v621_v52, 5  ;;  %v3461_v2 = vrot.slane %v625_v53, 4  ;;  %2913 = vmatmul.mubr.msk.bf16.gmra.mxu0 %vm718_vm1, %v2626_v7  ;;  %v559_v3 = vshll.u32 %v2600_v35, 16  ;;  %v570_v4 = vor.u32 %v569_v11, %v566_v10  ;;  %v2609_v52 = vld [vmem:[%s3200_s26 + $0xc8] sm:$0x1] }
  0x58   : > { %v547_v56 = vrot.slane %v546_v42, 4  ;;  %v557_v58 = vrot.slane %v556_v63, 4  ;;  %v580_v5 = vor.u32 %v579_v61, %v3419_v21  ;;  %v583_v60 = vshll.u32 %v2603_v51, 16  ;;  %v1198_v63 = vld [vmem:[%s3200_s26 + $0x18] sm:$0xf] }
  0x59   : > { %v561_v62 = vrot.slane %v559_v3, 5  ;;  %v571_v55 = vrot.slane %v570_v4, 4  ;;  %v1241_v59 = vshrl.u32 %v1192_v46, 16  ;;  %v1244_v6 = vshll.u32 %v1192_v46, 16 }
  0x5a   : > { %v552_v8 = vsel %vm3238_vm4, %v547_v56, %v3405_v1  ;;  %v581_v9 = vrot.slane %v580_v5, 4  ;;  %v585_v12 = vrot.slane %v583_v60, 5  ;;  %v1250_v10 = vshll.u32 %v1193_v0, 16  ;;  %v1201_v5 = vld [vmem:[%s3200_s26 + $0x24] sm:$0xf] }
  0x5b   : > { %v562_v11 = vsel %vm3238_vm4, %v557_v58, %v561_v62  ;;  %v576_v20 = vsel %vm3238_vm4, %v571_v55, %v3419_v21  ;;  %v1243_v61 = vrot.slane %v1241_v59, 4  ;;  %v1246_v23 = vrot.slane %v1244_v6, 5  ;;  %v1200_v58 = vld [vmem:[%s3200_s26 + $0x20] sm:$0x1] }
  0x5c   : > { %v2655_v27 = vcombine.low %v552_v8, %v562_v11  ;;  %v586_v1 = vsel %vm3238_vm4, %v581_v9, %v585_v12  ;;  %v1252_v28 = vrot.slane %v1250_v10, 5  ;;  %v1254_v13 = vshrl.u32 %v1193_v0, 16  ;;  %v1199_v0 = vld [vmem:[%s3200_s26 + $0x1c] sm:$0xf] }
  0x5d   : > { %v2656_v19 = vcombine.low %v576_v20, %v586_v1  ;;  %v1247_v14 = vor.u32 %v1246_v23, %v1243_v61  ;;  %v1260_v16 = vshll.u32 %v1194_v15, 16  ;;  %v594_v25 = vor.u32 %v3438_v47, %v3436_v44 }
  0x5e   : > { %2942 = vmatprep.mubr.msk.bf16.mxu1 %vm718_vm1, %v2655_v27  ;;  %v1256_v21 = vrot.slane %v1254_v13, 4  ;;  %v604_v32 = vor.u32 %v603_v39, %v3442_v41  ;;  %v607_v33 = vshll.u32 %v2606_v24, 16  ;;  %v1265_v34 = vshrl.u32 %v1195_v26, 16  ;;  %v1202_v27 = vld [vmem:[%s3200_s26 + $0x28] sm:$0xf] }
  0x5f   : > { %2943 = vmatmul.mubr.msk.bf16.gmra.mxu1 %vm718_vm1, %v2656_v19  ;;  %v1248_v30 = vrot.slane %v1247_v14, 4  ;;  %v1262_v31 = vrot.slane %v1260_v16, 5  ;;  %v595_v38 = vrot.slane %v594_v25, 4  ;;  %v1268_v18 = vshll.u32 %v1195_v26, 16  ;;  %v1203_v14 = vld [vmem:[%s3200_s26 + $0x2c] sm:$0x1] }
  0x60   : > { %v1257_v40 = vor.u32 %v1256_v21, %v1252_v28  ;;  %v605_v22 = vrot.slane %v604_v32, 4  ;;  %v609_v45 = vrot.slane %v607_v33, 5  ;;  %v1267_v44 = vrot.slane %v1265_v34, 4  ;;  %v1204_v16 = vld [vmem:[%s3200_s26 + $0x30] sm:$0xf] }
  0x61   : > { %v1253_v47 = vsel %vm3238_vm4, %v1248_v30, %v1252_v28  ;;  %v600_v48 = vsel %vm3238_vm4, %v595_v38, %v3442_v41  ;;  %v1270_v36 = vrot.slane %v1268_v18, 5  ;;  %v1274_v37 = vshll.u32 %v1196_v17, 16  ;;  %v3081_v28 = vld [vmem:[%s3200_s26] sm:$0xff]   ;;  %v1205_v33 = vld [vmem:[%s3200_s26 + $0x34] sm:$0xf] }
  0x62   : > { %v1258_v49 = vrot.slane %v1257_v40, 4  ;;  %v610_v35 = vsel %vm3238_vm4, %v605_v22, %v609_v45  ;;  %v1278_v51 = vshrl.u32 %v1196_v17, 16  ;;  %v1284_v39 = vshll.u32 %v1197_v29, 16  ;;  %v1206_v18 = vld [vmem:[%s3200_s26 + $0x38] sm:$0x1] }
  0x63   : > { %v2657_v53 = vcombine.low %v600_v48, %v610_v35  ;;  %v1271_v7 = vor.u32 %v1270_v36, %v1267_v44  ;;  %v1276_v46 = vrot.slane %v1274_v37, 5  ;;  %v618_v42 = vor.u32 %v3452_v54, %v3450_v50  ;;  %v3082_v35 = vld [vmem:[%s3200_s26 + $0xc] sm:$0xff]  }
  0x64   : > { %v1263_v41 = vsel %vm3238_vm4, %v1258_v49, %v1262_v31  ;;  %v1280_v3 = vrot.slane %v1278_v51, 4  ;;  %v1286_v4 = vrot.slane %v1284_v39, 5  ;;  %v628_v56 = vor.u32 %v3461_v2, %v3459_v43 }
  0x65   : > { %v2676_v60 = vcombine.low %v1253_v47, %v1263_v41  ;;  %2946 = vmatprep.mubr.msk.bf16.mxu1 %vm718_vm1, %v2657_v53  ;;  %v1272_v62 = vrot.slane %v1271_v7, 4  ;;  %v619_v55 = vrot.slane %v618_v42, 4  ;;  %v631_v59 = vshll.u32 %v2609_v52, 16  ;;  %v1207_v47 = vld [vmem:[%s3200_s26 + $0x3c] sm:$0xf] }
  0x66   : > { %v1281_v6 = vor.u32 %v1280_v3, %v1276_v46  ;;  %v629_v50 = vrot.slane %v628_v56, 4  ;;  %v1289_v54 = vshrl.u32 %v1198_v63, 16  ;;  %v1292_v8 = vshll.u32 %v1198_v63, 16  ;;  %v1208_v7 = vld [vmem:[%s3200_s26 + $0x40] sm:$0xf] }
  0x67   : > { %2952 = vmatprep.mubr.msk.bf16.mxu0 %vm718_vm1, %v2676_v60  ;;  %v1277_v9 = vsel %vm3238_vm4, %v1272_v62, %v1276_v46  ;;  %v624_v2 = vsel %vm3238_vm4, %v619_v55, %v3459_v43  ;;  %v633_v12 = vrot.slane %v631_v59, 5  ;;  %v1298_v15 = vshll.u32 %v1199_v0, 16  ;;  %v3083_v46 = vld [vmem:[%s3200_s26 + $0x18] sm:$0xff]   ;;  %v1209_v55 = vld [vmem:[%s3200_s26 + $0x44] sm:$0x1] }
  0x68   : > { %v1282_v10 = vrot.slane %v1281_v6, 4  ;;  %v1291_v11 = vrot.slane %v1289_v54, 4  ;;  %v1294_v20 = vrot.slane %v1292_v8, 5  ;;  %v1302_v61 = vshrl.u32 %v1199_v0, 16 }
  0x69   : > { %v634_v23 = vsel %vm3238_vm4, %v629_v50, %v633_v12  ;;  %v1300_v24 = vrot.slane %v1298_v15, 5  ;;  %v1308_v26 = vshll.u32 %v1200_v58, 16  ;;  %v1313_v1 = vshrl.u32 %v1201_v5, 16 }
  0x6a   : > { %v1287_v43 = vsel %vm3238_vm4, %v1282_v10, %v1286_v4  ;;  %v2658_v13 = vcombine.low %v624_v2, %v634_v23  ;;  %v1295_v17 = vor.u32 %v1294_v20, %v1291_v11  ;;  %v1304_v19 = vrot.slane %v1302_v61, 4  ;;  %v1211_v11 = vld [vmem:[%s3200_s26 + $0x4c] sm:$0xf] }
  0x6b   : > { %v2677_v25 = vcombine.low %v1277_v9, %v1287_v43  ;;  %v1310_v29 = vrot.slane %v1308_v26, 5  ;;  %v1315_v21 = vrot.slane %v1313_v1, 4  ;;  %v1316_v32 = vshll.u32 %v1201_v5, 16  ;;  %v1210_v9 = vld [vmem:[%s3200_s26 + $0x48] sm:$0xf] }
  0x6c   : > { %2947 = vmatmul.mubr.msk.bf16.gmra.mxu1 %vm718_vm1, %v2658_v13  ;;  %v1296_v34 = vrot.slane %v1295_v17, 4  ;;  %v1305_v30 = vor.u32 %v1304_v19, %v1300_v24  ;;  %v1322_v31 = vshll.u32 %v1202_v27, 16  ;;  %v1326_v38 = vshrl.u32 %v1202_v27, 16 }
  0x6d   : > { %2953 = vmatmul.mubr.msk.bf16.vlgmr.msra.gmra.mxu0 %vm718_vm1, %v2677_v25  ;;  %v1318_v40 = vrot.slane %v1316_v32, 5  ;;  %v1332_v22 = vshll.u32 %v1203_v14, 16  ;;  %2986 = vmatprep.mubr.msk.bf16.mxu1 %vm718_vm1, %v3081_v28  ;;  %v1337_v45 = vshrl.u32 %v1204_v16, 16  ;;  %v1340_v44 = vshll.u32 %v1204_v16, 16  ;;  %v1212_v28 = vld [vmem:[%s3200_s26 + $0x50] sm:$0x1] }
  0x6e   : > { %v1301_v48 = vsel %vm3238_vm4, %v1296_v34, %v1300_v24  ;;  %v1306_v36 = vrot.slane %v1305_v30, 4  ;;  %v1324_v37 = vrot.slane %v1322_v31, 5  ;;  %v1328_v49 = vrot.slane %v1326_v38, 4  ;;  %v1213_v16 = vld [vmem:[%s3200_s26 + $0x54] sm:$0xf] }
  0x6f   : > { %v1319_v51 = vor.u32 %v1318_v40, %v1315_v21  ;;  %v1334_v39 = vrot.slane %v1332_v22, 5  ;;  %v1339_v52 = vrot.slane %v1337_v45, 4  ;;  %v1342_v53 = vrot.slane %v1340_v44, 5  ;;  %v3084_v21 = vld [vmem:[%s3200_s26 + $0x24] sm:$0xff]   ;;  %v3085_v40 = vld [vmem:[%s3200_s26 + $0x30] sm:$0xff]  }
  0x70   : > { %v1311_v42 = vsel %vm3238_vm4, %v1306_v36, %v1310_v29  ;;  %v1329_v63 = vor.u32 %v1328_v49, %v1324_v37  ;;  %v1346_v0 = vshll.u32 %v1205_v33, 16  ;;  %v1350_v41 = vshrl.u32 %v1205_v33, 16  ;;  %v1215_v49 = vld [vmem:[%s3200_s26 + $0x5c] sm:$0x1] }
  0x71   : > { %v2678_v3 = vcombine.low %v1301_v48, %v1311_v42  ;;  %v1320_v4 = vrot.slane %v1319_v51, 4  ;;  %v1343_v56 = vor.u32 %v1342_v53, %v1339_v52  ;;  %v1356_v58 = vshll.u32 %v1206_v18, 16  ;;  %v1214_v18 = vld [vmem:[%s3200_s26 + $0x58] sm:$0xf] }
  0x72   : > { %v1330_v5 = vrot.slane %v1329_v63, 4  ;;  %v1348_v60 = vrot.slane %v1346_v0, 5  ;;  %v1352_v62 = vrot.slane %v1350_v41, 4  ;;  %v1361_v59 = vshrl.u32 %v1207_v47, 16  ;;  %v1217_v41 = vld [vmem:[%s3200_s26 + $0x64] sm:$0xf] }
  0x73   : > { %2956 = vmatprep.mubr.msk.bf16.mxu0 %vm718_vm1, %v2678_v3  ;;  %v1325_v6 = vsel %vm3238_vm4, %v1320_v4, %v1324_v37  ;;  %v1344_v50 = vrot.slane %v1343_v56, 4  ;;  %v1358_v54 = vrot.slane %v1356_v58, 5  ;;  %v1364_v8 = vshll.u32 %v1207_v47, 16 }
  0x74   : > { %v1335_v2 = vsel %vm3238_vm4, %v1330_v5, %v1334_v39  ;;  %2987 = vmatmul.mubr.msk.bf16.vlgmr.msra.gmra.mxu1 %vm718_vm1, %v3082_v35  ;;  %v1353_v12 = vor.u32 %v1352_v62, %v1348_v60  ;;  %v1363_v15 = vrot.slane %v1361_v59, 4  ;;  %v1370_v10 = vshll.u32 %v1208_v7, 16 }
  0x75   : > { %v2679_v20 = vcombine.low %v1325_v6, %v1335_v2  ;;  %v1349_v61 = vsel %vm3238_vm4, %v1344_v50, %v1348_v60  ;;  %v1366_v23 = vrot.slane %v1364_v8, 5  ;;  %v1374_v24 = vshrl.u32 %v1208_v7, 16  ;;  %2990 = vmatprep.mubr.msk.bf16.mxu1 %vm718_vm1, %v3083_v46  ;;  %v1216_v7 = vld [vmem:[%s3200_s26 + $0x60] sm:$0xf]  ;;  %v1219_v2 = vld [vmem:[%s3200_s26 + $0x6c] sm:$0xf] }
  0x76   : > { %v1354_v26 = vrot.slane %v1353_v12, 4  ;;  %v1372_v27 = vrot.slane %v1370_v10, 5  ;;  %v1380_v1 = vshll.u32 %v1209_v55, 16  ;;  %v1385_v43 = vshrl.u32 %v1210_v9, 16  ;;  %v1218_v55 = vld [vmem:[%s3200_s26 + $0x68] sm:$0x1] }
  0x77   : > { %2957 = vmatmul.mubr.msk.bf16.gmra.mxu0 %vm718_vm1, %v2679_v20  ;;  %v1367_v13 = vor.u32 %v1366_v23, %v1363_v15  ;;  %v1376_v17 = vrot.slane %v1374_v24, 4  ;;  %v1388_v19 = vshll.u32 %v1210_v9, 16  ;;  %v1394_v14 = vshll.u32 %v1211_v11, 16  ;;  %v1220_v20 = vld [vmem:[%s3200_s26 + $0x70] sm:$0xf] }
  0x78   : > { %v1359_v25 = vsel %vm3238_vm4, %v1354_v26, %v1358_v54  ;;  %v1382_v29 = vrot.slane %v1380_v1, 5  ;;  %v1387_v32 = vrot.slane %v1385_v43, 4  ;;  %v1398_v33 = vshrl.u32 %v1211_v11, 16  ;;  %v3086_v54 = vld [vmem:[%s3200_s26 + $0x3c] sm:$0xff]   ;;  %v1221_v43 = vld [vmem:[%s3200_s26 + $0x74] sm:$0x1] }
  0x79   : > { %v2680_v34 = vcombine.low %v1349_v61, %v1359_v25  ;;  %v1368_v30 = vrot.slane %v1367_v13, 4  ;;  %v1377_v31 = vor.u32 %v1376_v17, %v1372_v27  ;;  %v1390_v38 = vrot.slane %v1388_v19, 5  ;;  %v3087_v61 = vld [vmem:[%s3200_s26 + $0x48] sm:$0xff]  }
  0x7a   : > { %v1396_v22 = vrot.slane %v1394_v14, 5  ;;  %v1400_v45 = vrot.slane %v1398_v33, 4  ;;  %v1404_v44 = vshll.u32 %v1212_v28, 16  ;;  %v1409_v47 = vshrl.u32 %v1213_v16, 16 }
  0x7b   : > { %2960 = vmatprep.mubr.msk.bf16.mxu0 %vm718_vm1, %v2680_v34  ;;  %v1373_v48 = vsel %vm3238_vm4, %v1368_v30, %v1372_v27  ;;  %v1378_v36 = vrot.slane %v1377_v31, 4  ;;  %v1391_v37 = vor.u32 %v1390_v38, %v1387_v32  ;;  %v1412_v35 = vshll.u32 %v1213_v16, 16  ;;  %v1223_v30 = vld [vmem:[%s3200_s26 + $0x7c] sm:$0xf] }
  0x7c   : > { %2991 = vmatmul.mubr.msk.bf16.gmra.mxu1 %vm718_vm1, %v3084_v21  ;;  %v1401_v51 = vor.u32 %v1400_v45, %v1396_v22  ;;  %v1406_v39 = vrot.slane %v1404_v44, 5  ;;  %v1411_v52 = vrot.slane %v1409_v47, 4  ;;  %v1418_v53 = vshll.u32 %v1214_v18, 16 }
  0x7d   : > { %v1383_v46 = vsel %vm3238_vm4, %v1378_v36, %v1382_v29  ;;  %v1392_v42 = vrot.slane %v1391_v37, 4  ;;  %v1414_v63 = vrot.slane %v1412_v35, 5  ;;  %v1422_v0 = vshrl.u32 %v1214_v18, 16  ;;  %2994 = vmatprep.mubr.msk.bf16.mxu1 %vm718_vm1, %v3085_v40  ;;  %v1222_v29 = vld [vmem:[%s3200_s26 + $0x78] sm:$0xf] }
  0x7e   : > { %v2681_v3 = vcombine.low %v1373_v48, %v1383_v46  ;;  %v1402_v4 = vrot.slane %v1401_v51, 4  ;;  %v1420_v56 = vrot.slane %v1418_v53, 5  ;;  %v1428_v58 = vshll.u32 %v1215_v49, 16  ;;  %v3088_v37 = vld [vmem:[%s3200_s26 + $0x54] sm:$0xff]   ;;  %v1224_v49 = vld [vmem:[%s3200_s26 + $0x80] sm:$0x1] }
  0x7f   : > { %v1397_v5 = vsel %vm3238_vm4, %v1392_v42, %v1396_v22  ;;  %v1415_v60 = vor.u32 %v1414_v63, %v1411_v52  ;;  %v1424_v62 = vrot.slane %v1422_v0, 4  ;;  %v1433_v59 = vshrl.u32 %v1216_v7, 16  ;;  %v1225_v46 = vld [vmem:[%s3200_s26 + $0x84] sm:$0xf] }
  0x80   : > { %2961 = vmatmul.mubr.msk.bf16.gmra.mxu0 %vm718_vm1, %v2681_v3  ;;  %v1407_v6 = vsel %vm3238_vm4, %v1402_v4, %v1406_v39  ;;  %v1430_v50 = vrot.slane %v1428_v58, 5  ;;  %v1436_v8 = vshll.u32 %v1216_v7, 16  ;;  %v1442_v9 = vshll.u32 %v1217_v41, 16  ;;  %v3089_v42 = vld [vmem:[%s3200_s26 + $0x60] sm:$0xff]   ;;  %v1226_v4 = vld [vmem:[%s3200_s26 + $0x88] sm:$0xf] }
  0x81   : > { %v2682_v12 = vcombine.low %v1397_v5, %v1407_v6  ;;  %v1416_v15 = vrot.slane %v1415_v60, 4  ;;  %v1425_v10 = vor.u32 %v1424_v62, %v1420_v56  ;;  %v1435_v11 = vrot.slane %v1433_v59, 4  ;;  %v1227_v59 = vld [vmem:[%s3200_s26 + $0x8c] sm:$0x1] }
  0x82   : > { %v1438_v23 = vrot.slane %v1436_v8, 5  ;;  %v1444_v24 = vrot.slane %v1442_v9, 5  ;;  %v1446_v26 = vshrl.u32 %v1217_v41, 16  ;;  %v1452_v27 = vshll.u32 %v1218_v55, 16 }
  0x83   : > { %2964 = vmatprep.mubr.msk.bf16.mxu0 %vm718_vm1, %v2682_v12  ;;  %v1421_v1 = vsel %vm3238_vm4, %v1416_v15, %v1420_v56  ;;  %v1426_v28 = vrot.slane %v1425_v10, 4  ;;  %v1457_v13 = vshrl.u32 %v1219_v2, 16  ;;  %v1460_v17 = vshll.u32 %v1219_v2, 16  ;;  %v1228_v12 = vld [vmem:[%s3200_s26 + $0x90] sm:$0xf] }
  0x84   : > { %2995 = vmatmul.mubr.msk.bf16.gmra.mxu1 %vm718_vm1, %v3086_v54  ;;  %v1439_v19 = vor.u32 %v1438_v23, %v1435_v11  ;;  %v1448_v14 = vrot.slane %v1446_v26, 4  ;;  %v1454_v16 = vrot.slane %v1452_v27, 5  ;;  %v1466_v25 = vshll.u32 %v1220_v20, 16 }
  0x85   : > { %v1431_v21 = vsel %vm3238_vm4, %v1426_v28, %v1430_v50  ;;  %v1459_v32 = vrot.slane %v1457_v13, 4  ;;  %v1462_v33 = vrot.slane %v1460_v17, 5  ;;  %v1470_v34 = vshrl.u32 %v1220_v20, 16  ;;  %2998 = vmatprep.mubr.msk.bf16.mxu1 %vm718_vm1, %v3087_v61  ;;  %v1229_v61 = vld [vmem:[%s3200_s26 + $0x94] sm:$0xf] }
  0x86   : > { %v2683_v31 = vcombine.low %v1421_v1, %v1431_v21  ;;  %v1440_v38 = vrot.slane %v1439_v19, 4  ;;  %v1449_v18 = vor.u32 %v1448_v14, %v1444_v24  ;;  %v1468_v40 = vrot.slane %v1466_v25, 5  ;;  %v3091_v19 = vld [vmem:[%s3200_s26 + $0x78] sm:$0xff]  }
  0x87   : > { %v1463_v22 = vor.u32 %v1462_v33, %v1459_v32  ;;  %v1472_v45 = vrot.slane %v1470_v34, 4  ;;  %v1476_v44 = vshll.u32 %v1221_v43, 16  ;;  %v1481_v47 = vshrl.u32 %v1222_v29, 16  ;;  %v3090_v43 = vld [vmem:[%s3200_s26 + $0x6c] sm:$0xff]   ;;  %v1231_v32 = vld [vmem:[%s3200_s26 + $0x9c] sm:$0xf] }
  0x88   : > { %2965 = vmatmul.mubr.msk.bf16.gmra.mxu0 %vm718_vm1, %v2683_v31  ;;  %v1445_v48 = vsel %vm3238_vm4, %v1440_v38, %v1444_v24  ;;  %v1450_v36 = vrot.slane %v1449_v18, 4  ;;  %v1484_v35 = vshll.u32 %v1222_v29, 16  ;;  %v1490_v51 = vshll.u32 %v1223_v30, 16  ;;  %v1230_v29 = vld [vmem:[%s3200_s26 + $0x98] sm:$0x1] }
  0x89   : > { %v1464_v39 = vrot.slane %v1463_v22, 4  ;;  %v1473_v52 = vor.u32 %v1472_v45, %v1468_v40  ;;  %v1478_v53 = vrot.slane %v1476_v44, 5  ;;  %v1483_v7 = vrot.slane %v1481_v47, 4  ;;  %v1232_v38 = vld [vmem:[%s3200_s26 + $0xa0] sm:$0xf] }
  0x8a   : > { %v1455_v63 = vsel %vm3238_vm4, %v1450_v36, %v1454_v16  ;;  %v1486_v0 = vrot.slane %v1484_v35, 5  ;;  %v1492_v41 = vrot.slane %v1490_v51, 5  ;;  %v1494_v3 = vshrl.u32 %v1223_v30, 16  ;;  %v1233_v35 = vld [vmem:[%s3200_s26 + $0xa4] sm:$0x1] }
  0x8b   : > { %v2684_v56 = vcombine.low %v1445_v48, %v1455_v63  ;;  %v1469_v58 = vsel %vm3238_vm4, %v1464_v39, %v1468_v40  ;;  %v1474_v5 = vrot.slane %v1473_v52, 4  ;;  %v1500_v60 = vshll.u32 %v1224_v49, 16  ;;  %v1234_v52 = vld [vmem:[%s3200_s26 + $0xa8] sm:$0xf]  ;;  %v1235_v63 = vld [vmem:[%s3200_s26 + $0xac] sm:$0xf] }
  0x8c   : > { %2999 = vmatmul.mubr.msk.bf16.gmra.mxu1 %vm718_vm1, %v3088_v37  ;;  %v1487_v62 = vor.u32 %v1486_v0, %v1483_v7  ;;  %v1496_v55 = vrot.slane %v1494_v3, 4  ;;  %v1505_v6 = vshrl.u32 %v1225_v46, 16  ;;  %v1508_v50 = vshll.u32 %v1225_v46, 16 }
  0x8d   : > { %2968 = vmatprep.mubr.msk.bf16.mxu0 %vm718_vm1, %v2684_v56  ;;  %v1479_v54 = vsel %vm3238_vm4, %v1474_v5, %v1478_v53  ;;  %v1502_v8 = vrot.slane %v1500_v60, 5  ;;  %v1514_v9 = vshll.u32 %v1226_v4, 16  ;;  %v1518_v2 = vshrl.u32 %v1226_v4, 16  ;;  %3002 = vmatprep.mubr.msk.bf16.mxu1 %vm718_vm1, %v3089_v42  ;;  %v3092_v60 = vld [vmem:[%s3200_s26 + $0x84] sm:$0xff]  }
  0x8e   : > { %v2685_v15 = vcombine.low %v1469_v58, %v1479_v54  ;;  %v1488_v10 = vrot.slane %v1487_v62, 4  ;;  %v1497_v11 = vor.u32 %v1496_v55, %v1492_v41  ;;  %v1507_v20 = vrot.slane %v1505_v6, 4  ;;  %v1236_v62 = vld [vmem:[%s3200_s26 + $0xb0] sm:$0x1] }
  0x8f   : > { %v1510_v23 = vrot.slane %v1508_v50, 5  ;;  %v1516_v24 = vrot.slane %v1514_v9, 5  ;;  %v1520_v26 = vrot.slane %v1518_v2, 4  ;;  %v1524_v27 = vshll.u32 %v1227_v59, 16  ;;  %v3093_v9 = vld [vmem:[%s3200_s26 + $0x90] sm:$0xff]  }
  0x90   : > { %2969 = vmatmul.mubr.msk.bf16.gmra.mxu0 %vm718_vm1, %v2685_v15  ;;  %v1493_v1 = vsel %vm3238_vm4, %v1488_v10, %v1492_v41  ;;  %v1498_v28 = vrot.slane %v1497_v11, 4  ;;  %v1529_v13 = vshrl.u32 %v1228_v12, 16  ;;  %v1532_v17 = vshll.u32 %v1228_v12, 16 }
  0x91   : > { %v1511_v14 = vor.u32 %v1510_v23, %v1507_v20  ;;  %v1521_v16 = vor.u32 %v1520_v26, %v1516_v24  ;;  %v1526_v25 = vrot.slane %v1524_v27, 5  ;;  %v1538_v21 = vshll.u32 %v1229_v61, 16 }
  0x92   : > { %v1503_v33 = vsel %vm3238_vm4, %v1498_v28, %v1502_v8  ;;  %v1531_v34 = vrot.slane %v1529_v13, 4  ;;  %v1534_v30 = vrot.slane %v1532_v17, 5  ;;  %v1542_v31 = vshrl.u32 %v1229_v61, 16  ;;  %v1237_v8 = vld [vmem:[%s3200_s26 + $0xb4] sm:$0xf] }
  0x93   : > { %v2686_v18 = vcombine.low %v1493_v1, %v1503_v33  ;;  %v1512_v40 = vrot.slane %v1511_v14, 4  ;;  %v1522_v22 = vrot.slane %v1521_v16, 4  ;;  %v1540_v45 = vrot.slane %v1538_v21, 5 }
  0x94   : > { %3003 = vmatmul.mubr.msk.bf16.gmra.mxu1 %vm718_vm1, %v3090_v43  ;;  %v1535_v44 = vor.u32 %v1534_v30, %v1531_v34  ;;  %v1544_v47 = vrot.slane %v1542_v31, 4  ;;  %v1548_v48 = vshll.u32 %v1230_v29, 16  ;;  %v1553_v36 = vshrl.u32 %v1231_v32, 16 }
  0x95   : > { %2972 = vmatprep.mubr.msk.bf16.mxu0 %vm718_vm1, %v2686_v18  ;;  %v1517_v37 = vsel %vm3238_vm4, %v1512_v40, %v1516_v24  ;;  %v1527_v49 = vsel %vm3238_vm4, %v1522_v22, %v1526_v25  ;;  %v1556_v51 = vshll.u32 %v1231_v32, 16  ;;  %v1562_v39 = vshll.u32 %v1232_v38, 16  ;;  %3006 = vmatprep.mubr.msk.bf16.mxu1 %vm718_vm1, %v3091_v19  ;;  %v1238_v24 = vld [vmem:[%s3200_s26 + $0xb8] sm:$0xf]  ;;  %v1239_v19 = vld [vmem:[%s3200_s26 + $0xbc] sm:$0x1] }
  0x96   : > { %v2687_v53 = vcombine.low %v1517_v37, %v1527_v49  ;;  %v1536_v7 = vrot.slane %v1535_v44, 4  ;;  %v1545_v46 = vor.u32 %v1544_v47, %v1540_v45  ;;  %v1550_v42 = vrot.slane %v1548_v48, 5  ;;  %v3094_v22 = vld [vmem:[%s3200_s26 + $0x9c] sm:$0xff]   ;;  %v3095_v48 = vld [vmem:[%s3200_s26 + $0xa8] sm:$0xff]  }
  0x97   : > { %v1555_v0 = vrot.slane %v1553_v36, 4  ;;  %v1558_v41 = vrot.slane %v1556_v51, 5  ;;  %v1564_v3 = vrot.slane %v1562_v39, 5  ;;  %v1566_v4 = vshrl.u32 %v1232_v38, 16 }
  0x98   : > { %2973 = vmatmul.mubr.msk.bf16.gmra.mxu0 %vm718_vm1, %v2687_v53  ;;  %v1541_v56 = vsel %vm3238_vm4, %v1536_v7, %v1540_v45  ;;  %v1546_v58 = vrot.slane %v1545_v46, 4  ;;  %v1572_v5 = vshll.u32 %v1233_v35, 16  ;;  %v1577_v55 = vshrl.u32 %v1234_v52, 16  ;;  %v3096_v46 = vld [vmem:[%s3200_s26 + $0xb4] sm:$0xff]  }
  0x99   : > { %v1559_v59 = vor.u32 %v1558_v41, %v1555_v0  ;;  %v1568_v6 = vrot.slane %v1566_v4, 4  ;;  %v1580_v50 = vshll.u32 %v1234_v52, 16  ;;  %v1586_v54 = vshll.u32 %v1235_v63, 16 }
  0x9a   : > { %v1551_v2 = vsel %vm3238_vm4, %v1546_v58, %v1550_v42  ;;  %v1574_v12 = vrot.slane %v1572_v5, 5  ;;  %v1579_v15 = vrot.slane %v1577_v55, 4  ;;  %v1590_v10 = vshrl.u32 %v1235_v63, 16 }
  0x9b   : > { %v2688_v11 = vcombine.low %v1541_v56, %v1551_v2  ;;  %v1560_v20 = vrot.slane %v1559_v59, 4  ;;  %v1569_v61 = vor.u32 %v1568_v6, %v1564_v3  ;;  %v1582_v23 = vrot.slane %v1580_v50, 5 }
  0x9c   : > { %3007 = vmatmul.mubr.msk.bf16.gmra.mxu1 %vm718_vm1, %v3092_v60  ;;  %v1588_v26 = vrot.slane %v1586_v54, 5  ;;  %v1592_v27 = vrot.slane %v1590_v10, 4  ;;  %v1596_v1 = vshll.u32 %v1236_v62, 16  ;;  %v1601_v28 = vshrl.u32 %v1237_v8, 16 }
  0x9d   : > { %2976 = vmatprep.mubr.msk.bf16.mxu0 %vm718_vm1, %v2688_v11  ;;  %v1565_v43 = vsel %vm3238_vm4, %v1560_v20, %v1564_v3  ;;  %v1570_v13 = vrot.slane %v1569_v61, 4  ;;  %v1583_v17 = vor.u32 %v1582_v23, %v1579_v15  ;;  %v1604_v14 = vshll.u32 %v1237_v8, 16  ;;  %3010 = vmatprep.mubr.msk.bf16.mxu1 %vm718_vm1, %v3093_v9 }
  0x9e   : > { %v1593_v16 = vor.u32 %v1592_v27, %v1588_v26  ;;  %v1598_v25 = vrot.slane %v1596_v1, 5  ;;  %v1603_v29 = vrot.slane %v1601_v28, 4  ;;  %v1610_v21 = vshll.u32 %v1238_v24, 16 }
  0x9f   : > { %v1575_v32 = vsel %vm3238_vm4, %v1570_v13, %v1574_v12  ;;  %v1584_v33 = vrot.slane %v1583_v17, 4  ;;  %v1606_v34 = vrot.slane %v1604_v14, 5  ;;  %v1614_v30 = vshrl.u32 %v1238_v24, 16 }
  0xa0   : > { %v2689_v31 = vcombine.low %v1565_v43, %v1575_v32  ;;  %v1594_v38 = vrot.slane %v1593_v16, 4  ;;  %v1612_v18 = vrot.slane %v1610_v21, 5  ;;  %v1620_v40 = vshll.u32 %v1239_v19, 16 }
  0xa1   : > { %v1589_v45 = vsel %vm3238_vm4, %v1584_v33, %v1588_v26  ;;  %v1607_v44 = vor.u32 %v1606_v34, %v1603_v29  ;;  %v1616_v47 = vrot.slane %v1614_v30, 4 }
  0xa2   : > { %2977 = vmatmul.mubr.msk.bf16.gmra.mxu0 %vm718_vm1, %v2689_v31  ;;  %v1599_v36 = vsel %vm3238_vm4, %v1594_v38, %v1598_v25  ;;  %v1622_v51 = vrot.slane %v1620_v40, 5 }
  0xa3   : > { %v2690_v37 = vcombine.low %v1589_v45, %v1599_v36  ;;  %v1608_v49 = vrot.slane %v1607_v44, 4  ;;  %v1617_v35 = vor.u32 %v1616_v47, %v1612_v18 }
  0xa4   : > { %3011 = vmatmul.mubr.msk.bf16.gmra.mxu1 %vm718_vm1, %v3094_v22 }
  0xa5   : > { %2980 = vmatprep.mubr.msk.bf16.mxu0 %vm718_vm1, %v2690_v37  ;;  %v1613_v39 = vsel %vm3238_vm4, %v1608_v49, %v1612_v18  ;;  %v1618_v52 = vrot.slane %v1617_v35, 4  ;;  %3014 = vmatprep.mubr.msk.bf16.mxu1 %vm718_vm1, %v3095_v48 }
  0xa7   : > { %v1623_v53 = vsel %vm3238_vm4, %v1618_v52, %v1622_v51 }
  0xa8   : > { %v2691_v7 = vcombine.low %v1613_v39, %v1623_v53 }
  0xaa   : > { %2981 = vmatmul.mubr.msk.bf16.gmra.mxu0 %vm718_vm1, %v2691_v7 }
  0xac   : > { %3015 = vmatmul.mubr.msk.bf16.gmra.mxu1 %vm718_vm1, %v3096_v46 }
  0xde   : > { %v2886_v42 = vpop.f32.mrf.mxu0 }
  0xe0   : > { %v805_v63 = vpop.f32.mrf.mxu0 }
  0xe2   : > { %v2887_v0 = vpop.f32.mrf.mxu0 }
  0xe4   : > { %v808_v41 = vpop.f32.mrf.mxu0 }
  0xe6   : > { %v2890_v3 = vpop.f32.mrf.mxu0 }
  0xe8   : > { %v821_v4 = vpop.f32.mrf.mxu0 }
  0xe9   : > { %v2920_v56 = vpop.f32.mrf.mxu1 }
  0xea   : > { %v3656_v58 = vadd.f32 %v2920_v56, %v2886_v42  ;;  %v2891_v5 = vpop.f32.mrf.mxu0 }
  0xeb   : > { %v1065_v60 = vpop.f32.mrf.mxu1 }
  0xec   : > { %v3658_v62 = vadd.f32 %v1065_v60, %v805_v63  ;;  %v824_v57 = vpop.f32.mrf.mxu0 }
  0xed   : > { %v2921_v55 = vpop.f32.mrf.mxu1 }
  0xee   : > { %v3660_v59 = vadd.f32 %v2921_v55, %v2887_v0  ;;  %v2894_v6 = vpop.f32.mrf.mxu0 }
  0xef   : > { %v1068_v50 = vpop.f32.mrf.mxu1 }
  0xf0   : > { %v3662_v54 = vadd.f32 %v1068_v50, %v808_v41  ;;  %v837_v8 = vpop.f32.mrf.mxu0  ;;  %v3903_v41 = vmov 1.0  }
  0xf1   : > { %2340 = vmatprep.mubr.f32.mxu0 %v3903_v41  ;;  %2444 = vmatprep.mubr.f32.mxu1 %v3903_v41 }
  0xf2   : > { %v2924_v9 = vpop.f32.mrf.mxu1  ;;  %v2895_v2 = vpop.f32.mrf.mxu0 }
  0xf3   : > { %v3664_v12 = vadd.f32 %v2924_v9, %v2890_v3 }
  0xf4   : > { %v1081_v15 = vpop.f32.mrf.mxu1  ;;  %v840_v10 = vpop.f32.mrf.mxu0 }
  0xf5   : > { %v3666_v11 = vadd.f32 %v1081_v15, %v821_v4 }
  0xf6   : > { %v2925_v20 = vpop.f32.mrf.mxu1  ;;  %v2898_v61 = vpop.f32.mrf.mxu0 }
  0xf7   : > { %v3668_v23 = vadd.f32 %v2925_v20, %v2891_v5 }
  0xf8   : > { %v1084_v24 = vpop.f32.mrf.mxu1  ;;  %v853_v26 = vpop.f32.mrf.mxu0 }
  0xf9   : > { %v3670_v27 = vadd.f32 %v1084_v24, %v824_v57 }
  0xfa   : > { %v2899_v1 = vpop.f32.mrf.mxu0 }
  0xfb   : > { %v2928_v28 = vpop.f32.mrf.mxu1 }
  0xfc   : > { %v3672_v43 = vadd.f32 %v2928_v28, %v2894_v6  ;;  %v856_v13 = vpop.f32.mrf.mxu0 }
  0xfd   : > { %v1097_v17 = vpop.f32.mrf.mxu1 }
  0xfe   : > { %v3674_v19 = vadd.f32 %v1097_v17, %v837_v8  ;;  %v2902_v14 = vpop.f32.mrf.mxu0 }
  0xff   : > { %v2929_v16 = vpop.f32.mrf.mxu1 }
 0x100   : > { %v3676_v25 = vadd.f32 %v2929_v16, %v2895_v2  ;;  %v869_v29 = vpop.f32.mrf.mxu0 }
 0x101   : > { %v1100_v21 = vpop.f32.mrf.mxu1 }
 0x102   : > { %v3678_v32 = vadd.f32 %v1100_v21, %v840_v10  ;;  %v2903_v33 = vpop.f32.mrf.mxu0 }
 0x104   : > { %v2932_v34 = vpop.f32.mrf.mxu1  ;;  %v872_v30 = vpop.f32.mrf.mxu0 }
 0x105   : > { %v3680_v31 = vadd.f32 %v2932_v34, %v2898_v61 }
 0x106   : > { %v1113_v38 = vpop.f32.mrf.mxu1  ;;  %v2906_v18 = vpop.f32.mrf.mxu0 }
 0x107   : > { %v3682_v40 = vadd.f32 %v1113_v38, %v853_v26 }
 0x108   : > { %v2933_v22 = vpop.f32.mrf.mxu1  ;;  %v885_v45 = vpop.f32.mrf.mxu0 }
 0x109   : > { %v3684_v44 = vadd.f32 %v2933_v22, %v2899_v1 }
 0x10a   : > { %v1116_v47 = vpop.f32.mrf.mxu1  ;;  %v2907_v48 = vpop.f32.mrf.mxu0 }
 0x10b   : > { %v3686_v36 = vadd.f32 %v1116_v47, %v856_v13 }
 0x10c   : > { %v888_v37 = vpop.f32.mrf.mxu0 }
 0x10d   : > { %v2936_v49 = vpop.f32.mrf.mxu1 }
 0x10e   : > { %v3688_v35 = vadd.f32 %v2936_v49, %v2902_v14  ;;  %v2910_v51 = vpop.f32.mrf.mxu0 }
 0x10f   : > { %v1129_v39 = vpop.f32.mrf.mxu1 }
 0x110   : > { %3915 = vst [vmem:[#allocation2_spill] sm:$0xff] %v3688_v35  ;;  %v3690_v52 = vadd.f32 %v1129_v39, %v869_v29  ;;  %v901_v7 = vpop.f32.mrf.mxu0 }
 0x111   : > { %v2937_v53 = vpop.f32.mrf.mxu1 }
 0x112   : > { %3916 = vst [vmem:[#allocation3_spill] sm:$0xff] %v3690_v52  ;;  %v3692_v46 = vadd.f32 %v2937_v53, %v2903_v33  ;;  %v2911_v0 = vpop.f32.mrf.mxu0 }
 0x113   : > { %v1132_v42 = vpop.f32.mrf.mxu1 }
 0x114   : > { %3917 = vst [vmem:[#allocation4_spill] sm:$0xff] %v3692_v46  ;;  %v3694_v63 = vadd.f32 %v1132_v42, %v872_v30  ;;  %v904_v60 = vpop.f32.mrf.mxu0 }
 0x116   : > { %3918 = vst [vmem:[#allocation5_spill] sm:$0xff] %v3694_v63  ;;  %v2940_v3 = vpop.f32.mrf.mxu1 }
 0x117   : > { %v3698_v4 = vadd.f32 %v2940_v3, %v2906_v18  ;;  %v2914_v8 = vpop.f32.mrf.mxu0 }
 0x118   : > { %v1145_v56 = vpop.f32.mrf.mxu1 }
 0x119   : > { %v3700_v5 = vadd.f32 %v1145_v56, %v885_v45  ;;  %v917_v15 = vpop.f32.mrf.mxu0 }
 0x11a   : > { %v2941_v57 = vpop.f32.mrf.mxu1 }
 0x11b   : > { %3919 = vst [vmem:[#allocation6_spill] sm:$0xff] %v3700_v5  ;;  %v3702_v55 = vadd.f32 %v2941_v57, %v2907_v48  ;;  %v3712_v26 = vpop.f32.mrf.mxu0 }
 0x11c   : > { %v1148_v6 = vpop.f32.mrf.mxu1 }
 0x11d   : > { %v3704_v50 = vadd.f32 %v1148_v6, %v888_v37  ;;  %v3716_v13 = vpop.f32.mrf.mxu0 }
 0x11f   : > { %3920 = vst [vmem:[#allocation7_spill] sm:$0xff] %v3704_v50  ;;  %v2944_v9 = vpop.f32.mrf.mxu1 }
 0x120   : > { %v3706_v2 = vadd.f32 %v2944_v9, %v2910_v51 }
 0x121   : > { %v1161_v10 = vpop.f32.mrf.mxu1 }
 0x122   : > { %v3708_v20 = vadd.f32 %v1161_v10, %v901_v7 }
 0x123   : > { %v2945_v61 = vpop.f32.mrf.mxu1 }
 0x124   : > { %v3710_v24 = vadd.f32 %v2945_v61, %v2911_v0 }
 0x125   : > { %v1164_v1 = vpop.f32.mrf.mxu1 }
 0x126   : > { %v3714_v28 = vadd.f32 %v1164_v1, %v904_v60 }
 0x12c   : > { %v2948_v17 = vpop.f32.mrf.mxu1 }
 0x12d   : > { %v2954_v14 = vpop.f32.mrf.mxu0  ;;  %v3718_v16 = vadd.f32 %v2948_v17, %v2914_v8 }
 0x12e   : > { %v1888_v29 = vadd.f32 %v2954_v14, %v3656_v58  ;;  %v1177_v21 = vpop.f32.mrf.mxu1 }
 0x12f   : > { %v1759_v33 = vpop.f32.mrf.mxu0  ;;  %v3721_v34 = vadd.f32 %v1177_v21, %v917_v15 }
 0x130   : > { %v1886_v30 = vadd.f32 %v1759_v33, %v3658_v62  ;;  %v3724_v38 = vpop.f32.mrf.mxu1 }
 0x131   : > { %v2955_v18 = vpop.f32.mrf.mxu0 }
 0x132   : > { %v1889_v22 = vadd.f32 %v2955_v18, %v3660_v59  ;;  %v3727_v45 = vpop.f32.mrf.mxu1 }
 0x133   : > { %v1762_v47 = vpop.f32.mrf.mxu0 }
 0x134   : > { %v1887_v48 = vadd.f32 %v1762_v47, %v3662_v54  ;;  %v2988_v37 = vpop.f32.mrf.mxu1 }
 0x135   : > { %v3730_v49 = vadd.f32 %v2988_v37, %v1888_v29 }
 0x136   : > { %v2117_v58 = vpop.f32.mrf.mxu1 }
 0x137   : > { %3921 = vst [vmem:[#allocation8_spill] sm:$0xff] %v3730_v49  ;;  %v2958_v51 = vpop.f32.mrf.mxu0  ;;  %v3732_v39 = vadd.f32 %v2117_v58, %v1886_v30 }
 0x138   : > { %v1892_v53 = vadd.f32 %v2958_v51, %v3664_v12  ;;  %v2989_v62 = vpop.f32.mrf.mxu1 }
 0x139   : > { %3922 = vst [vmem:[#allocation9_spill] sm:$0xff] %v3732_v39  ;;  %v1775_v7 = vpop.f32.mrf.mxu0  ;;  %v3735_v42 = vadd.f32 %v2989_v62, %v1889_v22 }
 0x13a   : > { %v1890_v59 = vadd.f32 %v1775_v7, %v3666_v11  ;;  %v2120_v0 = vpop.f32.mrf.mxu1 }
 0x13b   : > { %3923 = vst [vmem:[#allocation10_spill] sm:$0xff] %v3735_v42  ;;  %v2959_v3 = vpop.f32.mrf.mxu0  ;;  %v3738_v56 = vadd.f32 %v2120_v0, %v1887_v48 }
 0x13c   : > { %v1893_v54 = vadd.f32 %v2959_v3, %v3668_v23  ;;  %v2992_v60 = vpop.f32.mrf.mxu1 }
 0x13d   : > { %3924 = vst [vmem:[#allocation11_spill] sm:$0xff] %v3738_v56  ;;  %v1778_v57 = vpop.f32.mrf.mxu0  ;;  %v3741_v6 = vadd.f32 %v2992_v60, %v1892_v53 }
 0x13e   : > { %v1891_v8 = vadd.f32 %v1778_v57, %v3670_v27  ;;  %v2133_v9 = vpop.f32.mrf.mxu1 }
 0x13f   : > { %3925 = vst [vmem:[#allocation12_spill] sm:$0xff] %v3741_v6  ;;  %v3744_v12 = vadd.f32 %v2133_v9, %v1890_v59 }
 0x140   : > { %v3746_v15 = vpop.f32.mrf.mxu0  ;;  %v2993_v10 = vpop.f32.mrf.mxu1 }
 0x141   : > { %3926 = vst [vmem:[#allocation13_spill] sm:$0xff] %v3744_v12  ;;  %v3748_v61 = vadd.f32 %v2993_v10, %v1893_v54 }
 0x142   : > { %v3750_v11 = vpop.f32.mrf.mxu0  ;;  %v2136_v1 = vpop.f32.mrf.mxu1 }
 0x143   : > { %3927 = vst [vmem:[#allocation14_spill] sm:$0xff] %v3748_v61  ;;  %v3752_v17 = vadd.f32 %v2136_v1, %v1891_v8 }
 0x144   : > { %v3754_v23 = vpop.f32.mrf.mxu0  ;;  %v3756_v14 = vpop.f32.mrf.mxu1 }
 0x145   : > { %3928 = vst [vmem:[#allocation15_spill] sm:$0xff] %v3752_v17 }
 0x146   : > { %v3758_v29 = vpop.f32.mrf.mxu0  ;;  %v3760_v27 = vpop.f32.mrf.mxu1 }
 0x148   : > { %v2966_v21 = vpop.f32.mrf.mxu0  ;;  %v3762_v33 = vpop.f32.mrf.mxu1 }
 0x149   : > { %v1900_v61 = vadd.f32 %v2966_v21, %v3680_v31 }
 0x14a   : > { %v1807_v30 = vpop.f32.mrf.mxu0  ;;  %v3764_v18 = vpop.f32.mrf.mxu1 }
 0x14c   : > { %v2967_v22 = vpop.f32.mrf.mxu0  ;;  %v3000_v47 = vpop.f32.mrf.mxu1 }
 0x14e   : > { %v1810_v48 = vpop.f32.mrf.mxu0  ;;  %v2165_v37 = vpop.f32.mrf.mxu1 }
 0x150   : > { %v3766_v58 = vpop.f32.mrf.mxu0  ;;  %v3001_v51 = vpop.f32.mrf.mxu1 }
 0x151   : > { %3929 = vst [vmem:[#allocation16_spill] sm:$0xff] %v3766_v58  ;;  %v1901_v58 = vadd.f32 %v2967_v22, %v3684_v44 }
 0x152   : > { %v3768_v53 = vpop.f32.mrf.mxu0  ;;  %v2168_v62 = vpop.f32.mrf.mxu1 }
 0x153   : > { %3930 = vst [vmem:[#allocation17_spill] sm:$0xff] %v3768_v53 }
 0x154   : > { %v3770_v7 = vpop.f32.mrf.mxu0  ;;  %v3772_v59 = vpop.f32.mrf.mxu1 }
 0x155   : > { %3931 = vst [vmem:[#allocation18_spill] sm:$0xff] %v3770_v7  ;;  %3932 = vst [vmem:[#allocation19_spill] sm:$0xff] %v3772_v59 }
 0x156   : > { %v3774_v0 = vpop.f32.mrf.mxu0  ;;  %v3776_v3 = vpop.f32.mrf.mxu1 }
 0x157   : > { %3933 = vst [vmem:[#allocation20_spill] sm:$0xff] %v3774_v0  ;;  %3934 = vst [vmem:[#allocation21_spill] sm:$0xff] %v3776_v3 }
 0x158   : > { %v3778_v54 = vpop.f32.mrf.mxu0  ;;  %v3780_v60 = vpop.f32.mrf.mxu1 }
 0x159   : > { %3935 = vst [vmem:[#allocation22_spill] sm:$0xff] %v3778_v54  ;;  %3936 = vst [vmem:[#allocation23_spill] sm:$0xff] %v3780_v60  ;;  %v1189_v60 = vadd.f32 %v3724_v38, %v3712_v26  ;;  %v1899_v26 = vadd.f32 %v1810_v48, %v3686_v36  ;;  %v2258_v38 = vadd.f32 %v3000_v47, %v1900_v61 }
 0x15a   : > { %v3782_v57 = vpop.f32.mrf.mxu0  ;;  %v3784_v8 = vpop.f32.mrf.mxu1  ;;  %v1897_v36 = vadd.f32 %v3754_v23, %v3676_v25 }
 0x15b   : > { %3937 = vst [vmem:[#allocation24_spill] sm:$0xff] %v3782_v57  ;;  %3938 = vst [vmem:[#allocation25_spill] sm:$0xff] %v3784_v8 }
 0x15c   : > { %v3786_v9 = vpop.f32.mrf.mxu0  ;;  %v3788_v10 = vpop.f32.mrf.mxu1 }
 0x15d   : > { %3939 = vst [vmem:[#allocation26_spill] sm:$0xff] %v3788_v10 }
 0x15e   : > { %v3790_v1 = vpop.f32.mrf.mxu0  ;;  %v3792_v41 = vpop.f32.mrf.mxu1 }
 0x15f   : > { %3940 = vst [vmem:[#allocation27_spill] sm:$0xff] %v3790_v1  ;;  %3941 = vst [vmem:[#allocation28_spill] sm:$0xff] %v3792_v41  ;;  %v1181_v41 = vadd.f32 %v3727_v45, %v3716_v13  ;;  %v1898_v13 = vadd.f32 %v1807_v30, %v3682_v40 }
 0x160   : > { %v3794_v39 = vpop.f32.mrf.mxu1 }
 0x161   : > { %3942 = vst [vmem:[#allocation29_spill] sm:$0xff] %v3794_v39 }
 0x162   : > { %v2978_v56 = vpop.f32.mrf.mxu0  ;;  %v3796_v49 = vpop.f32.mrf.mxu1 }
 0x163   : > { %3943 = vst [vmem:[#allocation30_spill] sm:$0xff] %v3796_v49  ;;  %v2259_v49 = vadd.f32 %v3001_v51, %v1901_v58  ;;  %v3950_v51 = vld [vmem:[#allocation24_spill] sm:$0xff] }
 0x164   : > { %v3798_v3 = vpop.f32.mrf.mxu0  ;;  %v3012_v42 = vpop.f32.mrf.mxu1  ;;  %v3948_v48 = vld [vmem:[#allocation26_spill] sm:$0xff] }
 0x166   : > { %v2979_v53 = vpop.f32.mrf.mxu0  ;;  %v3800_v52 = vpop.f32.mrf.mxu1 }
 0x167   : > { %v1913_v31 = vadd.f32 %v2979_v53, %v3710_v24  ;;  %v1896_v24 = vadd.f32 %v3746_v15, %v3672_v43  ;;  %v1910_v43 = vadd.f32 %v3798_v3, %v3708_v20 }
 0x168   : > { %v1858_v8 = vpop.f32.mrf.mxu0  ;;  %v3013_v12 = vpop.f32.mrf.mxu1  ;;  %v3945_v21 = vld [vmem:[#allocation29_spill] sm:$0xff] }
 0x169   : > { %v1911_v25 = vadd.f32 %v1858_v8, %v3714_v28  ;;  %v1894_v28 = vadd.f32 %v3750_v11, %v3674_v19  ;;  %v3944_v19 = vld [vmem:[#allocation22_spill] sm:$0xff] }
 0x16a   : > { %v2982_v59 = vpop.f32.mrf.mxu0  ;;  %v2216_v0 = vpop.f32.mrf.mxu1  ;;  %v1908_v11 = vadd.f32 %v3944_v19, %v3698_v4  ;;  %v3949_v4 = vld [vmem:[#allocation6_spill] sm:$0xff]  ;;  %v3973_v19 = vmov 1.0  }
 0x16b   : > { %v1916_v7 = vadd.f32 %v2982_v59, %v3718_v16  ;;  %v2257_v16 = vadd.f32 %v2168_v62, %v1899_v26  ;;  %v2269_v61 = vadd.f32 %v2216_v0, %v1911_v25  ;;  %v1906_v53 = vadd.f32 %v3950_v51, %v3949_v4  ;;  %v3952_v0 = vld [vmem:[#allocation14_spill] sm:$0xff] }
 0x16c   : > { %v1871_v63 = vpop.f32.mrf.mxu0  ;;  %v3016_v17 = vpop.f32.mrf.mxu1  ;;  %v2355_v3 = vmul.f32 %v3952_v0, %v3952_v0 }
 0x16d   : > { %v2274_v1 = vadd.f32 %v3016_v17, %v1916_v7  ;;  %v1914_v22 = vadd.f32 %v1871_v63, %v3721_v34  ;;  %v1912_v63 = vadd.f32 %v2978_v56, %v3706_v2  ;;  %v2255_v34 = vadd.f32 %v3762_v33, %v1897_v36  ;;  %v3951_v7 = vld [vmem:[#allocation30_spill] sm:$0xff]  ;;  %v3962_v36 = vld [vmem:[#allocation20_spill] sm:$0xff] }
 0x16e   : > { %v2983_v35 = vpop.f32.mrf.mxu0  ;;  %v2229_v6 = vpop.f32.mrf.mxu1  ;;  %v1895_v2 = vadd.f32 %v3758_v29, %v3678_v32  ;;  %v2254_v56 = vadd.f32 %v3756_v14, %v1896_v24  ;;  %v1909_v32 = vadd.f32 %v3786_v9, %v3702_v55  ;;  %v2268_v14 = vadd.f32 %v3800_v52, %v1910_v43  ;;  %v3946_v55 = vld [vmem:[#allocation7_spill] sm:$0xff]  ;;  %v3955_v9 = vld [vmem:[#allocation28_spill] sm:$0xff] }
 0x16f   : > { %v1917_v46 = vadd.f32 %v2983_v35, %v1189_v60  ;;  %v2363_v35 = vmul.f32 %v2259_v49, %v2259_v49  ;;  %v2378_v45 = vmul.f32 %v2274_v1, %v2274_v1  ;;  %v2252_v29 = vadd.f32 %v3760_v27, %v1894_v28  ;;  %v3947_v52 = vld [vmem:[#allocation27_spill] sm:$0xff]  ;;  %v3954_v60 = vld [vmem:[#allocation18_spill] sm:$0xff]  ;;  %v3970_v28 = vld [vmem:[#allocation8_spill] sm:$0xff] }
 0x170   : > { %v1874_v57 = vpop.f32.mrf.mxu0  ;;  %v3017_v5 = vpop.f32.mrf.mxu1  ;;  %v2253_v17 = vadd.f32 %v3764_v18, %v1895_v2  ;;  %v2358_v20 = vmul.f32 %v2254_v56, %v2254_v56  ;;  %v2267_v33 = vadd.f32 %v3945_v21, %v1909_v32  ;;  %v2373_v30 = vmul.f32 %v2269_v61, %v2269_v61  ;;  %v3971_v32 = vld [vmem:[#allocation11_spill] sm:$0xff] }
 0x171   : > { %v1915_v10 = vadd.f32 %v1874_v57, %v1181_v41  ;;  %v2275_v50 = vadd.f32 %v3017_v5, %v1917_v46  ;;  %v2272_v41 = vadd.f32 %v2229_v6, %v1914_v22  ;;  %v2362_v46 = vmul.f32 %v2258_v38, %v2258_v38 }
 0x172   : > { %v2232_v44 = vpop.f32.mrf.mxu1  ;;  %v2256_v5 = vadd.f32 %v2165_v37, %v1898_v13  ;;  %v2357_v18 = vmul.f32 %v2253_v17, %v2253_v17  ;;  %v1907_v47 = vadd.f32 %v3947_v52, %v3946_v55  ;;  %v2266_v37 = vadd.f32 %v3948_v48, %v1908_v11  ;;  %v3959_v13 = vld [vmem:[#allocation23_spill] sm:$0xff] }
 0x173   : > { %v2379_v39 = vmul.f32 %v2275_v50, %v2275_v50  ;;  %v2273_v54 = vadd.f32 %v2232_v44, %v1915_v10  ;;  %2812 = vmatprep.subr.mxu0 %v2275_v50  ;;  %v2271_v50 = vadd.f32 %v3013_v12, %v1913_v31  ;;  %v2376_v6 = vmul.f32 %v2272_v41, %v2272_v41  ;;  %v3958_v44 = vld [vmem:[#allocation16_spill] sm:$0xff]  ;;  %v3960_v31 = vld [vmem:[#allocation15_spill] sm:$0xff] }
 0x174   : > { %2813 = vmatpush3.msra.mxu0 %v2259_v49  ;;  %v2361_v49 = vmul.f32 %v2257_v16, %v2257_v16  ;;  %v2360_v12 = vmul.f32 %v2256_v5, %v2256_v5  ;;  %v2372_v58 = vmul.f32 %v2268_v14, %v2268_v14  ;;  %v2356_v27 = vmul.f32 %v2252_v29, %v2252_v29 }
 0x175   : > { %2814 = vmatprep.subr.mxu0 %v2274_v1  ;;  %2847 = vmatprep.subr.mxu1 %v2379_v39  ;;  %v2377_v40 = vmul.f32 %v2273_v54, %v2273_v54  ;;  %v2270_v39 = vadd.f32 %v3012_v42, %v1912_v63  ;;  %v2375_v15 = vmul.f32 %v2271_v50, %v2271_v50  ;;  %v3956_v1 = vld [vmem:[#allocation12_spill] sm:$0xff] }
 0x176   : > { %2815 = vmatpush3.msra.mxu0 %v2258_v38  ;;  %2848 = vmatpush3.msra.mxu1 %v2363_v35  ;;  %v2359_v42 = vmul.f32 %v2255_v34, %v2255_v34  ;;  %v2371_v62 = vmul.f32 %v2267_v33, %v2267_v33  ;;  %v2265_v59 = vadd.f32 %v3951_v7, %v1907_v47  ;;  %v3957_v38 = vld [vmem:[#allocation2_spill] sm:$0xff] }
 0x177   : > { %2816 = vmatprep.subr.mxu0 %v2273_v54  ;;  %2849 = vmatprep.subr.mxu1 %v2378_v45  ;;  %v2374_v23 = vmul.f32 %v2270_v39, %v2270_v39  ;;  %v3953_v54 = vld [vmem:[#allocation4_spill] sm:$0xff]  ;;  %v2370_v8 = vmul.f32 %v2266_v37, %v2266_v37  ;;  %v2264_v10 = vadd.f32 %v3955_v9, %v1906_v53 }
 0x178   : > { %2817 = vmatpush3.msra.mxu0 %v2257_v16  ;;  %2850 = vmatpush3.msra.mxu1 %v2362_v46  ;;  %v1905_v57 = vadd.f32 %v3954_v60, %v3953_v54  ;;  %v2354_v26 = vmul.f32 %v3956_v1, %v3956_v1  ;;  %v1904_v22 = vadd.f32 %v3958_v44, %v3957_v38 }
 0x179   : > { %2818 = vmatprep.subr.mxu0 %v2272_v41  ;;  %2851 = vmatprep.subr.mxu1 %v2377_v40  ;;  %v2369_v16 = vmul.f32 %v2265_v59, %v2265_v59  ;;  %v2353_v45 = vmul.f32 %v3960_v31, %v3960_v31  ;;  %v3961_v41 = vld [vmem:[#allocation5_spill] sm:$0xff] }
 0x17a   : > { %2819 = vmatpush3.msra.mxu0 %v2256_v5  ;;  %2852 = vmatpush3.msra.mxu1 %v2361_v49  ;;  %v2263_v35 = vadd.f32 %v3959_v13, %v1905_v57  ;;  %v1903_v46 = vadd.f32 %v3962_v36, %v3961_v41  ;;  %v3963_v5 = vld [vmem:[#allocation19_spill] sm:$0xff]  ;;  %v3964_v40 = vld [vmem:[#allocation13_spill] sm:$0xff] }
 0x17b   : > { %2820 = vmatprep.subr.mxu0 %v2271_v50  ;;  %2853 = vmatprep.subr.mxu1 %v2376_v6  ;;  %v2262_v63 = vadd.f32 %v3963_v5, %v1904_v22  ;;  %v2368_v50 = vmul.f32 %v2264_v10, %v2264_v10  ;;  %v2352_v24 = vmul.f32 %v3964_v40, %v3964_v40  ;;  %v3966_v49 = vld [vmem:[#allocation17_spill] sm:$0xff] }
 0x17c   : > { %2821 = vmatpush3.msra.mxu0 %v2255_v34  ;;  %2854 = vmatpush3.msra.mxu1 %v2360_v12  ;;  %v3965_v34 = vld [vmem:[#allocation3_spill] sm:$0xff]  ;;  %v3967_v6 = vld [vmem:[#allocation25_spill] sm:$0xff] }
 0x17d   : > { %2822 = vmatprep.subr.mxu0 %v2270_v39  ;;  %2855 = vmatprep.subr.mxu1 %v2375_v15  ;;  %v1902_v25 = vadd.f32 %v3966_v49, %v3965_v34  ;;  %v2367_v39 = vmul.f32 %v2263_v35, %v2263_v35  ;;  %v2261_v2 = vadd.f32 %v3967_v6, %v1903_v46  ;;  %v3969_v15 = vld [vmem:[#allocation21_spill] sm:$0xff] }
 0x17e   : > { %2823 = vmatpush3.msra.mxu0 %v2254_v56  ;;  %2856 = vmatpush3.msra.mxu1 %v2359_v42  ;;  %v3968_v56 = vld [vmem:[#allocation10_spill] sm:$0xff]  ;;  %v2366_v43 = vmul.f32 %v2262_v63, %v2262_v63  ;;  %v2350_v42 = vmul.f32 %v3970_v28, %v3970_v28 }
 0x17f   : > { %2824 = vmatprep.subr.mxu0 %v2269_v61  ;;  %2857 = vmatprep.subr.mxu1 %v2374_v23  ;;  %v2351_v12 = vmul.f32 %v3968_v56, %v3968_v56  ;;  %v2260_v61 = vadd.f32 %v3969_v15, %v1902_v25  ;;  %v2349_v23 = vmul.f32 %v3971_v32, %v3971_v32 }
 0x180   : > { %2825 = vmatpush3.msra.mxu0 %v2253_v17  ;;  %2858 = vmatpush3.msra.mxu1 %v2358_v20  ;;  %v2365_v17 = vmul.f32 %v2261_v2, %v2261_v2  ;;  %v3972_v20 = vld [vmem:[#allocation9_spill] sm:$0xff] }
 0x181   : > { %2826 = vmatprep.subr.mxu0 %v2268_v14  ;;  %2859 = vmatprep.subr.mxu1 %v2373_v30  ;;  %v2364_v14 = vmul.f32 %v2260_v61, %v2260_v61 }
 0x182   : > { %2827 = vmatpush3.msra.mxu0 %v2252_v29  ;;  %2860 = vmatpush3.msra.mxu1 %v2357_v18  ;;  %v2348_v29 = vmul.f32 %v3972_v20, %v3972_v20 }
 0x183   : > { %2828 = vmatprep.subr.mxu0 %v2267_v33  ;;  %2861 = vmatprep.subr.mxu1 %v2372_v58 }
 0x184   : > { %2829 = vmatpush3.msra.mxu0 %v3952_v0  ;;  %2862 = vmatpush3.msra.mxu1 %v2356_v27 }
 0x185   : > { %2830 = vmatprep.subr.mxu0 %v2266_v37  ;;  %2863 = vmatprep.subr.mxu1 %v2371_v62 }
 0x186   : > { %2831 = vmatpush3.msra.mxu0 %v3956_v1  ;;  %2864 = vmatpush3.msra.mxu1 %v2355_v3 }
 0x187   : > { %2832 = vmatprep.subr.mxu0 %v2265_v59  ;;  %2865 = vmatprep.subr.mxu1 %v2370_v8 }
 0x188   : > { %2833 = vmatpush3.msra.mxu0 %v3960_v31  ;;  %2866 = vmatpush3.msra.mxu1 %v2354_v26 }
 0x189   : > { %2834 = vmatprep.subr.mxu0 %v2264_v10  ;;  %2867 = vmatprep.subr.mxu1 %v2369_v16 }
 0x18a   : > { %2835 = vmatpush3.msra.mxu0 %v3964_v40  ;;  %2868 = vmatpush3.msra.mxu1 %v2353_v45 }
 0x18b   : > { %2836 = vmatprep.subr.mxu0 %v2263_v35  ;;  %2869 = vmatprep.subr.mxu1 %v2368_v50 }
 0x18c   : > { %2837 = vmatpush3.msra.mxu0 %v3968_v56  ;;  %2870 = vmatpush3.msra.mxu1 %v2352_v24 }
 0x18d   : > { %2838 = vmatprep.subr.mxu0 %v2262_v63  ;;  %2871 = vmatprep.subr.mxu1 %v2367_v39 }
 0x18e   : > { %2839 = vmatpush3.msra.mxu0 %v3970_v28  ;;  %2872 = vmatpush3.msra.mxu1 %v2351_v12 }
 0x18f   : > { %2840 = vmatprep.subr.mxu0 %v2261_v2  ;;  %2873 = vmatprep.subr.mxu1 %v2366_v43 }
 0x190   : > { %2841 = vmatpush3.msra.mxu0 %v3971_v32  ;;  %2874 = vmatpush3.msra.mxu1 %v2350_v42 }
 0x191   : > { %2842 = vmatprep.subr.mxu0 %v2260_v61  ;;  %2875 = vmatprep.subr.mxu1 %v2365_v17 }
 0x192   : > { %2843 = vmatpush3.msra.mxu0 %v3972_v20  ;;  %2876 = vmatpush3.msra.mxu1 %v2349_v23 }
 0x193   : > { %2877 = vmatprep.subr.mxu1 %v2364_v14  ;;  %2341 = vmatmul.mubr.f32.vlgmr.msra.gmra.mxu0 %v3973_v19 }
 0x194   : > { %2878 = vmatpush3.msra.mxu1 %v2348_v29 }
 0x195   : > { %2445 = vmatmul.mubr.f32.vlgmr.msra.gmra.mxu1 %v3973_v19 }
 0x253   : > { %v2844_v11 = vpop.f32.mrf.mxu0 }
 0x255   : > { %v2879_v21 = vpop.f32.mrf.mxu1  ;;  %v2845_v33 = vpop.f32.mrf.mxu0 }
 0x256   : > { %v2846_v30 = vadd.f32 %v2845_v33, %v2844_v11 }
 0x257   : > { %v2880_v18 = vpop.f32.mrf.mxu1 }
 0x258   : > { %2347 = vst.msk [vmem:[%s197_s4] sm:$0x1] %vm2346_vm5, %v2846_v30  ;;  %v2881_v55 = vadd.f32 %v2880_v18, %v2879_v21 }
 0x25a   : > { %2450 = vst.msk [vmem:[%s197_s4 + $0x1] sm:$0x1] %vm2346_vm5, %v2881_v55 }
 0x25b PF: > { %s12_s13 = sadd.s32 1, %s3135_s13   ;;  %s3974_s9 = smov %s3127_s11 }
 0x25c   : > { %p9_p7 = scmp.ge.s32.totalorder %s12_s13, 10   ;;  %s3975_s10 = smov %s3131_s12 }
 0x25d   : > { %s3976_s11 = smov %s3979_s14  ;;  %s3977_s12 = smov %s3983_s15 }
 0x25e   :  { %11 = sbr.rel (!%p9_p7) target bundleno = 3 (0x3), region = 65 }

// kernel: dcgan_block_forward.3
= control target key start
LH: loop header
LB: loop body
LE: loop exit
PB: predicated region body
PF: predicated region fallthrough
CT: control target
= control target key end

     0   :  { %s3124_s15 = smov 0   ;;  %s3126_s16 = smov 0   ;;  %s3967_s0 = inlined_call_operand.vmem [shape: bf16[4,2,17,17,4], index: 0, kind: input, shape index: {}]   ;;  %s3968_s1 = inlined_call_operand.vmem [shape: bf16[4,4,4,8], index: 1, kind: input, shape index: {}]   ;;  %s3969_s2 = inlined_call_operand.vmem [shape: f32[1,8], index: 2, kind: input, shape index: {}]   ;;  %s3970_s3 = inlined_call_operand.vmem [shape: f32[1,8], index: 3, kind: input, shape index: {}]   ;;  %s3971_s4 = inlined_call_operand.vmem [shape: f32[4,2,256,8], index: 4, kind: output, shape index: {}]  }
   0x1   :  { %s3128_s17 = smov 0   ;;  %s3130_s18 = smov 0  }
   0x2   :  { %s3132_s19 = smov 0  }
   0x3 LB: > { %s23_s20 = sadd.s32 1, %s3089_s17  ;;  %s26_s21 = sadd.s32 1, %s3093_s18  ;;  %s3097_s19 = sphi %s3132_s19, %s14_s19   ;;  %s3093_s18 = sphi %s3130_s18, %s4005_s18   ;;  %s3089_s17 = sphi %s3128_s17, %s4004_s17   ;;  %s3085_s16 = sphi %s3126_s16, %s4003_s16   ;;  %s3081_s15 = sphi %s3124_s15, %s4002_s15  }
   0x4   : > { %p24_p0 = scmp.ge.s32.totalorder %s23_s20, 2  ;;  %p2586_p1 = scmp.ge.s32.totalorder %s3097_s19, 1 }
   0x5   : > { %p192_p2 = scmp.lt.s32.totalorder %s3097_s19, 9 }
   0x6   : > { %s4007_s20 = smov (%p24_p0, %s23_s20), 0  ;;  %s4009_s21 = smov (!%p24_p0, %s26_s21), %s3093_s18 }
   0x7   : > { %p193_p3 = pnand %p2586_p1, %p192_p2  ;;  %p28_p4 = scmp.ge.s32.totalorder %s4009_s21, 4 }
   0x9   : > { %s4011_s21 = smov (%p28_p4, %s4009_s21), 0  ;;  %196 = sbr.rel (%p193_p3) target bundleno = 380 (0x17c), region = 36 }
   0xe   : > { %p231_p5 = scmp.lt.s32.totalorder %s3085_s16, 3  ;;  %p233_p6 = scmp.lt.s32.totalorder %s3081_s15, 1  ;;  %vm823_vm0 = vcmask 1041408   ;;  %vm774_vm1 = vcmask 31744   ;;  %vm304_vm2 = vsmask.f32 3328 }
   0xf   : > { %vm305_vm3 = vsmask.f32 7440  ;;  %vm2442_vm5 = vcmask 64512  }
  0x10   : > { %s4013_s16 = smov (!%p231_p5, %s3085_s16), 3  ;;  %s4015_s15 = smov (!%p233_p6, %s3081_s15), 1  ;;  %vm3204_vm4 = vmor %vm304_vm2, %vm305_vm3 }
  0x11   : > { %s2986_s22 = smul.u32 102, %s4013_s16  ;;  %s2776_s23 = sshll.u32 %s4013_s16, 3 }
  0x12   : > { %s2985_s24 = smul.u32 51, %s4015_s15  ;;  %s244_s27 = scalar_lea.vmem %s3968_s1, %s2776_s23 }
  0x13   : > { %s2590_s28 = sshll.u32 %s4015_s15, 5  ;;  %s2591_s29 = sshll.u32 %s4013_s16, 6  ;;  %v2641_v0 = vld [vmem:[%s244_s27 + $0x2] sm:$0x3]  ;;  %v691_v1 = vld [vmem:[%s244_s27] sm:$0x3] }
  0x14   : > { %s237_s30 = sadd.s32 %s2986_s22, %s2985_s24  ;;  %s3157_s5 = sadd.s32 %s2591_s29, %s2590_s28  ;;  %2981 = vmatprep.subr.msk.bf16.mxu0 %vm823_vm0, %v2641_v0  ;;  %v825_v2 = vsel %vm823_vm0, %v2641_v0, 0  ;;  %2982 = vmatprep.subr.msk.bf16.mxu1 %vm823_vm0, %v691_v1  ;;  %v1085_v3 = vsel %vm823_vm0, %v691_v1, 0  ;;  %v2706_v4 = vld [vmem:[%s244_s27 + $0x4] sm:$0x3]  ;;  %v2739_v5 = vld [vmem:[%s244_s27 + $0x6] sm:$0x3] }
  0x15   : > { %s2587_s6 = sshll.u32 %s237_s30, 2  ;;  %2846 = vmatpush3.bf16.msra.mxu0 %v825_v2  ;;  %2880 = vmatpush3.bf16.msra.mxu1 %v1085_v3  ;;  %v1779_v6 = vsel %vm823_vm0, %v2706_v4, 0  ;;  %v3172_v7 = vsel %vm823_vm0, %v2739_v5, 0  ;;  %s2592_s14 = sshll.u32 %s3157_s5, 3 }
  0x16   : > { %s3166_s9 = scalar_lea.vmem %s3967_s0, %s2587_s6  ;;  %2983 = vmatprep.subr.msk.bf16.mxu0 %vm823_vm0, %v2706_v4  ;;  %2984 = vmatprep.subr.msk.bf16.mxu1 %vm823_vm0, %v2739_v5  ;;  %s3771_s22 = scalar_lea.vmem %s3971_s4, %s2592_s14 }
  0x17   : > { %v2593_v8 = vld [vmem:[%s3166_s9 + $0xc] sm:$0xf]  ;;  %v2594_v9 = vld [vmem:[%s3166_s9 + $0x10] sm:$0xf]  ;;  %v2596_v10 = vld [vmem:[%s3166_s9 + $0x18] sm:$0xf] }
  0x18   : > { %v308_v11 = vshrl.u32 %v2593_v8, 16  ;;  %v311_v12 = vshll.u32 %v2593_v8, 16  ;;  %v317_v13 = vshll.u32 %v2594_v9, 16  ;;  %v321_v14 = vshrl.u32 %v2594_v9, 16  ;;  %v2597_v15 = vld [vmem:[%s3166_s9 + $0x1c] sm:$0xf] }
  0x19   : > { %v2642_v16 = vcombine.low %v2593_v8, %v2594_v9  ;;  %v332_v17 = vshrl.u32 %v2596_v10, 16  ;;  %v335_v18 = vshll.u32 %v2596_v10, 16  ;;  %v341_v19 = vshll.u32 %v2597_v15, 16  ;;  %v2599_v20 = vld [vmem:[%s3166_s9 + $0x24] sm:$0xf] }
  0x1a   : > { %v310_v21 = vrot.slane %v308_v11, 4  ;;  %v313_v22 = vrot.slane %v311_v12, 5  ;;  %v319_v23 = vrot.slane %v317_v13, 5  ;;  %v323_v24 = vrot.slane %v321_v14, 4  ;;  %v2600_v25 = vld [vmem:[%s3166_s9 + $0x28] sm:$0xf] }
  0x1b   : > { %2847 = vmatprep.mubr.msk.bf16.mxu0 %vm774_vm1, %v2642_v16  ;;  %v334_v26 = vrot.slane %v332_v17, 4  ;;  %v337_v27 = vrot.slane %v335_v18, 5  ;;  %v343_v28 = vrot.slane %v341_v19, 5  ;;  %v345_v29 = vshrl.u32 %v2597_v15, 16  ;;  %v2602_v30 = vld [vmem:[%s3166_s9 + $0x30] sm:$0xf] }
  0x1c   : > { %v2643_v31 = vcombine.low %v2596_v10, %v2597_v15  ;;  %v356_v32 = vshrl.u32 %v2599_v20, 16  ;;  %v359_v33 = vshll.u32 %v2599_v20, 16  ;;  %v365_v34 = vshll.u32 %v2600_v25, 16  ;;  %v2603_v35 = vld [vmem:[%s3166_s9 + $0x34] sm:$0xf] }
  0x1d   : > { %v347_v36 = vrot.slane %v345_v29, 4  ;;  %v369_v37 = vshrl.u32 %v2600_v25, 16  ;;  %v2644_v38 = vcombine.low %v2599_v20, %v2600_v25  ;;  %v380_v39 = vshrl.u32 %v2602_v30, 16  ;;  %v2595_v44 = vld [vmem:[%s3166_s9 + $0x14] sm:$0x1] }
  0x1e   : > { %2848 = vmatmul.mubr.msk.bf16.vlgmr.msra.gmra.mxu0 %vm774_vm1, %v2643_v31  ;;  %v3184_v40 = vrot.slane %v356_v32, 4  ;;  %v3186_v41 = vrot.slane %v359_v33, 5  ;;  %v3188_v42 = vrot.slane %v365_v34, 5  ;;  %v383_v43 = vshll.u32 %v2602_v30, 16  ;;  %v2598_v49 = vld [vmem:[%s3166_s9 + $0x20] sm:$0x1] }
  0x1f   : > { %v3191_v45 = vrot.slane %v369_v37, 4  ;;  %2851 = vmatprep.mubr.msk.bf16.mxu0 %vm774_vm1, %v2644_v38  ;;  %2914 = vmatpush3.bf16.msra.mxu0 %v1779_v6  ;;  %v3194_v46 = vrot.slane %v380_v39, 4  ;;  %v389_v47 = vshll.u32 %v2603_v35, 16  ;;  %v393_v48 = vshrl.u32 %v2603_v35, 16  ;;  %v2605_v54 = vld [vmem:[%s3166_s9 + $0x3c] sm:$0xf] }
  0x20   : > { %v3197_v50 = vrot.slane %v383_v43, 5  ;;  %v2645_v51 = vcombine.low %v2602_v30, %v2603_v35  ;;  %v314_v52 = vor.u32 %v313_v22, %v310_v21  ;;  %v324_v53 = vor.u32 %v323_v24, %v319_v23  ;;  %v2606_v60 = vld [vmem:[%s3166_s9 + $0x40] sm:$0xf]  ;;  %v2608_v10 = vld [vmem:[%s3166_s9 + $0x48] sm:$0xf] }
  0x21   : > { %v3200_v55 = vrot.slane %v389_v47, 5  ;;  %v395_v56 = vrot.slane %v393_v48, 4  ;;  %v327_v58 = vshll.u32 %v2595_v44, 16  ;;  %v338_v59 = vor.u32 %v337_v27, %v334_v26  ;;  %v2609_v15 = vld [vmem:[%s3166_s9 + $0x4c] sm:$0xf] }
  0x22   : > { %v315_v61 = vrot.slane %v314_v52, 4  ;;  %v325_v62 = vrot.slane %v324_v53, 4  ;;  %v348_v63 = vor.u32 %v347_v36, %v343_v28  ;;  %v351_v0 = vshll.u32 %v2598_v49, 16  ;;  %v2601_v24 = vld [vmem:[%s3166_s9 + $0x2c] sm:$0x1] }
  0x23   : > { %v329_v1 = vrot.slane %v327_v58, 5  ;;  %v339_v2 = vrot.slane %v338_v59, 4  ;;  %v404_v3 = vshrl.u32 %v2605_v54, 16  ;;  %v407_v4 = vshll.u32 %v2605_v54, 16  ;;  %v2604_v29 = vld [vmem:[%s3166_s9 + $0x38] sm:$0x1] }
  0x24   : > { %v320_v5 = vsel %vm3204_vm4, %v315_v61, %v319_v23  ;;  %v349_v6 = vrot.slane %v348_v63, 4  ;;  %v353_v8 = vrot.slane %v351_v0, 5  ;;  %v413_v9 = vshll.u32 %v2606_v60, 16  ;;  %v2611_v34 = vld [vmem:[%s3166_s9 + $0x54] sm:$0xf] }
  0x25   : > { %v330_v11 = vsel %vm3204_vm4, %v325_v62, %v329_v1  ;;  %v344_v12 = vsel %vm3204_vm4, %v339_v2, %v343_v28  ;;  %v3216_v13 = vrot.slane %v404_v3, 4  ;;  %v3218_v14 = vrot.slane %v407_v4, 5  ;;  %v2612_v39 = vld [vmem:[%s3166_s9 + $0x58] sm:$0xf]  ;;  %v2607_v3 = vld [vmem:[%s3166_s9 + $0x44] sm:$0x1] }
  0x26   : > { %2852 = vmatmul.mubr.msk.bf16.gmra.mxu0 %vm774_vm1, %v2645_v51  ;;  %v2674_v16 = vcombine.low %v320_v5, %v330_v11  ;;  %v354_v17 = vsel %vm3204_vm4, %v349_v6, %v353_v8  ;;  %v3224_v18 = vrot.slane %v413_v9, 5  ;;  %v417_v19 = vshrl.u32 %v2606_v60, 16  ;;  %v2610_v8 = vld [vmem:[%s3166_s9 + $0x50] sm:$0x1] }
  0x27   : > { %v2675_v20 = vcombine.low %v344_v12, %v354_v17  ;;  %v2646_v21 = vcombine.low %v2605_v54, %v2606_v60  ;;  %v428_v22 = vshrl.u32 %v2608_v10, 16  ;;  %v431_v23 = vshll.u32 %v2608_v10, 16 }
  0x28   : > { %2881 = vmatprep.mubr.msk.bf16.mxu1 %vm774_vm1, %v2674_v16  ;;  %v3228_v25 = vrot.slane %v417_v19, 4  ;;  %v437_v26 = vshll.u32 %v2609_v15, 16  ;;  %v441_v27 = vshrl.u32 %v2609_v15, 16  ;;  %v2647_v28 = vcombine.low %v2608_v10, %v2609_v15  ;;  %v2617_v15 = vld [vmem:[%s3166_s9 + $0x6c] sm:$0xf] }
  0x29   : > { %2882 = vmatmul.mubr.msk.bf16.vlgmr.msra.gmra.mxu1 %vm774_vm1, %v2675_v20  ;;  %2855 = vmatprep.mubr.msk.bf16.mxu0 %vm774_vm1, %v2646_v21  ;;  %v430_v30 = vrot.slane %v428_v22, 4  ;;  %v433_v31 = vrot.slane %v431_v23, 5  ;;  %v362_v32 = vor.u32 %v3186_v41, %v3184_v40  ;;  %v372_v33 = vor.u32 %v3191_v45, %v3188_v42  ;;  %v2618_v21 = vld [vmem:[%s3166_s9 + $0x70] sm:$0xf] }
  0x2a   : > { %2948 = vmatpush3.bf16.msra.mxu1 %v3172_v7  ;;  %v3239_v35 = vrot.slane %v437_v26, 5  ;;  %v443_v36 = vrot.slane %v441_v27, 4  ;;  %v375_v37 = vshll.u32 %v2601_v24, 16  ;;  %v386_v38 = vor.u32 %v3197_v50, %v3194_v46  ;;  %v2614_v46 = vld [vmem:[%s3166_s9 + $0x60] sm:$0xf] }
  0x2b   : > { %v363_v43 = vrot.slane %v362_v32, 4  ;;  %v373_v44 = vrot.slane %v372_v33, 4  ;;  %v396_v47 = vor.u32 %v395_v56, %v3200_v55  ;;  %v399_v40 = vshll.u32 %v2604_v29, 16 }
  0x2c   : > { %v377_v41 = vrot.slane %v375_v37, 5  ;;  %v387_v45 = vrot.slane %v386_v38, 4  ;;  %v452_v48 = vshrl.u32 %v2611_v34, 16  ;;  %v455_v49 = vshll.u32 %v2611_v34, 16  ;;  %v2621_v38 = vld [vmem:[%s3166_s9 + $0x7c] sm:$0xf] }
  0x2d   : > { %v368_v7 = vsel %vm3204_vm4, %v363_v43, %v3188_v42  ;;  %v397_v51 = vrot.slane %v396_v47, 4  ;;  %v401_v52 = vrot.slane %v399_v40, 5  ;;  %v461_v53 = vshll.u32 %v2612_v39, 16  ;;  %v2615_v42 = vld [vmem:[%s3166_s9 + $0x64] sm:$0xf] }
  0x2e   : > { %2856 = vmatmul.mubr.msk.bf16.gmra.mxu0 %vm774_vm1, %v2647_v28  ;;  %v378_v50 = vsel %vm3204_vm4, %v373_v44, %v377_v41  ;;  %v392_v54 = vsel %vm3204_vm4, %v387_v45, %v3200_v55  ;;  %v3255_v56 = vrot.slane %v452_v48, 4  ;;  %v3257_v58 = vrot.slane %v455_v49, 5  ;;  %v2613_v48 = vld [vmem:[%s3166_s9 + $0x5c] sm:$0x1] }
  0x2f   : > { %v2676_v59 = vcombine.low %v368_v7, %v378_v50  ;;  %v402_v60 = vsel %vm3204_vm4, %v397_v51, %v401_v52  ;;  %v3262_v61 = vrot.slane %v461_v53, 5  ;;  %v465_v62 = vshrl.u32 %v2612_v39, 16  ;;  %v2616_v52 = vld [vmem:[%s3166_s9 + $0x68] sm:$0x1] }
  0x30   : > { %v2677_v63 = vcombine.low %v392_v54, %v402_v60  ;;  %v2648_v0 = vcombine.low %v2611_v34, %v2612_v39  ;;  %v476_v1 = vshrl.u32 %v2614_v46, 16  ;;  %v479_v2 = vshll.u32 %v2614_v46, 16 }
  0x31   : > { %2885 = vmatprep.mubr.msk.bf16.mxu1 %vm774_vm1, %v2676_v59  ;;  %v3266_v55 = vrot.slane %v465_v62, 4  ;;  %v485_v4 = vshll.u32 %v2615_v42, 16  ;;  %v489_v5 = vshrl.u32 %v2615_v42, 16  ;;  %v2649_v6 = vcombine.low %v2614_v46, %v2615_v42  ;;  %v2623_v42 = vld [vmem:[%s3166_s9 + $0x84] sm:$0xf] }
  0x32   : > { %2886 = vmatmul.mubr.msk.bf16.gmra.mxu1 %vm774_vm1, %v2677_v63  ;;  %2859 = vmatprep.mubr.msk.bf16.mxu0 %vm774_vm1, %v2648_v0  ;;  %v478_v9 = vrot.slane %v476_v1, 4  ;;  %v481_v10 = vrot.slane %v479_v2, 5  ;;  %v410_v11 = vor.u32 %v3218_v14, %v3216_v13  ;;  %v420_v12 = vor.u32 %v3228_v25, %v3224_v18  ;;  %v2624_v0 = vld [vmem:[%s3166_s9 + $0x88] sm:$0xf] }
  0x33   : > { %v3276_v16 = vrot.slane %v485_v4, 5  ;;  %v491_v17 = vrot.slane %v489_v5, 4  ;;  %v423_v19 = vshll.u32 %v2607_v3, 16  ;;  %v434_v20 = vor.u32 %v433_v31, %v430_v30  ;;  %v2620_v31 = vld [vmem:[%s3166_s9 + $0x78] sm:$0xf] }
  0x34   : > { %v411_v22 = vrot.slane %v410_v11, 4  ;;  %v421_v23 = vrot.slane %v420_v12, 4  ;;  %v444_v24 = vor.u32 %v443_v36, %v3239_v35  ;;  %v447_v26 = vshll.u32 %v2610_v8, 16  ;;  %v2626_v11 = vld [vmem:[%s3166_s9 + $0x90] sm:$0xf] }
  0x35   : > { %v425_v27 = vrot.slane %v423_v19, 5  ;;  %v435_v28 = vrot.slane %v434_v20, 4  ;;  %v500_v13 = vshrl.u32 %v2617_v15, 16  ;;  %v503_v14 = vshll.u32 %v2617_v15, 16  ;;  %v2627_v20 = vld [vmem:[%s3166_s9 + $0x94] sm:$0xf] }
  0x36   : > { %2860 = vmatmul.mubr.msk.bf16.gmra.mxu0 %vm774_vm1, %v2649_v6  ;;  %v416_v25 = vsel %vm3204_vm4, %v411_v22, %v3224_v18  ;;  %v445_v29 = vrot.slane %v444_v24, 4  ;;  %v449_v32 = vrot.slane %v447_v26, 5  ;;  %v509_v30 = vshll.u32 %v2618_v21, 16  ;;  %v2619_v24 = vld [vmem:[%s3166_s9 + $0x74] sm:$0x1] }
  0x37   : > { %v426_v33 = vsel %vm3204_vm4, %v421_v23, %v425_v27  ;;  %v440_v34 = vsel %vm3204_vm4, %v435_v28, %v3239_v35  ;;  %v3290_v36 = vrot.slane %v500_v13, 4  ;;  %v3292_v37 = vrot.slane %v503_v14, 5  ;;  %v2622_v26 = vld [vmem:[%s3166_s9 + $0x80] sm:$0x1] }
  0x38   : > { %v2678_v39 = vcombine.low %v416_v25, %v426_v33  ;;  %v450_v18 = vsel %vm3204_vm4, %v445_v29, %v449_v32  ;;  %v3297_v43 = vrot.slane %v509_v30, 5  ;;  %v513_v44 = vshrl.u32 %v2618_v21, 16 }
  0x39   : > { %v2679_v47 = vcombine.low %v440_v34, %v450_v18  ;;  %v2650_v40 = vcombine.low %v2617_v15, %v2618_v21  ;;  %v524_v41 = vshrl.u32 %v2620_v31, 16  ;;  %v527_v45 = vshll.u32 %v2620_v31, 16 }
  0x3a   : > { %2889 = vmatprep.mubr.msk.bf16.mxu1 %vm774_vm1, %v2678_v39  ;;  %v3301_v35 = vrot.slane %v513_v44, 4  ;;  %v533_v49 = vshll.u32 %v2621_v38, 16  ;;  %v537_v7 = vshrl.u32 %v2621_v38, 16  ;;  %v2651_v51 = vcombine.low %v2620_v31, %v2621_v38  ;;  %v2629_v38 = vld [vmem:[%s3166_s9 + $0x9c] sm:$0xf] }
  0x3b   : > { %2890 = vmatmul.mubr.msk.bf16.gmra.mxu1 %vm774_vm1, %v2679_v47  ;;  %2863 = vmatprep.mubr.msk.bf16.mxu0 %vm774_vm1, %v2650_v40  ;;  %v526_v53 = vrot.slane %v524_v41, 4  ;;  %v529_v46 = vrot.slane %v527_v45, 5  ;;  %v458_v50 = vor.u32 %v3257_v58, %v3255_v56  ;;  %v468_v54 = vor.u32 %v3266_v55, %v3262_v61  ;;  %v2630_v40 = vld [vmem:[%s3166_s9 + $0xa0] sm:$0xf] }
  0x3c   : > { %v3311_v59 = vrot.slane %v533_v49, 5  ;;  %v539_v60 = vrot.slane %v537_v7, 4  ;;  %v471_v62 = vshll.u32 %v2613_v48, 16  ;;  %v482_v63 = vor.u32 %v481_v10, %v478_v9 }
  0x3d   : > { %v459_v1 = vrot.slane %v458_v50, 4  ;;  %v469_v2 = vrot.slane %v468_v54, 4  ;;  %v492_v3 = vor.u32 %v491_v17, %v3276_v16  ;;  %v495_v4 = vshll.u32 %v2616_v52, 16 }
  0x3e   : > { %2864 = vmatmul.mubr.msk.bf16.gmra.mxu0 %vm774_vm1, %v2651_v51  ;;  %v473_v56 = vrot.slane %v471_v62, 5  ;;  %v483_v58 = vrot.slane %v482_v63, 4  ;;  %v548_v5 = vshrl.u32 %v2623_v42, 16  ;;  %v551_v55 = vshll.u32 %v2623_v42, 16  ;;  %v2633_v63 = vld [vmem:[%s3166_s9 + $0xac] sm:$0xf] }
  0x3f   : > { %v464_v6 = vsel %vm3204_vm4, %v459_v1, %v3262_v61  ;;  %v493_v8 = vrot.slane %v492_v3, 4  ;;  %v497_v9 = vrot.slane %v495_v4, 5  ;;  %v557_v10 = vshll.u32 %v2624_v0, 16 }
  0x40   : > { %v474_v12 = vsel %vm3204_vm4, %v469_v2, %v473_v56  ;;  %v488_v15 = vsel %vm3204_vm4, %v483_v58, %v3276_v16  ;;  %v3325_v17 = vrot.slane %v548_v5, 4  ;;  %v3327_v19 = vrot.slane %v551_v55, 5  ;;  %v2625_v5 = vld [vmem:[%s3166_s9 + $0x8c] sm:$0x1] }
  0x41   : > { %v2680_v21 = vcombine.low %v464_v6, %v474_v12  ;;  %v498_v61 = vsel %vm3204_vm4, %v493_v8, %v497_v9  ;;  %v3332_v22 = vrot.slane %v557_v10, 5  ;;  %v561_v23 = vshrl.u32 %v2624_v0, 16  ;;  %v2628_v9 = vld [vmem:[%s3166_s9 + $0x98] sm:$0x1] }
  0x42   : > { %v2681_v27 = vcombine.low %v488_v15, %v498_v61  ;;  %v2652_v28 = vcombine.low %v2623_v42, %v2624_v0  ;;  %v572_v13 = vshrl.u32 %v2626_v11, 16  ;;  %v575_v14 = vshll.u32 %v2626_v11, 16 }
  0x43   : > { %2893 = vmatprep.mubr.msk.bf16.mxu1 %vm774_vm1, %v2680_v21  ;;  %v3337_v16 = vrot.slane %v561_v23, 4  ;;  %v581_v25 = vshll.u32 %v2627_v20, 16  ;;  %v585_v29 = vshrl.u32 %v2627_v20, 16  ;;  %v2653_v32 = vcombine.low %v2626_v11, %v2627_v20  ;;  %v2635_v20 = vld [vmem:[%s3166_s9 + $0xb4] sm:$0xf] }
  0x44   : > { %2894 = vmatmul.mubr.msk.bf16.gmra.mxu1 %vm774_vm1, %v2681_v27  ;;  %2867 = vmatprep.mubr.msk.bf16.mxu0 %vm774_vm1, %v2652_v28  ;;  %v3341_v30 = vrot.slane %v572_v13, 4  ;;  %v577_v31 = vrot.slane %v575_v14, 5  ;;  %v506_v33 = vor.u32 %v3292_v37, %v3290_v36  ;;  %v516_v34 = vor.u32 %v3301_v35, %v3297_v43 }
  0x45   : > { %v3348_v39 = vrot.slane %v581_v25, 5  ;;  %v3350_v18 = vrot.slane %v585_v29, 4  ;;  %v519_v44 = vshll.u32 %v2619_v24, 16  ;;  %v530_v47 = vor.u32 %v529_v46, %v526_v53  ;;  %v2632_v46 = vld [vmem:[%s3166_s9 + $0xa8] sm:$0xf] }
  0x46   : > { %2868 = vmatmul.mubr.msk.bf16.gmra.mxu0 %vm774_vm1, %v2653_v32  ;;  %v507_v41 = vrot.slane %v506_v33, 4  ;;  %v517_v45 = vrot.slane %v516_v34, 4  ;;  %v540_v48 = vor.u32 %v539_v60, %v3311_v59  ;;  %v543_v36 = vshll.u32 %v2622_v26, 16  ;;  %v2636_v26 = vld [vmem:[%s3166_s9 + $0xb8] sm:$0xf] }
  0x47   : > { %v521_v37 = vrot.slane %v519_v44, 5  ;;  %v531_v49 = vrot.slane %v530_v47, 4  ;;  %v596_v35 = vshrl.u32 %v2629_v38, 16  ;;  %v599_v7 = vshll.u32 %v2629_v38, 16  ;;  %v2639_v32 = vld [vmem:[%s3166_s9 + $0xc4] sm:$0xf] }
  0x48   : > { %v512_v51 = vsel %vm3204_vm4, %v507_v41, %v3297_v43  ;;  %v541_v52 = vrot.slane %v540_v48, 4  ;;  %v545_v50 = vrot.slane %v543_v36, 5  ;;  %v605_v53 = vshll.u32 %v2630_v40, 16 }
  0x49   : > { %v522_v54 = vsel %vm3204_vm4, %v517_v45, %v521_v37  ;;  %v536_v42 = vsel %vm3204_vm4, %v531_v49, %v3311_v59  ;;  %v3364_v60 = vrot.slane %v596_v35, 4  ;;  %v3366_v62 = vrot.slane %v599_v7, 5  ;;  %v2631_v35 = vld [vmem:[%s3166_s9 + $0xa4] sm:$0x1]  ;;  %v2634_v7 = vld [vmem:[%s3166_s9 + $0xb0] sm:$0x1] }
  0x4a   : > { %v2682_v0 = vcombine.low %v512_v51, %v522_v54  ;;  %v546_v43 = vsel %vm3204_vm4, %v541_v52, %v545_v50  ;;  %v3371_v1 = vrot.slane %v605_v53, 5  ;;  %v609_v2 = vshrl.u32 %v2630_v40, 16  ;;  %v1248_v53 = vld [vmem:[%s3166_s9] sm:$0xf] }
  0x4b   : > { %v2683_v3 = vcombine.low %v536_v42, %v546_v43  ;;  %v2654_v4 = vcombine.low %v2629_v38, %v2630_v40  ;;  %v620_v56 = vshrl.u32 %v2632_v46, 16  ;;  %v623_v58 = vshll.u32 %v2632_v46, 16 }
  0x4c   : > { %2897 = vmatprep.mubr.msk.bf16.mxu1 %vm774_vm1, %v2682_v0  ;;  %v3375_v59 = vrot.slane %v609_v2, 4  ;;  %v629_v55 = vshll.u32 %v2633_v63, 16  ;;  %v633_v6 = vshrl.u32 %v2633_v63, 16  ;;  %v2655_v8 = vcombine.low %v2632_v46, %v2633_v63  ;;  %v1249_v0 = vld [vmem:[%s3166_s9 + $0x4] sm:$0xf] }
  0x4d   : > { %2898 = vmatmul.mubr.msk.bf16.gmra.mxu1 %vm774_vm1, %v2683_v3  ;;  %2871 = vmatprep.mubr.msk.bf16.mxu0 %vm774_vm1, %v2654_v4  ;;  %v622_v10 = vrot.slane %v620_v56, 4  ;;  %v625_v11 = vrot.slane %v623_v58, 5  ;;  %v554_v12 = vor.u32 %v3327_v19, %v3325_v17  ;;  %v564_v15 = vor.u32 %v3337_v16, %v3332_v22  ;;  %v2638_v19 = vld [vmem:[%s3166_s9 + $0xc0] sm:$0xf] }
  0x4e   : > { %v3385_v21 = vrot.slane %v629_v55, 5  ;;  %v635_v61 = vrot.slane %v633_v6, 4  ;;  %2872 = vmatmul.mubr.msk.bf16.gmra.mxu0 %vm774_vm1, %v2655_v8  ;;  %v567_v23 = vshll.u32 %v2625_v5, 16  ;;  %v578_v24 = vor.u32 %v577_v31, %v3341_v30 }
  0x4f   : > { %v555_v27 = vrot.slane %v554_v12, 4  ;;  %v565_v28 = vrot.slane %v564_v15, 4  ;;  %v588_v13 = vor.u32 %v3350_v18, %v3348_v39  ;;  %v591_v17 = vshll.u32 %v2628_v9, 16  ;;  %v1250_v15 = vld [vmem:[%s3166_s9 + $0x8] sm:$0x1] }
  0x50   : > { %v569_v14 = vrot.slane %v567_v23, 5  ;;  %v579_v16 = vrot.slane %v578_v24, 4  ;;  %v644_v25 = vshrl.u32 %v2635_v20, 16  ;;  %v647_v29 = vshll.u32 %v2635_v20, 16  ;;  %v2637_v24 = vld [vmem:[%s3166_s9 + $0xbc] sm:$0x1] }
  0x51   : > { %v560_v33 = vsel %vm3204_vm4, %v555_v27, %v3332_v22  ;;  %v589_v34 = vrot.slane %v588_v13, 4  ;;  %v593_v30 = vrot.slane %v591_v17, 5  ;;  %v653_v31 = vshll.u32 %v2636_v26, 16  ;;  %v1252_v17 = vld [vmem:[%s3166_s9 + $0x10] sm:$0xf] }
  0x52   : > { %v570_v38 = vsel %vm3204_vm4, %v565_v28, %v569_v14  ;;  %v584_v18 = vsel %vm3204_vm4, %v579_v16, %v3348_v39  ;;  %v3402_v44 = vrot.slane %v644_v25, 4  ;;  %v3404_v47 = vrot.slane %v647_v29, 5  ;;  %v1253_v29 = vld [vmem:[%s3166_s9 + $0x14] sm:$0x1] }
  0x53   : > { %v2684_v40 = vcombine.low %v560_v33, %v570_v38  ;;  %v594_v22 = vsel %vm3204_vm4, %v589_v34, %v593_v30  ;;  %v3408_v41 = vrot.slane %v653_v31, 5  ;;  %v657_v45 = vshrl.u32 %v2636_v26, 16 }
  0x54   : > { %v2685_v48 = vcombine.low %v584_v18, %v594_v22  ;;  %v2656_v36 = vcombine.low %v2635_v20, %v2636_v26  ;;  %v668_v37 = vshrl.u32 %v2638_v19, 16  ;;  %v671_v49 = vshll.u32 %v2638_v19, 16  ;;  %v1251_v26 = vld [vmem:[%s3166_s9 + $0xc] sm:$0xf] }
  0x55   : > { %2901 = vmatprep.mubr.msk.bf16.mxu1 %vm774_vm1, %v2684_v40  ;;  %v659_v39 = vrot.slane %v657_v45, 4  ;;  %v677_v51 = vshll.u32 %v2639_v32, 16  ;;  %v681_v52 = vshrl.u32 %v2639_v32, 16  ;;  %v2657_v50 = vcombine.low %v2638_v19, %v2639_v32 }
  0x56   : > { %2902 = vmatmul.mubr.msk.bf16.gmra.mxu1 %vm774_vm1, %v2685_v48  ;;  %2875 = vmatprep.mubr.msk.bf16.mxu0 %vm774_vm1, %v2656_v36  ;;  %v3416_v46 = vrot.slane %v668_v37, 4  ;;  %v3418_v54 = vrot.slane %v671_v49, 5  ;;  %v602_v42 = vor.u32 %v3366_v62, %v3364_v60  ;;  %v612_v63 = vor.u32 %v3375_v59, %v3371_v1 }
  0x57   : > { %v3425_v43 = vrot.slane %v677_v51, 5  ;;  %v3427_v2 = vrot.slane %v681_v52, 4  ;;  %2876 = vmatmul.mubr.msk.bf16.gmra.mxu0 %vm774_vm1, %v2657_v50  ;;  %v615_v3 = vshll.u32 %v2631_v35, 16  ;;  %v626_v4 = vor.u32 %v625_v11, %v622_v10  ;;  %v2640_v51 = vld [vmem:[%s3166_s9 + $0xc8] sm:$0x1] }
  0x58   : > { %v603_v56 = vrot.slane %v602_v42, 4  ;;  %v613_v58 = vrot.slane %v612_v63, 4  ;;  %v636_v5 = vor.u32 %v635_v61, %v3385_v21  ;;  %v639_v60 = vshll.u32 %v2634_v7, 16  ;;  %v1254_v63 = vld [vmem:[%s3166_s9 + $0x18] sm:$0xf] }
  0x59   : > { %v617_v62 = vrot.slane %v615_v3, 5  ;;  %v627_v55 = vrot.slane %v626_v4, 4  ;;  %v1297_v59 = vshrl.u32 %v1248_v53, 16  ;;  %v1300_v6 = vshll.u32 %v1248_v53, 16 }
  0x5a   : > { %v608_v8 = vsel %vm3204_vm4, %v603_v56, %v3371_v1  ;;  %v637_v9 = vrot.slane %v636_v5, 4  ;;  %v641_v12 = vrot.slane %v639_v60, 5  ;;  %v1306_v10 = vshll.u32 %v1249_v0, 16  ;;  %v1257_v5 = vld [vmem:[%s3166_s9 + $0x24] sm:$0xf] }
  0x5b   : > { %v618_v11 = vsel %vm3204_vm4, %v613_v58, %v617_v62  ;;  %v632_v20 = vsel %vm3204_vm4, %v627_v55, %v3385_v21  ;;  %v1299_v61 = vrot.slane %v1297_v59, 4  ;;  %v1302_v23 = vrot.slane %v1300_v6, 5  ;;  %v1256_v58 = vld [vmem:[%s3166_s9 + $0x20] sm:$0x1] }
  0x5c   : > { %v2686_v27 = vcombine.low %v608_v8, %v618_v11  ;;  %v642_v1 = vsel %vm3204_vm4, %v637_v9, %v641_v12  ;;  %v1308_v28 = vrot.slane %v1306_v10, 5  ;;  %v1310_v13 = vshrl.u32 %v1249_v0, 16  ;;  %v1255_v0 = vld [vmem:[%s3166_s9 + $0x1c] sm:$0xf] }
  0x5d   : > { %v2687_v19 = vcombine.low %v632_v20, %v642_v1  ;;  %v1303_v14 = vor.u32 %v1302_v23, %v1299_v61  ;;  %v1316_v16 = vshll.u32 %v1250_v15, 16  ;;  %v650_v25 = vor.u32 %v3404_v47, %v3402_v44 }
  0x5e   : > { %2905 = vmatprep.mubr.msk.bf16.mxu1 %vm774_vm1, %v2686_v27  ;;  %v1312_v21 = vrot.slane %v1310_v13, 4  ;;  %v660_v32 = vor.u32 %v659_v39, %v3408_v41  ;;  %v663_v33 = vshll.u32 %v2637_v24, 16  ;;  %v1321_v34 = vshrl.u32 %v1251_v26, 16  ;;  %v1258_v27 = vld [vmem:[%s3166_s9 + $0x28] sm:$0xf] }
  0x5f   : > { %2906 = vmatmul.mubr.msk.bf16.gmra.mxu1 %vm774_vm1, %v2687_v19  ;;  %v1304_v30 = vrot.slane %v1303_v14, 4  ;;  %v1318_v31 = vrot.slane %v1316_v16, 5  ;;  %v651_v38 = vrot.slane %v650_v25, 4  ;;  %v1324_v18 = vshll.u32 %v1251_v26, 16  ;;  %v1259_v14 = vld [vmem:[%s3166_s9 + $0x2c] sm:$0x1] }
  0x60   : > { %v1313_v40 = vor.u32 %v1312_v21, %v1308_v28  ;;  %v661_v22 = vrot.slane %v660_v32, 4  ;;  %v665_v45 = vrot.slane %v663_v33, 5  ;;  %v1323_v44 = vrot.slane %v1321_v34, 4  ;;  %v1260_v16 = vld [vmem:[%s3166_s9 + $0x30] sm:$0xf] }
  0x61   : > { %v1309_v47 = vsel %vm3204_vm4, %v1304_v30, %v1308_v28  ;;  %v656_v48 = vsel %vm3204_vm4, %v651_v38, %v3408_v41  ;;  %v1326_v36 = vrot.slane %v1324_v18, 5  ;;  %v1330_v37 = vshll.u32 %v1252_v17, 16  ;;  %v3043_v28 = vld [vmem:[%s3166_s9] sm:$0xff]   ;;  %v1261_v33 = vld [vmem:[%s3166_s9 + $0x34] sm:$0xf] }
  0x62   : > { %v1314_v49 = vrot.slane %v1313_v40, 4  ;;  %v666_v35 = vsel %vm3204_vm4, %v661_v22, %v665_v45  ;;  %v1334_v7 = vshrl.u32 %v1252_v17, 16  ;;  %v1340_v39 = vshll.u32 %v1253_v29, 16  ;;  %v1262_v18 = vld [vmem:[%s3166_s9 + $0x38] sm:$0x1] }
  0x63   : > { %v2688_v52 = vcombine.low %v656_v48, %v666_v35  ;;  %v1327_v50 = vor.u32 %v1326_v36, %v1323_v44  ;;  %v1332_v53 = vrot.slane %v1330_v37, 5  ;;  %v674_v42 = vor.u32 %v3418_v54, %v3416_v46  ;;  %v3044_v35 = vld [vmem:[%s3166_s9 + $0xc] sm:$0xff]  }
  0x64   : > { %v1319_v41 = vsel %vm3204_vm4, %v1314_v49, %v1318_v31  ;;  %v1336_v3 = vrot.slane %v1334_v7, 4  ;;  %v1342_v4 = vrot.slane %v1340_v39, 5  ;;  %v684_v56 = vor.u32 %v3427_v2, %v3425_v43 }
  0x65   : > { %v2707_v60 = vcombine.low %v1309_v47, %v1319_v41  ;;  %2909 = vmatprep.mubr.msk.bf16.mxu1 %vm774_vm1, %v2688_v52  ;;  %v1328_v62 = vrot.slane %v1327_v50, 4  ;;  %v675_v55 = vrot.slane %v674_v42, 4  ;;  %v687_v59 = vshll.u32 %v2640_v51, 16  ;;  %v1263_v47 = vld [vmem:[%s3166_s9 + $0x3c] sm:$0xf] }
  0x66   : > { %v1337_v6 = vor.u32 %v1336_v3, %v1332_v53  ;;  %v685_v46 = vrot.slane %v684_v56, 4  ;;  %v1345_v54 = vshrl.u32 %v1254_v63, 16  ;;  %v1348_v8 = vshll.u32 %v1254_v63, 16  ;;  %v1264_v50 = vld [vmem:[%s3166_s9 + $0x40] sm:$0xf] }
  0x67   : > { %2915 = vmatprep.mubr.msk.bf16.mxu0 %vm774_vm1, %v2707_v60  ;;  %v1333_v9 = vsel %vm3204_vm4, %v1328_v62, %v1332_v53  ;;  %v680_v2 = vsel %vm3204_vm4, %v675_v55, %v3425_v43  ;;  %v689_v12 = vrot.slane %v687_v59, 5  ;;  %v1354_v15 = vshll.u32 %v1255_v0, 16  ;;  %v3045_v53 = vld [vmem:[%s3166_s9 + $0x18] sm:$0xff]   ;;  %v1265_v55 = vld [vmem:[%s3166_s9 + $0x44] sm:$0x1] }
  0x68   : > { %v1338_v10 = vrot.slane %v1337_v6, 4  ;;  %v1347_v11 = vrot.slane %v1345_v54, 4  ;;  %v1350_v20 = vrot.slane %v1348_v8, 5  ;;  %v1358_v61 = vshrl.u32 %v1255_v0, 16 }
  0x69   : > { %v690_v23 = vsel %vm3204_vm4, %v685_v46, %v689_v12  ;;  %v1356_v24 = vrot.slane %v1354_v15, 5  ;;  %v1364_v26 = vshll.u32 %v1256_v58, 16  ;;  %v1369_v1 = vshrl.u32 %v1257_v5, 16 }
  0x6a   : > { %v1343_v43 = vsel %vm3204_vm4, %v1338_v10, %v1342_v4  ;;  %v2689_v13 = vcombine.low %v680_v2, %v690_v23  ;;  %v1351_v17 = vor.u32 %v1350_v20, %v1347_v11  ;;  %v1360_v19 = vrot.slane %v1358_v61, 4  ;;  %v1267_v11 = vld [vmem:[%s3166_s9 + $0x4c] sm:$0xf] }
  0x6b   : > { %v2708_v25 = vcombine.low %v1333_v9, %v1343_v43  ;;  %v1366_v29 = vrot.slane %v1364_v26, 5  ;;  %v1371_v21 = vrot.slane %v1369_v1, 4  ;;  %v1372_v32 = vshll.u32 %v1257_v5, 16  ;;  %v1266_v9 = vld [vmem:[%s3166_s9 + $0x48] sm:$0xf] }
  0x6c   : > { %2910 = vmatmul.mubr.msk.bf16.gmra.mxu1 %vm774_vm1, %v2689_v13  ;;  %v1352_v34 = vrot.slane %v1351_v17, 4  ;;  %v1361_v30 = vor.u32 %v1360_v19, %v1356_v24  ;;  %v1378_v31 = vshll.u32 %v1258_v27, 16  ;;  %v1382_v38 = vshrl.u32 %v1258_v27, 16 }
  0x6d   : > { %2916 = vmatmul.mubr.msk.bf16.vlgmr.msra.gmra.mxu0 %vm774_vm1, %v2708_v25  ;;  %v1374_v40 = vrot.slane %v1372_v32, 5  ;;  %v1388_v22 = vshll.u32 %v1259_v14, 16  ;;  %2949 = vmatprep.mubr.msk.bf16.mxu1 %vm774_vm1, %v3043_v28  ;;  %v1393_v45 = vshrl.u32 %v1260_v16, 16  ;;  %v1396_v44 = vshll.u32 %v1260_v16, 16  ;;  %v1268_v28 = vld [vmem:[%s3166_s9 + $0x50] sm:$0x1] }
  0x6e   : > { %v1357_v48 = vsel %vm3204_vm4, %v1352_v34, %v1356_v24  ;;  %v1362_v36 = vrot.slane %v1361_v30, 4  ;;  %v1380_v37 = vrot.slane %v1378_v31, 5  ;;  %v1384_v49 = vrot.slane %v1382_v38, 4  ;;  %v1269_v16 = vld [vmem:[%s3166_s9 + $0x54] sm:$0xf] }
  0x6f   : > { %v1375_v7 = vor.u32 %v1374_v40, %v1371_v21  ;;  %v1390_v39 = vrot.slane %v1388_v22, 5  ;;  %v1395_v51 = vrot.slane %v1393_v45, 4  ;;  %v1398_v52 = vrot.slane %v1396_v44, 5  ;;  %v3046_v21 = vld [vmem:[%s3166_s9 + $0x24] sm:$0xff]   ;;  %v3047_v40 = vld [vmem:[%s3166_s9 + $0x30] sm:$0xff]  }
  0x70   : > { %v1367_v42 = vsel %vm3204_vm4, %v1362_v36, %v1366_v29  ;;  %v1385_v63 = vor.u32 %v1384_v49, %v1380_v37  ;;  %v1402_v0 = vshll.u32 %v1261_v33, 16  ;;  %v1406_v41 = vshrl.u32 %v1261_v33, 16  ;;  %v1271_v49 = vld [vmem:[%s3166_s9 + $0x5c] sm:$0x1] }
  0x71   : > { %v2709_v3 = vcombine.low %v1357_v48, %v1367_v42  ;;  %v1376_v4 = vrot.slane %v1375_v7, 4  ;;  %v1399_v56 = vor.u32 %v1398_v52, %v1395_v51  ;;  %v1412_v58 = vshll.u32 %v1262_v18, 16  ;;  %v1270_v18 = vld [vmem:[%s3166_s9 + $0x58] sm:$0xf] }
  0x72   : > { %v1386_v5 = vrot.slane %v1385_v63, 4  ;;  %v1404_v60 = vrot.slane %v1402_v0, 5  ;;  %v1408_v62 = vrot.slane %v1406_v41, 4  ;;  %v1417_v59 = vshrl.u32 %v1263_v47, 16  ;;  %v1273_v41 = vld [vmem:[%s3166_s9 + $0x64] sm:$0xf] }
  0x73   : > { %2919 = vmatprep.mubr.msk.bf16.mxu0 %vm774_vm1, %v2709_v3  ;;  %v1381_v6 = vsel %vm3204_vm4, %v1376_v4, %v1380_v37  ;;  %v1400_v46 = vrot.slane %v1399_v56, 4  ;;  %v1414_v54 = vrot.slane %v1412_v58, 5  ;;  %v1420_v8 = vshll.u32 %v1263_v47, 16 }
  0x74   : > { %v1391_v2 = vsel %vm3204_vm4, %v1386_v5, %v1390_v39  ;;  %2950 = vmatmul.mubr.msk.bf16.vlgmr.msra.gmra.mxu1 %vm774_vm1, %v3044_v35  ;;  %v1409_v12 = vor.u32 %v1408_v62, %v1404_v60  ;;  %v1419_v15 = vrot.slane %v1417_v59, 4  ;;  %v1426_v10 = vshll.u32 %v1264_v50, 16 }
  0x75   : > { %v2710_v20 = vcombine.low %v1381_v6, %v1391_v2  ;;  %v1405_v61 = vsel %vm3204_vm4, %v1400_v46, %v1404_v60  ;;  %v1422_v23 = vrot.slane %v1420_v8, 5  ;;  %v1430_v24 = vshrl.u32 %v1264_v50, 16  ;;  %2953 = vmatprep.mubr.msk.bf16.mxu1 %vm774_vm1, %v3045_v53  ;;  %v1272_v50 = vld [vmem:[%s3166_s9 + $0x60] sm:$0xf]  ;;  %v1275_v2 = vld [vmem:[%s3166_s9 + $0x6c] sm:$0xf] }
  0x76   : > { %v1410_v26 = vrot.slane %v1409_v12, 4  ;;  %v1428_v27 = vrot.slane %v1426_v10, 5  ;;  %v1436_v1 = vshll.u32 %v1265_v55, 16  ;;  %v1441_v43 = vshrl.u32 %v1266_v9, 16  ;;  %v1274_v55 = vld [vmem:[%s3166_s9 + $0x68] sm:$0x1] }
  0x77   : > { %2920 = vmatmul.mubr.msk.bf16.gmra.mxu0 %vm774_vm1, %v2710_v20  ;;  %v1423_v13 = vor.u32 %v1422_v23, %v1419_v15  ;;  %v1432_v17 = vrot.slane %v1430_v24, 4  ;;  %v1444_v19 = vshll.u32 %v1266_v9, 16  ;;  %v1450_v14 = vshll.u32 %v1267_v11, 16  ;;  %v1276_v20 = vld [vmem:[%s3166_s9 + $0x70] sm:$0xf] }
  0x78   : > { %v1415_v25 = vsel %vm3204_vm4, %v1410_v26, %v1414_v54  ;;  %v1438_v29 = vrot.slane %v1436_v1, 5  ;;  %v1443_v32 = vrot.slane %v1441_v43, 4  ;;  %v1454_v33 = vshrl.u32 %v1267_v11, 16  ;;  %v3048_v54 = vld [vmem:[%s3166_s9 + $0x3c] sm:$0xff]   ;;  %v1277_v43 = vld [vmem:[%s3166_s9 + $0x74] sm:$0x1] }
  0x79   : > { %v2711_v34 = vcombine.low %v1405_v61, %v1415_v25  ;;  %v1424_v30 = vrot.slane %v1423_v13, 4  ;;  %v1433_v31 = vor.u32 %v1432_v17, %v1428_v27  ;;  %v1446_v38 = vrot.slane %v1444_v19, 5  ;;  %v3049_v61 = vld [vmem:[%s3166_s9 + $0x48] sm:$0xff]  }
  0x7a   : > { %v1452_v22 = vrot.slane %v1450_v14, 5  ;;  %v1456_v45 = vrot.slane %v1454_v33, 4  ;;  %v1460_v44 = vshll.u32 %v1268_v28, 16  ;;  %v1465_v47 = vshrl.u32 %v1269_v16, 16 }
  0x7b   : > { %2923 = vmatprep.mubr.msk.bf16.mxu0 %vm774_vm1, %v2711_v34  ;;  %v1429_v48 = vsel %vm3204_vm4, %v1424_v30, %v1428_v27  ;;  %v1434_v36 = vrot.slane %v1433_v31, 4  ;;  %v1447_v37 = vor.u32 %v1446_v38, %v1443_v32  ;;  %v1468_v35 = vshll.u32 %v1269_v16, 16  ;;  %v1279_v30 = vld [vmem:[%s3166_s9 + $0x7c] sm:$0xf] }
  0x7c   : > { %2954 = vmatmul.mubr.msk.bf16.gmra.mxu1 %vm774_vm1, %v3046_v21  ;;  %v1457_v7 = vor.u32 %v1456_v45, %v1452_v22  ;;  %v1462_v39 = vrot.slane %v1460_v44, 5  ;;  %v1467_v51 = vrot.slane %v1465_v47, 4  ;;  %v1474_v52 = vshll.u32 %v1270_v18, 16 }
  0x7d   : > { %v1439_v53 = vsel %vm3204_vm4, %v1434_v36, %v1438_v29  ;;  %v1448_v42 = vrot.slane %v1447_v37, 4  ;;  %v1470_v63 = vrot.slane %v1468_v35, 5  ;;  %v1478_v0 = vshrl.u32 %v1270_v18, 16  ;;  %2957 = vmatprep.mubr.msk.bf16.mxu1 %vm774_vm1, %v3047_v40  ;;  %v1278_v29 = vld [vmem:[%s3166_s9 + $0x78] sm:$0xf] }
  0x7e   : > { %v2712_v3 = vcombine.low %v1429_v48, %v1439_v53  ;;  %v1458_v4 = vrot.slane %v1457_v7, 4  ;;  %v1476_v56 = vrot.slane %v1474_v52, 5  ;;  %v1484_v58 = vshll.u32 %v1271_v49, 16  ;;  %v3050_v37 = vld [vmem:[%s3166_s9 + $0x54] sm:$0xff]   ;;  %v1280_v49 = vld [vmem:[%s3166_s9 + $0x80] sm:$0x1] }
  0x7f   : > { %v1453_v5 = vsel %vm3204_vm4, %v1448_v42, %v1452_v22  ;;  %v1471_v60 = vor.u32 %v1470_v63, %v1467_v51  ;;  %v1480_v62 = vrot.slane %v1478_v0, 4  ;;  %v1489_v59 = vshrl.u32 %v1272_v50, 16  ;;  %v1281_v53 = vld [vmem:[%s3166_s9 + $0x84] sm:$0xf] }
  0x80   : > { %2924 = vmatmul.mubr.msk.bf16.gmra.mxu0 %vm774_vm1, %v2712_v3  ;;  %v1463_v6 = vsel %vm3204_vm4, %v1458_v4, %v1462_v39  ;;  %v1486_v46 = vrot.slane %v1484_v58, 5  ;;  %v1492_v8 = vshll.u32 %v1272_v50, 16  ;;  %v1498_v9 = vshll.u32 %v1273_v41, 16  ;;  %v3051_v42 = vld [vmem:[%s3166_s9 + $0x60] sm:$0xff]   ;;  %v1282_v4 = vld [vmem:[%s3166_s9 + $0x88] sm:$0xf] }
  0x81   : > { %v2713_v12 = vcombine.low %v1453_v5, %v1463_v6  ;;  %v1472_v15 = vrot.slane %v1471_v60, 4  ;;  %v1481_v10 = vor.u32 %v1480_v62, %v1476_v56  ;;  %v1491_v11 = vrot.slane %v1489_v59, 4  ;;  %v1283_v59 = vld [vmem:[%s3166_s9 + $0x8c] sm:$0x1] }
  0x82   : > { %v1494_v23 = vrot.slane %v1492_v8, 5  ;;  %v1500_v24 = vrot.slane %v1498_v9, 5  ;;  %v1502_v26 = vshrl.u32 %v1273_v41, 16  ;;  %v1508_v27 = vshll.u32 %v1274_v55, 16 }
  0x83   : > { %2927 = vmatprep.mubr.msk.bf16.mxu0 %vm774_vm1, %v2713_v12  ;;  %v1477_v1 = vsel %vm3204_vm4, %v1472_v15, %v1476_v56  ;;  %v1482_v28 = vrot.slane %v1481_v10, 4  ;;  %v1513_v13 = vshrl.u32 %v1275_v2, 16  ;;  %v1516_v17 = vshll.u32 %v1275_v2, 16  ;;  %v1284_v12 = vld [vmem:[%s3166_s9 + $0x90] sm:$0xf] }
  0x84   : > { %2958 = vmatmul.mubr.msk.bf16.gmra.mxu1 %vm774_vm1, %v3048_v54  ;;  %v1495_v19 = vor.u32 %v1494_v23, %v1491_v11  ;;  %v1504_v14 = vrot.slane %v1502_v26, 4  ;;  %v1510_v16 = vrot.slane %v1508_v27, 5  ;;  %v1522_v25 = vshll.u32 %v1276_v20, 16 }
  0x85   : > { %v1487_v21 = vsel %vm3204_vm4, %v1482_v28, %v1486_v46  ;;  %v1515_v32 = vrot.slane %v1513_v13, 4  ;;  %v1518_v33 = vrot.slane %v1516_v17, 5  ;;  %v1526_v34 = vshrl.u32 %v1276_v20, 16  ;;  %2961 = vmatprep.mubr.msk.bf16.mxu1 %vm774_vm1, %v3049_v61  ;;  %v1285_v61 = vld [vmem:[%s3166_s9 + $0x94] sm:$0xf] }
  0x86   : > { %v2714_v31 = vcombine.low %v1477_v1, %v1487_v21  ;;  %v1496_v38 = vrot.slane %v1495_v19, 4  ;;  %v1505_v18 = vor.u32 %v1504_v14, %v1500_v24  ;;  %v1524_v40 = vrot.slane %v1522_v25, 5  ;;  %v3053_v19 = vld [vmem:[%s3166_s9 + $0x78] sm:$0xff]  }
  0x87   : > { %v1519_v22 = vor.u32 %v1518_v33, %v1515_v32  ;;  %v1528_v45 = vrot.slane %v1526_v34, 4  ;;  %v1532_v44 = vshll.u32 %v1277_v43, 16  ;;  %v1537_v47 = vshrl.u32 %v1278_v29, 16  ;;  %v3052_v43 = vld [vmem:[%s3166_s9 + $0x6c] sm:$0xff]   ;;  %v1287_v32 = vld [vmem:[%s3166_s9 + $0x9c] sm:$0xf] }
  0x88   : > { %2928 = vmatmul.mubr.msk.bf16.gmra.mxu0 %vm774_vm1, %v2714_v31  ;;  %v1501_v48 = vsel %vm3204_vm4, %v1496_v38, %v1500_v24  ;;  %v1506_v36 = vrot.slane %v1505_v18, 4  ;;  %v1540_v35 = vshll.u32 %v1278_v29, 16  ;;  %v1546_v7 = vshll.u32 %v1279_v30, 16  ;;  %v1286_v29 = vld [vmem:[%s3166_s9 + $0x98] sm:$0x1] }
  0x89   : > { %v1520_v39 = vrot.slane %v1519_v22, 4  ;;  %v1529_v51 = vor.u32 %v1528_v45, %v1524_v40  ;;  %v1534_v52 = vrot.slane %v1532_v44, 5  ;;  %v1539_v50 = vrot.slane %v1537_v47, 4  ;;  %v1288_v38 = vld [vmem:[%s3166_s9 + $0xa0] sm:$0xf] }
  0x8a   : > { %v1511_v63 = vsel %vm3204_vm4, %v1506_v36, %v1510_v16  ;;  %v1542_v0 = vrot.slane %v1540_v35, 5  ;;  %v1548_v41 = vrot.slane %v1546_v7, 5  ;;  %v1550_v3 = vshrl.u32 %v1279_v30, 16  ;;  %v1289_v35 = vld [vmem:[%s3166_s9 + $0xa4] sm:$0x1] }
  0x8b   : > { %v2715_v56 = vcombine.low %v1501_v48, %v1511_v63  ;;  %v1525_v58 = vsel %vm3204_vm4, %v1520_v39, %v1524_v40  ;;  %v1530_v5 = vrot.slane %v1529_v51, 4  ;;  %v1556_v60 = vshll.u32 %v1280_v49, 16  ;;  %v1290_v51 = vld [vmem:[%s3166_s9 + $0xa8] sm:$0xf]  ;;  %v1291_v63 = vld [vmem:[%s3166_s9 + $0xac] sm:$0xf] }
  0x8c   : > { %2962 = vmatmul.mubr.msk.bf16.gmra.mxu1 %vm774_vm1, %v3050_v37  ;;  %v1543_v62 = vor.u32 %v1542_v0, %v1539_v50  ;;  %v1552_v55 = vrot.slane %v1550_v3, 4  ;;  %v1561_v6 = vshrl.u32 %v1281_v53, 16  ;;  %v1564_v46 = vshll.u32 %v1281_v53, 16 }
  0x8d   : > { %2931 = vmatprep.mubr.msk.bf16.mxu0 %vm774_vm1, %v2715_v56  ;;  %v1535_v54 = vsel %vm3204_vm4, %v1530_v5, %v1534_v52  ;;  %v1558_v8 = vrot.slane %v1556_v60, 5  ;;  %v1570_v9 = vshll.u32 %v1282_v4, 16  ;;  %v1574_v2 = vshrl.u32 %v1282_v4, 16  ;;  %2965 = vmatprep.mubr.msk.bf16.mxu1 %vm774_vm1, %v3051_v42  ;;  %v3054_v60 = vld [vmem:[%s3166_s9 + $0x84] sm:$0xff]  }
  0x8e   : > { %v2716_v15 = vcombine.low %v1525_v58, %v1535_v54  ;;  %v1544_v10 = vrot.slane %v1543_v62, 4  ;;  %v1553_v11 = vor.u32 %v1552_v55, %v1548_v41  ;;  %v1563_v20 = vrot.slane %v1561_v6, 4  ;;  %v1292_v62 = vld [vmem:[%s3166_s9 + $0xb0] sm:$0x1] }
  0x8f   : > { %v1566_v23 = vrot.slane %v1564_v46, 5  ;;  %v1572_v24 = vrot.slane %v1570_v9, 5  ;;  %v1576_v26 = vrot.slane %v1574_v2, 4  ;;  %v1580_v27 = vshll.u32 %v1283_v59, 16  ;;  %v3055_v9 = vld [vmem:[%s3166_s9 + $0x90] sm:$0xff]  }
  0x90   : > { %2932 = vmatmul.mubr.msk.bf16.gmra.mxu0 %vm774_vm1, %v2716_v15  ;;  %v1549_v1 = vsel %vm3204_vm4, %v1544_v10, %v1548_v41  ;;  %v1554_v28 = vrot.slane %v1553_v11, 4  ;;  %v1585_v13 = vshrl.u32 %v1284_v12, 16  ;;  %v1588_v17 = vshll.u32 %v1284_v12, 16 }
  0x91   : > { %v1567_v14 = vor.u32 %v1566_v23, %v1563_v20  ;;  %v1577_v16 = vor.u32 %v1576_v26, %v1572_v24  ;;  %v1582_v25 = vrot.slane %v1580_v27, 5  ;;  %v1594_v21 = vshll.u32 %v1285_v61, 16 }
  0x92   : > { %v1559_v33 = vsel %vm3204_vm4, %v1554_v28, %v1558_v8  ;;  %v1587_v34 = vrot.slane %v1585_v13, 4  ;;  %v1590_v30 = vrot.slane %v1588_v17, 5  ;;  %v1598_v31 = vshrl.u32 %v1285_v61, 16  ;;  %v1293_v8 = vld [vmem:[%s3166_s9 + $0xb4] sm:$0xf] }
  0x93   : > { %v2717_v18 = vcombine.low %v1549_v1, %v1559_v33  ;;  %v1568_v40 = vrot.slane %v1567_v14, 4  ;;  %v1578_v22 = vrot.slane %v1577_v16, 4  ;;  %v1596_v45 = vrot.slane %v1594_v21, 5 }
  0x94   : > { %2966 = vmatmul.mubr.msk.bf16.gmra.mxu1 %vm774_vm1, %v3052_v43  ;;  %v1591_v44 = vor.u32 %v1590_v30, %v1587_v34  ;;  %v1600_v47 = vrot.slane %v1598_v31, 4  ;;  %v1604_v48 = vshll.u32 %v1286_v29, 16  ;;  %v1609_v36 = vshrl.u32 %v1287_v32, 16 }
  0x95   : > { %2935 = vmatprep.mubr.msk.bf16.mxu0 %vm774_vm1, %v2717_v18  ;;  %v1573_v37 = vsel %vm3204_vm4, %v1568_v40, %v1572_v24  ;;  %v1583_v49 = vsel %vm3204_vm4, %v1578_v22, %v1582_v25  ;;  %v1612_v7 = vshll.u32 %v1287_v32, 16  ;;  %v1618_v39 = vshll.u32 %v1288_v38, 16  ;;  %2969 = vmatprep.mubr.msk.bf16.mxu1 %vm774_vm1, %v3053_v19  ;;  %v1294_v24 = vld [vmem:[%s3166_s9 + $0xb8] sm:$0xf]  ;;  %v1295_v19 = vld [vmem:[%s3166_s9 + $0xbc] sm:$0x1] }
  0x96   : > { %v2718_v52 = vcombine.low %v1573_v37, %v1583_v49  ;;  %v1592_v50 = vrot.slane %v1591_v44, 4  ;;  %v1601_v53 = vor.u32 %v1600_v47, %v1596_v45  ;;  %v1606_v42 = vrot.slane %v1604_v48, 5  ;;  %v3056_v22 = vld [vmem:[%s3166_s9 + $0x9c] sm:$0xff]   ;;  %v3057_v48 = vld [vmem:[%s3166_s9 + $0xa8] sm:$0xff]  }
  0x97   : > { %v1611_v0 = vrot.slane %v1609_v36, 4  ;;  %v1614_v41 = vrot.slane %v1612_v7, 5  ;;  %v1620_v3 = vrot.slane %v1618_v39, 5  ;;  %v1622_v4 = vshrl.u32 %v1288_v38, 16 }
  0x98   : > { %2936 = vmatmul.mubr.msk.bf16.gmra.mxu0 %vm774_vm1, %v2718_v52  ;;  %v1597_v56 = vsel %vm3204_vm4, %v1592_v50, %v1596_v45  ;;  %v1602_v58 = vrot.slane %v1601_v53, 4  ;;  %v1628_v5 = vshll.u32 %v1289_v35, 16  ;;  %v1633_v55 = vshrl.u32 %v1290_v51, 16  ;;  %v3058_v53 = vld [vmem:[%s3166_s9 + $0xb4] sm:$0xff]  }
  0x99   : > { %v1615_v59 = vor.u32 %v1614_v41, %v1611_v0  ;;  %v1624_v6 = vrot.slane %v1622_v4, 4  ;;  %v1636_v46 = vshll.u32 %v1290_v51, 16  ;;  %v1642_v54 = vshll.u32 %v1291_v63, 16 }
  0x9a   : > { %v1607_v2 = vsel %vm3204_vm4, %v1602_v58, %v1606_v42  ;;  %v1630_v12 = vrot.slane %v1628_v5, 5  ;;  %v1635_v15 = vrot.slane %v1633_v55, 4  ;;  %v1646_v10 = vshrl.u32 %v1291_v63, 16 }
  0x9b   : > { %v2719_v11 = vcombine.low %v1597_v56, %v1607_v2  ;;  %v1616_v20 = vrot.slane %v1615_v59, 4  ;;  %v1625_v61 = vor.u32 %v1624_v6, %v1620_v3  ;;  %v1638_v23 = vrot.slane %v1636_v46, 5 }
  0x9c   : > { %2970 = vmatmul.mubr.msk.bf16.gmra.mxu1 %vm774_vm1, %v3054_v60  ;;  %v1644_v26 = vrot.slane %v1642_v54, 5  ;;  %v1648_v27 = vrot.slane %v1646_v10, 4  ;;  %v1652_v1 = vshll.u32 %v1292_v62, 16  ;;  %v1657_v28 = vshrl.u32 %v1293_v8, 16 }
  0x9d   : > { %2939 = vmatprep.mubr.msk.bf16.mxu0 %vm774_vm1, %v2719_v11  ;;  %v1621_v43 = vsel %vm3204_vm4, %v1616_v20, %v1620_v3  ;;  %v1626_v13 = vrot.slane %v1625_v61, 4  ;;  %v1639_v17 = vor.u32 %v1638_v23, %v1635_v15  ;;  %v1660_v14 = vshll.u32 %v1293_v8, 16  ;;  %2973 = vmatprep.mubr.msk.bf16.mxu1 %vm774_vm1, %v3055_v9 }
  0x9e   : > { %v1649_v16 = vor.u32 %v1648_v27, %v1644_v26  ;;  %v1654_v25 = vrot.slane %v1652_v1, 5  ;;  %v1659_v29 = vrot.slane %v1657_v28, 4  ;;  %v1666_v21 = vshll.u32 %v1294_v24, 16 }
  0x9f   : > { %v1631_v32 = vsel %vm3204_vm4, %v1626_v13, %v1630_v12  ;;  %v1640_v33 = vrot.slane %v1639_v17, 4  ;;  %v1662_v34 = vrot.slane %v1660_v14, 5  ;;  %v1670_v30 = vshrl.u32 %v1294_v24, 16 }
  0xa0   : > { %v2720_v31 = vcombine.low %v1621_v43, %v1631_v32  ;;  %v1650_v38 = vrot.slane %v1649_v16, 4  ;;  %v1668_v18 = vrot.slane %v1666_v21, 5  ;;  %v1676_v40 = vshll.u32 %v1295_v19, 16 }
  0xa1   : > { %v1645_v45 = vsel %vm3204_vm4, %v1640_v33, %v1644_v26  ;;  %v1663_v44 = vor.u32 %v1662_v34, %v1659_v29  ;;  %v1672_v47 = vrot.slane %v1670_v30, 4 }
  0xa2   : > { %2940 = vmatmul.mubr.msk.bf16.gmra.mxu0 %vm774_vm1, %v2720_v31  ;;  %v1655_v36 = vsel %vm3204_vm4, %v1650_v38, %v1654_v25  ;;  %v1678_v7 = vrot.slane %v1676_v40, 5 }
  0xa3   : > { %v2721_v37 = vcombine.low %v1645_v45, %v1655_v36  ;;  %v1664_v49 = vrot.slane %v1663_v44, 4  ;;  %v1673_v35 = vor.u32 %v1672_v47, %v1668_v18 }
  0xa4   : > { %2974 = vmatmul.mubr.msk.bf16.gmra.mxu1 %vm774_vm1, %v3056_v22 }
  0xa5   : > { %2943 = vmatprep.mubr.msk.bf16.mxu0 %vm774_vm1, %v2721_v37  ;;  %v1669_v39 = vsel %vm3204_vm4, %v1664_v49, %v1668_v18  ;;  %v1674_v51 = vrot.slane %v1673_v35, 4  ;;  %2977 = vmatprep.mubr.msk.bf16.mxu1 %vm774_vm1, %v3057_v48 }
  0xa7   : > { %v1679_v52 = vsel %vm3204_vm4, %v1674_v51, %v1678_v7 }
  0xa8   : > { %v2722_v50 = vcombine.low %v1669_v39, %v1679_v52 }
  0xaa   : > { %2944 = vmatmul.mubr.msk.bf16.gmra.mxu0 %vm774_vm1, %v2722_v50 }
  0xac   : > { %2978 = vmatmul.mubr.msk.bf16.gmra.mxu1 %vm774_vm1, %v3058_v53 }
  0xde   : > { %v3622_v42 = vpop.f32.mrf.mxu0 }
  0xe0   : > { %v3624_v63 = vpop.f32.mrf.mxu0 }
  0xe2   : > { %v3626_v0 = vpop.f32.mrf.mxu0 }
  0xe4   : > { %v3628_v41 = vpop.f32.mrf.mxu0 }
  0xe6   : > { %v3630_v3 = vpop.f32.mrf.mxu0 }
  0xe8   : > { %v3632_v4 = vpop.f32.mrf.mxu0 }
  0xe9   : > { %v2883_v57 = vpop.f32.mrf.mxu1 }
  0xea   : > { %v3634_v56 = vpop.f32.mrf.mxu0 }
  0xeb   : > { %v1121_v58 = vpop.f32.mrf.mxu1 }
  0xec   : > { %v3636_v5 = vpop.f32.mrf.mxu0 }
  0xed   : > { %v3638_v60 = vpop.f32.mrf.mxu1 }
  0xee   : > { %v3640_v62 = vpop.f32.mrf.mxu0 }
  0xef   : > { %v3642_v55 = vpop.f32.mrf.mxu1 }
  0xf0   : > { %v3644_v59 = vpop.f32.mrf.mxu0 }
  0xf2   : > { %v3646_v6 = vpop.f32.mrf.mxu1  ;;  %v3648_v46 = vpop.f32.mrf.mxu0 }
  0xf4   : > { %v3650_v54 = vpop.f32.mrf.mxu1  ;;  %v3652_v8 = vpop.f32.mrf.mxu0 }
  0xf6   : > { %v3654_v9 = vpop.f32.mrf.mxu1  ;;  %v3656_v2 = vpop.f32.mrf.mxu0 }
  0xf8   : > { %v3658_v12 = vpop.f32.mrf.mxu1  ;;  %v3660_v15 = vpop.f32.mrf.mxu0 }
  0xfa   : > { %v3662_v10 = vpop.f32.mrf.mxu0 }
  0xfb   : > { %v3664_v11 = vpop.f32.mrf.mxu1 }
  0xfc   : > { %v3666_v20 = vpop.f32.mrf.mxu0 }
  0xfd   : > { %v3668_v61 = vpop.f32.mrf.mxu1 }
  0xfe   : > { %v3670_v23 = vpop.f32.mrf.mxu0 }
  0xff   : > { %v3672_v24 = vpop.f32.mrf.mxu1 }
 0x100   : > { %v3674_v26 = vpop.f32.mrf.mxu0 }
 0x101   : > { %v3676_v27 = vpop.f32.mrf.mxu1 }
 0x102   : > { %v3678_v1 = vpop.f32.mrf.mxu0 }
 0x104   : > { %v3680_v28 = vpop.f32.mrf.mxu1  ;;  %v3682_v43 = vpop.f32.mrf.mxu0 }
 0x106   : > { %v3684_v13 = vpop.f32.mrf.mxu1  ;;  %v3686_v17 = vpop.f32.mrf.mxu0 }
 0x108   : > { %v3688_v19 = vpop.f32.mrf.mxu1  ;;  %v3690_v14 = vpop.f32.mrf.mxu0 }
 0x10a   : > { %v3692_v16 = vpop.f32.mrf.mxu1  ;;  %v3694_v25 = vpop.f32.mrf.mxu0 }
 0x10c   : > { %v3696_v29 = vpop.f32.mrf.mxu0 }
 0x10d   : > { %v3698_v21 = vpop.f32.mrf.mxu1 }
 0x10e   : > { %v3700_v32 = vpop.f32.mrf.mxu0 }
 0x10f   : > { %v3702_v33 = vpop.f32.mrf.mxu1 }
 0x110   : > { %v3706_v30 = vpop.f32.mrf.mxu0 }
 0x111   : > { %v3704_v34 = vpop.f32.mrf.mxu1  ;;  %3974 = vst [vmem:[#allocation2_spill] sm:$0xff] %v3706_v30 }
 0x112   : > { %v3710_v38 = vpop.f32.mrf.mxu0 }
 0x113   : > { %v3708_v31 = vpop.f32.mrf.mxu1  ;;  %3975 = vst [vmem:[#allocation3_spill] sm:$0xff] %v3710_v38 }
 0x114   : > { %v3716_v22 = vpop.f32.mrf.mxu0 }
 0x115   : > { %3976 = vst [vmem:[#allocation4_spill] sm:$0xff] %v3716_v22 }
 0x116   : > { %v3712_v18 = vpop.f32.mrf.mxu1 }
 0x117   : > { %v3722_v47 = vpop.f32.mrf.mxu0 }
 0x118   : > { %v3714_v40 = vpop.f32.mrf.mxu1  ;;  %3977 = vst [vmem:[#allocation5_spill] sm:$0xff] %v3722_v47 }
 0x119   : > { %v3726_v36 = vpop.f32.mrf.mxu0 }
 0x11a   : > { %v3718_v45 = vpop.f32.mrf.mxu1  ;;  %3978 = vst [vmem:[#allocation6_spill] sm:$0xff] %v3726_v36  ;;  %v1130_v36 = vadd.f32 %v2883_v57, %v3622_v42  ;;  %v3758_v42 = vld [vmem:[%s3970_s3] ss:$0 sm:$0xff] }
 0x11b   : > { %v3732_v35 = vpop.f32.mrf.mxu0 }
 0x11c   : > { %v3720_v44 = vpop.f32.mrf.mxu1  ;;  %3981 = vst [vmem:[#allocation9_spill] sm:$0xff] %v3732_v35  ;;  %v1122_v35 = vadd.f32 %v1121_v58, %v3624_v63  ;;  %v1125_v63 = vadd.f32 %v3642_v55, %v3628_v41  ;;  %v1138_v41 = vadd.f32 %v3650_v54, %v3632_v4 }
 0x11d   : > { %v3736_v39 = vpop.f32.mrf.mxu0 }
 0x11e   : > { %3983 = vst [vmem:[#allocation11_spill] sm:$0xff] %v3736_v39  ;;  %v3751_v39 = vld [vmem:[%s3969_s2] ss:$0 sm:$0xff] }
 0x11f   : > { %v3724_v48 = vpop.f32.mrf.mxu1 }
 0x121   : > { %v3728_v37 = vpop.f32.mrf.mxu1 }
 0x122   : > { %3979 = vst [vmem:[#allocation7_spill] sm:$0xff] %v3728_v37 }
 0x123   : > { %v3730_v49 = vpop.f32.mrf.mxu1 }
 0x124   : > { %3980 = vst [vmem:[#allocation8_spill] sm:$0xff] %v3730_v49 }
 0x125   : > { %v3734_v7 = vpop.f32.mrf.mxu1 }
 0x126   : > { %3982 = vst [vmem:[#allocation10_spill] sm:$0xff] %v3734_v7 }
 0x12c   : > { %v3738_v51 = vpop.f32.mrf.mxu1 }
 0x12d   : > { %3984 = vst [vmem:[#allocation12_spill] sm:$0xff] %v3738_v51  ;;  %v2917_v52 = vpop.f32.mrf.mxu0 }
 0x12e   : > { %v3740_v50 = vpop.f32.mrf.mxu1  ;;  %v1944_v49 = vadd.f32 %v2917_v52, %v1130_v36 }
 0x12f   : > { %3985 = vst [vmem:[#allocation13_spill] sm:$0xff] %v3740_v50  ;;  %v1815_v53 = vpop.f32.mrf.mxu0  ;;  %v1133_v50 = vadd.f32 %v3638_v60, %v3626_v0  ;;  %v1146_v0 = vadd.f32 %v3646_v6, %v3630_v3 }
 0x130   : > { %v3742_v47 = vpop.f32.mrf.mxu1  ;;  %v1942_v51 = vadd.f32 %v1815_v53, %v1122_v35 }
 0x131   : > { %3986 = vst [vmem:[#allocation14_spill] sm:$0xff] %v3742_v47  ;;  %v2918_v22 = vpop.f32.mrf.mxu0 }
 0x132   : > { %v3745_v38 = vpop.f32.mrf.mxu1  ;;  %v1945_v58 = vadd.f32 %v2918_v22, %v1133_v50 }
 0x133   : > { %3987 = vst [vmem:[#allocation15_spill] sm:$0xff] %v3745_v38  ;;  %v1818_v7 = vpop.f32.mrf.mxu0 }
 0x134   : > { %v2951_v37 = vpop.f32.mrf.mxu1 }
 0x135   : > { %v2302_v47 = vadd.f32 %v2951_v37, %v1944_v49  ;;  %v1943_v37 = vadd.f32 %v1818_v7, %v1125_v63 }
 0x136   : > { %v2173_v57 = vpop.f32.mrf.mxu1 }
 0x137   : > { %v2921_v36 = vpop.f32.mrf.mxu0  ;;  %v2341_v52 = vmul.f32 %v3751_v39, %v2302_v47  ;;  %v2300_v38 = vadd.f32 %v2173_v57, %v1942_v51 }
 0x138   : > { %v2952_v60 = vpop.f32.mrf.mxu1  ;;  %v1948_v55 = vadd.f32 %v2921_v36, %v1146_v0  ;;  %v1149_v36 = vadd.f32 %v3654_v9, %v3634_v56 }
 0x139   : > { %v2380_v49 = vadd.f32 %v3758_v42, %v2341_v52  ;;  %v1831_v35 = vpop.f32.mrf.mxu0  ;;  %v2339_v53 = vmul.f32 %v3751_v39, %v2300_v38  ;;  %v2303_v30 = vadd.f32 %v2952_v60, %v1945_v58  ;;  %v1141_v52 = vadd.f32 %v3658_v12, %v3636_v5 }
 0x13a   : > { %v2176_v3 = vpop.f32.mrf.mxu1  ;;  %v1946_v51 = vadd.f32 %v1831_v35, %v1138_v41  ;;  %v1162_v35 = vadd.f32 %v3664_v11, %v3640_v62 }
 0x13b   : > { %v2412_v6 = vmax.f32 %v2380_v49, 0.0  ;;  %v2378_v22 = vadd.f32 %v3758_v42, %v2339_v53  ;;  %v2922_v47 = vpop.f32.mrf.mxu0  ;;  %v2342_v38 = vmul.f32 %v3751_v39, %v2303_v30  ;;  %v2301_v7 = vadd.f32 %v2176_v3, %v1943_v37 }
 0x13c   : > { %v2955_v50 = vpop.f32.mrf.mxu1  ;;  %v1949_v53 = vadd.f32 %v2922_v47, %v1149_v36  ;;  %v1154_v3 = vadd.f32 %v3668_v61, %v3644_v59 }
 0x13d   : > { %2445 = vst.msk [vmem:[%s3771_s22 + $0x10] sm:$0xff] %vm2442_vm5, %v2412_v6  ;;  %v2410_v57 = vmax.f32 %v2378_v22, 0.0  ;;  %v2381_v63 = vadd.f32 %v3758_v42, %v2342_v38  ;;  %v1834_v4 = vpop.f32.mrf.mxu0  ;;  %v2340_v54 = vmul.f32 %v3751_v39, %v2301_v7  ;;  %v2306_v58 = vadd.f32 %v2955_v50, %v1948_v55 }
 0x13e   : > { %v2189_v30 = vpop.f32.mrf.mxu1  ;;  %v1947_v56 = vadd.f32 %v1834_v4, %v1141_v52 }
 0x13f   : > { %2443 = vst.msk [vmem:[%s3771_s22] sm:$0xff] %vm2442_vm5, %v2410_v57  ;;  %v2413_v0 = vmax.f32 %v2381_v63, 0.0  ;;  %v2379_v60 = vadd.f32 %v3758_v42, %v2340_v54  ;;  %v2345_v37 = vmul.f32 %v3751_v39, %v2306_v58  ;;  %v2304_v49 = vadd.f32 %v2189_v30, %v1946_v51 }
 0x140   : > { %v2925_v41 = vpop.f32.mrf.mxu0  ;;  %v2956_v55 = vpop.f32.mrf.mxu1  ;;  %v1165_v54 = vadd.f32 %v3672_v24, %v3648_v46  ;;  %v1157_v30 = vadd.f32 %v3676_v27, %v3652_v8 }
 0x141   : > { %2446 = vst.msk [vmem:[%s3771_s22 + $0x18] sm:$0xff] %vm2442_vm5, %v2413_v0  ;;  %v2411_v5 = vmax.f32 %v2379_v60, 0.0  ;;  %v2384_v9 = vadd.f32 %v3758_v42, %v2345_v37  ;;  %v2343_v12 = vmul.f32 %v3751_v39, %v2304_v49  ;;  %v2307_v22 = vadd.f32 %v2956_v55, %v1949_v53 }
 0x142   : > { %v1847_v6 = vpop.f32.mrf.mxu0  ;;  %v2192_v38 = vpop.f32.mrf.mxu1  ;;  %v1952_v62 = vadd.f32 %v2925_v41, %v1162_v35  ;;  %v1178_v49 = vadd.f32 %v3680_v28, %v3656_v2 }
 0x143   : > { %2444 = vst.msk [vmem:[%s3771_s22 + $0x8] sm:$0xff] %vm2442_vm5, %v2411_v5  ;;  %v2416_v11 = vmax.f32 %v2384_v9, 0.0  ;;  %v2382_v47 = vadd.f32 %v3758_v42, %v2343_v12  ;;  %v2305_v7 = vadd.f32 %v2192_v38, %v1947_v56  ;;  %v2346_v50 = vmul.f32 %v3751_v39, %v2307_v22 }
 0x144   : > { %v2926_v51 = vpop.f32.mrf.mxu0  ;;  %v2959_v57 = vpop.f32.mrf.mxu1  ;;  %v1950_v63 = vadd.f32 %v1847_v6, %v1154_v3  ;;  %v1170_v56 = vadd.f32 %v3684_v13, %v3660_v15 }
 0x145   : > { %2449 = vst.msk [vmem:[%s3771_s22 + $0x30] sm:$0xff] %vm2442_vm5, %v2416_v11  ;;  %v2414_v4 = vmax.f32 %v2382_v47, 0.0  ;;  %v2344_v59 = vmul.f32 %v3751_v39, %v2305_v7  ;;  %v2310_v61 = vadd.f32 %v2959_v57, %v1952_v62  ;;  %v2385_v58 = vadd.f32 %v3758_v42, %v2346_v50 }
 0x146   : > { %v1850_v36 = vpop.f32.mrf.mxu0  ;;  %v2205_v52 = vpop.f32.mrf.mxu1  ;;  %v1953_v46 = vadd.f32 %v2926_v51, %v1165_v54  ;;  %v1181_v7 = vadd.f32 %v3688_v19, %v3662_v10  ;;  %v1194_v54 = vadd.f32 %v3698_v21, %v3670_v23 }
 0x147   : > { %2447 = vst.msk [vmem:[%s3771_s22 + $0x20] sm:$0xff] %vm2442_vm5, %v2414_v4  ;;  %v2383_v0 = vadd.f32 %v3758_v42, %v2344_v59  ;;  %v2349_v60 = vmul.f32 %v3751_v39, %v2310_v61  ;;  %v2308_v37 = vadd.f32 %v2205_v52, %v1950_v63  ;;  %v2417_v24 = vmax.f32 %v2385_v58, 0.0 }
 0x148   : > { %v2929_v35 = vpop.f32.mrf.mxu0  ;;  %v2960_v53 = vpop.f32.mrf.mxu1  ;;  %v1951_v41 = vadd.f32 %v1850_v36, %v1157_v30  ;;  %v1173_v63 = vadd.f32 %v3692_v16, %v3666_v20 }
 0x149   : > { %v2415_v55 = vmax.f32 %v2383_v0, 0.0  ;;  %v2388_v8 = vadd.f32 %v3758_v42, %v2349_v60  ;;  %v2347_v27 = vmul.f32 %v3751_v39, %v2308_v37  ;;  %2450 = vst.msk [vmem:[%s3771_s22 + $0x38] sm:$0xff] %vm2442_vm5, %v2417_v24  ;;  %v2311_v9 = vadd.f32 %v2960_v53, %v1953_v46 }
 0x14a   : > { %v1863_v5 = vpop.f32.mrf.mxu0  ;;  %v2208_v12 = vpop.f32.mrf.mxu1  ;;  %v1956_v2 = vadd.f32 %v2929_v35, %v1178_v49  ;;  %v1186_v0 = vadd.f32 %v3702_v33, %v3674_v26 }
 0x14b   : > { %2448 = vst.msk [vmem:[%s3771_s22 + $0x28] sm:$0xff] %vm2442_vm5, %v2415_v55  ;;  %v2420_v28 = vmax.f32 %v2388_v8, 0.0  ;;  %v2386_v3 = vadd.f32 %v3758_v42, %v2347_v27  ;;  %v2309_v6 = vadd.f32 %v2208_v12, %v1951_v41  ;;  %v2350_v38 = vmul.f32 %v3751_v39, %v2311_v9 }
 0x14c   : > { %v2930_v22 = vpop.f32.mrf.mxu0  ;;  %v2963_v62 = vpop.f32.mrf.mxu1  ;;  %v1954_v15 = vadd.f32 %v1863_v5, %v1170_v56  ;;  %v1197_v27 = vadd.f32 %v3704_v34, %v3678_v1  ;;  %v1189_v12 = vadd.f32 %v3708_v31, %v3682_v43  ;;  %v1202_v31 = vadd.f32 %v3714_v40, %v3690_v14 }
 0x14d   : > { %2453 = vst.msk [vmem:[%s3771_s22 + $0x50] sm:$0xff] %vm2442_vm5, %v2420_v28  ;;  %v2418_v13 = vmax.f32 %v2386_v3, 0.0  ;;  %v2348_v11 = vmul.f32 %v3751_v39, %v2309_v6  ;;  %v2314_v47 = vadd.f32 %v2963_v62, %v1956_v2  ;;  %v2389_v51 = vadd.f32 %v3758_v42, %v2350_v38 }
 0x14e   : > { %v1866_v50 = vpop.f32.mrf.mxu0  ;;  %v2221_v57 = vpop.f32.mrf.mxu1  ;;  %v1957_v10 = vadd.f32 %v2930_v22, %v1181_v7  ;;  %v1210_v6 = vadd.f32 %v3712_v18, %v3686_v17 }
 0x14f   : > { %2451 = vst.msk [vmem:[%s3771_s22 + $0x40] sm:$0xff] %vm2442_vm5, %v2418_v13  ;;  %v2387_v4 = vadd.f32 %v3758_v42, %v2348_v11  ;;  %v2353_v59 = vmul.f32 %v3751_v39, %v2314_v47  ;;  %v2312_v61 = vadd.f32 %v2221_v57, %v1954_v15  ;;  %v2421_v19 = vmax.f32 %v2389_v51, 0.0 }
 0x150   : > { %v2933_v58 = vpop.f32.mrf.mxu0  ;;  %v2964_v36 = vpop.f32.mrf.mxu1  ;;  %v1955_v52 = vadd.f32 %v1866_v50, %v1173_v63  ;;  %v1213_v57 = vadd.f32 %v3718_v45, %v3694_v25 }
 0x151   : > { %v2419_v30 = vmax.f32 %v2387_v4, 0.0  ;;  %v2392_v20 = vadd.f32 %v3758_v42, %v2353_v59  ;;  %v2351_v16 = vmul.f32 %v3751_v39, %v2312_v61  ;;  %2454 = vst.msk [vmem:[%s3771_s22 + $0x58] sm:$0xff] %vm2442_vm5, %v2421_v19  ;;  %v2315_v37 = vadd.f32 %v2964_v36, %v1957_v10 }
 0x152   : > { %v1879_v60 = vpop.f32.mrf.mxu0  ;;  %v2224_v49 = vpop.f32.mrf.mxu1  ;;  %v1960_v23 = vadd.f32 %v2933_v58, %v1194_v54 }
 0x153   : > { %2452 = vst.msk [vmem:[%s3771_s22 + $0x48] sm:$0xff] %vm2442_vm5, %v2419_v30  ;;  %v2424_v21 = vmax.f32 %v2392_v20, 0.0  ;;  %v2390_v46 = vadd.f32 %v3758_v42, %v2351_v16  ;;  %v2313_v24 = vadd.f32 %v2224_v49, %v1955_v52  ;;  %v2354_v53 = vmul.f32 %v3751_v39, %v2315_v37 }
 0x154   : > { %v2934_v35 = vpop.f32.mrf.mxu0  ;;  %v2967_v41 = vpop.f32.mrf.mxu1  ;;  %v1958_v26 = vadd.f32 %v1879_v60, %v1186_v0  ;;  %v1205_v30 = vadd.f32 %v3720_v44, %v3696_v29  ;;  %v1226_v20 = vadd.f32 %v3724_v48, %v3700_v32 }
 0x155   : > { %2457 = vst.msk [vmem:[%s3771_s22 + $0x70] sm:$0xff] %vm2442_vm5, %v2424_v21  ;;  %v2422_v33 = vmax.f32 %v2390_v46, 0.0  ;;  %v2352_v55 = vmul.f32 %v3751_v39, %v2313_v24  ;;  %v2318_v8 = vadd.f32 %v2967_v41, %v1960_v23  ;;  %v2393_v56 = vadd.f32 %v3758_v42, %v2354_v53  ;;  %v3988_v21 = vld [vmem:[#allocation2_spill] sm:$0xff]  ;;  %v3989_v46 = vld [vmem:[#allocation7_spill] sm:$0xff] }
 0x156   : > { %v1882_v5 = vpop.f32.mrf.mxu0  ;;  %v2237_v9 = vpop.f32.mrf.mxu1  ;;  %v1961_v1 = vadd.f32 %v2934_v35, %v1197_v27  ;;  %v1218_v24 = vadd.f32 %v3989_v46, %v3988_v21 }
 0x157   : > { %2455 = vst.msk [vmem:[%s3771_s22 + $0x60] sm:$0xff] %vm2442_vm5, %v2422_v33  ;;  %v2391_v2 = vadd.f32 %v3758_v42, %v2352_v55  ;;  %v2357_v28 = vmul.f32 %v3751_v39, %v2318_v8  ;;  %v2316_v3 = vadd.f32 %v2237_v9, %v1958_v26  ;;  %v2425_v34 = vmax.f32 %v2393_v56, 0.0  ;;  %v3990_v26 = vld [vmem:[#allocation3_spill] sm:$0xff]  ;;  %v3991_v33 = vld [vmem:[#allocation8_spill] sm:$0xff] }
 0x158   : > { %v2937_v22 = vpop.f32.mrf.mxu0  ;;  %v2968_v38 = vpop.f32.mrf.mxu1  ;;  %v1959_v62 = vadd.f32 %v1882_v5, %v1189_v12  ;;  %v1229_v55 = vadd.f32 %v3991_v33, %v3990_v26 }
 0x159   : > { %v2423_v15 = vmax.f32 %v2391_v2, 0.0  ;;  %v2396_v13 = vadd.f32 %v3758_v42, %v2357_v28  ;;  %v2355_v43 = vmul.f32 %v3751_v39, %v2316_v3  ;;  %2458 = vst.msk [vmem:[%s3771_s22 + $0x78] sm:$0xff] %vm2442_vm5, %v2425_v34  ;;  %v2319_v47 = vadd.f32 %v2968_v38, %v1961_v1 }
 0x15a   : > { %v1895_v11 = vpop.f32.mrf.mxu0  ;;  %v2240_v7 = vpop.f32.mrf.mxu1  ;;  %v1964_v17 = vadd.f32 %v2937_v22, %v1210_v6 }
 0x15b   : > { %2456 = vst.msk [vmem:[%s3771_s22 + $0x68] sm:$0xff] %vm2442_vm5, %v2423_v15  ;;  %v2428_v18 = vmax.f32 %v2396_v13, 0.0  ;;  %v2394_v51 = vadd.f32 %v3758_v42, %v2355_v43  ;;  %v2317_v50 = vadd.f32 %v2240_v7, %v1959_v62  ;;  %v2358_v4 = vmul.f32 %v3751_v39, %v2319_v47  ;;  %v3992_v62 = vld [vmem:[#allocation4_spill] sm:$0xff]  ;;  %v3993_v15 = vld [vmem:[#allocation10_spill] sm:$0xff]  ;;  %v3994_v47 = vld [vmem:[#allocation5_spill] sm:$0xff] }
 0x15c   : > { %v2938_v63 = vpop.f32.mrf.mxu0  ;;  %v2971_v14 = vpop.f32.mrf.mxu1  ;;  %v1962_v40 = vadd.f32 %v1895_v11, %v1202_v31  ;;  %v1221_v13 = vadd.f32 %v3993_v15, %v3992_v62  ;;  %v3995_v7 = vld [vmem:[#allocation12_spill] sm:$0xff] }
 0x15d   : > { %2461 = vst.msk [vmem:[%s3771_s22 + $0x90] sm:$0xff] %vm2442_vm5, %v2428_v18  ;;  %v2426_v59 = vmax.f32 %v2394_v51, 0.0  ;;  %v2356_v61 = vmul.f32 %v3751_v39, %v2317_v50  ;;  %v2322_v54 = vadd.f32 %v2971_v14, %v1964_v17  ;;  %v2397_v10 = vadd.f32 %v3758_v42, %v2358_v4 }
 0x15e   : > { %v1898_v19 = vpop.f32.mrf.mxu0  ;;  %v2253_v58 = vpop.f32.mrf.mxu1  ;;  %v1965_v36 = vadd.f32 %v2938_v63, %v1213_v57  ;;  %v1242_v17 = vadd.f32 %v3995_v7, %v3994_v47  ;;  %v3996_v57 = vld [vmem:[#allocation6_spill] sm:$0xff]  ;;  %v3997_v63 = vld [vmem:[#allocation13_spill] sm:$0xff] }
 0x15f   : > { %2459 = vst.msk [vmem:[%s3771_s22 + $0x80] sm:$0xff] %vm2442_vm5, %v2426_v59  ;;  %v2395_v25 = vadd.f32 %v3758_v42, %v2356_v61  ;;  %v2361_v45 = vmul.f32 %v3751_v39, %v2322_v54  ;;  %v2320_v52 = vadd.f32 %v2253_v58, %v1962_v40  ;;  %v2429_v16 = vmax.f32 %v2397_v10, 0.0 }
 0x160   : > { %v2972_v0 = vpop.f32.mrf.mxu1  ;;  %v1963_v35 = vadd.f32 %v1898_v19, %v1205_v30  ;;  %v1234_v4 = vadd.f32 %v3997_v63, %v3996_v57 }
 0x161   : > { %v2427_v60 = vmax.f32 %v2395_v25, 0.0  ;;  %v2400_v37 = vadd.f32 %v3758_v42, %v2361_v45  ;;  %v2359_v49 = vmul.f32 %v3751_v39, %v2320_v52  ;;  %v2323_v23 = vadd.f32 %v2972_v0, %v1965_v36  ;;  %2462 = vst.msk [vmem:[%s3771_s22 + $0x98] sm:$0xff] %vm2442_vm5, %v2429_v16  ;;  %v3998_v36 = vld [vmem:[#allocation9_spill] sm:$0xff]  ;;  %v3999_v25 = vld [vmem:[#allocation14_spill] sm:$0xff] }
 0x162   : > { %v2941_v53 = vpop.f32.mrf.mxu0  ;;  %v2256_v29 = vpop.f32.mrf.mxu1  ;;  %v1245_v45 = vadd.f32 %v3999_v25, %v3998_v36 }
 0x163   : > { %2460 = vst.msk [vmem:[%s3771_s22 + $0x88] sm:$0xff] %vm2442_vm5, %v2427_v60  ;;  %v1968_v32 = vadd.f32 %v2941_v53, %v1226_v20  ;;  %v2432_v44 = vmax.f32 %v2400_v37, 0.0  ;;  %v2398_v48 = vadd.f32 %v3758_v42, %v2359_v49  ;;  %v2362_v41 = vmul.f32 %v3751_v39, %v2323_v23  ;;  %v4000_v49 = vld [vmem:[#allocation11_spill] sm:$0xff] }
 0x164   : > { %v1911_v8 = vpop.f32.mrf.mxu0  ;;  %v2321_v27 = vadd.f32 %v2256_v29, %v1963_v35  ;;  %v2975_v56 = vpop.f32.mrf.mxu1  ;;  %v4001_v23 = vld [vmem:[#allocation15_spill] sm:$0xff] }
 0x165   : > { %2465 = vst.msk [vmem:[%s3771_s22 + $0xb0] sm:$0xff] %vm2442_vm5, %v2432_v44  ;;  %v1966_v5 = vadd.f32 %v1911_v8, %v1218_v24  ;;  %v2430_v9 = vmax.f32 %v2398_v48, 0.0  ;;  %v2401_v12 = vadd.f32 %v3758_v42, %v2362_v41  ;;  %v2326_v2 = vadd.f32 %v2975_v56, %v1968_v32 }
 0x166   : > { %v2942_v28 = vpop.f32.mrf.mxu0  ;;  %v2360_v3 = vmul.f32 %v3751_v39, %v2321_v27  ;;  %v2269_v6 = vpop.f32.mrf.mxu1  ;;  %v1237_v21 = vadd.f32 %v4001_v23, %v4000_v49 }
 0x167   : > { %2463 = vst.msk [vmem:[%s3771_s22 + $0xa0] sm:$0xff] %vm2442_vm5, %v2430_v9  ;;  %v1969_v1 = vadd.f32 %v2942_v28, %v1229_v55  ;;  %v2433_v34 = vmax.f32 %v2401_v12, 0.0  ;;  %v2365_v22 = vmul.f32 %v3751_v39, %v2326_v2  ;;  %v2324_v38 = vadd.f32 %v2269_v6, %v1966_v5 }
 0x168   : > { %v1914_v43 = vpop.f32.mrf.mxu0  ;;  %v2399_v31 = vadd.f32 %v3758_v42, %v2360_v3  ;;  %v2976_v11 = vpop.f32.mrf.mxu1 }
 0x169   : > { %2466 = vst.msk [vmem:[%s3771_s22 + $0xb8] sm:$0xff] %vm2442_vm5, %v2433_v34  ;;  %v2404_v18 = vadd.f32 %v3758_v42, %v2365_v22  ;;  %v2363_v51 = vmul.f32 %v3751_v39, %v2324_v38  ;;  %v2327_v50 = vadd.f32 %v2976_v11, %v1969_v1  ;;  %v1967_v14 = vadd.f32 %v1914_v43, %v1221_v13 }
 0x16a   : > { %v2431_v40 = vmax.f32 %v2399_v31, 0.0  ;;  %v2945_v59 = vpop.f32.mrf.mxu0  ;;  %v2272_v61 = vpop.f32.mrf.mxu1 }
 0x16b   : > { %v1972_v54 = vadd.f32 %v2945_v59, %v1242_v17  ;;  %v2436_v10 = vmax.f32 %v2404_v18, 0.0  ;;  %v2402_v19 = vadd.f32 %v3758_v42, %v2363_v51  ;;  %v2366_v58 = vmul.f32 %v3751_v39, %v2327_v50 }
 0x16c   : > { %2464 = vst.msk [vmem:[%s3771_s22 + $0xa8] sm:$0xff] %vm2442_vm5, %v2431_v40  ;;  %v1927_v52 = vpop.f32.mrf.mxu0  ;;  %v2325_v30 = vadd.f32 %v2272_v61, %v1967_v14  ;;  %v2979_v20 = vpop.f32.mrf.mxu1 }
 0x16d   : > { %2469 = vst.msk [vmem:[%s3771_s22 + $0xd0] sm:$0xff] %vm2442_vm5, %v2436_v10  ;;  %v1970_v16 = vadd.f32 %v1927_v52, %v1234_v4  ;;  %v2434_v0 = vmax.f32 %v2402_v19, 0.0  ;;  %v2405_v60 = vadd.f32 %v3758_v42, %v2366_v58  ;;  %v2330_v37 = vadd.f32 %v2979_v20, %v1972_v54 }
 0x16e   : > { %v2946_v46 = vpop.f32.mrf.mxu0  ;;  %v2364_v24 = vmul.f32 %v3751_v39, %v2325_v30  ;;  %v2285_v35 = vpop.f32.mrf.mxu1 }
 0x16f   : > { %2467 = vst.msk [vmem:[%s3771_s22 + $0xc0] sm:$0xff] %vm2442_vm5, %v2434_v0  ;;  %v1973_v53 = vadd.f32 %v2946_v46, %v1245_v45  ;;  %v2437_v29 = vmax.f32 %v2405_v60, 0.0  ;;  %v2369_v32 = vmul.f32 %v3751_v39, %v2330_v37  ;;  %v2328_v44 = vadd.f32 %v2285_v35, %v1970_v16 }
 0x170   : > { %v1930_v48 = vpop.f32.mrf.mxu0  ;;  %v2403_v41 = vadd.f32 %v3758_v42, %v2364_v24  ;;  %v2980_v26 = vpop.f32.mrf.mxu1 }
 0x171   : > { %2470 = vst.msk [vmem:[%s3771_s22 + $0xd8] sm:$0xff] %vm2442_vm5, %v2437_v29  ;;  %v1971_v33 = vadd.f32 %v1930_v48, %v1237_v21  ;;  %v2408_v55 = vadd.f32 %v3758_v42, %v2369_v32  ;;  %v2367_v8 = vmul.f32 %v3751_v39, %v2328_v44  ;;  %v2331_v27 = vadd.f32 %v2980_v26, %v1973_v53 }
 0x172   : > { %v2435_v56 = vmax.f32 %v2403_v41, 0.0  ;;  %v2288_v5 = vpop.f32.mrf.mxu1 }
 0x173   : > { %v2440_v9 = vmax.f32 %v2408_v55, 0.0  ;;  %v2406_v12 = vadd.f32 %v3758_v42, %v2367_v8  ;;  %v2370_v2 = vmul.f32 %v3751_v39, %v2331_v27  ;;  %v2329_v28 = vadd.f32 %v2288_v5, %v1971_v33 }
 0x174   : > { %2468 = vst.msk [vmem:[%s3771_s22 + $0xc8] sm:$0xff] %vm2442_vm5, %v2435_v56 }
 0x175   : > { %2473 = vst.msk [vmem:[%s3771_s22 + $0xf0] sm:$0xff] %vm2442_vm5, %v2440_v9  ;;  %v2438_v3 = vmax.f32 %v2406_v12, 0.0  ;;  %v2409_v6 = vadd.f32 %v3758_v42, %v2370_v2  ;;  %v2368_v1 = vmul.f32 %v3751_v39, %v2329_v28 }
 0x177   : > { %2471 = vst.msk [vmem:[%s3771_s22 + $0xe0] sm:$0xff] %vm2442_vm5, %v2438_v3  ;;  %v2441_v34 = vmax.f32 %v2409_v6, 0.0  ;;  %v2407_v22 = vadd.f32 %v3758_v42, %v2368_v1 }
 0x179   : > { %2474 = vst.msk [vmem:[%s3771_s22 + $0xf8] sm:$0xff] %vm2442_vm5, %v2441_v34  ;;  %v2439_v38 = vmax.f32 %v2407_v22, 0.0 }
 0x17b   : > { %2472 = vst.msk [vmem:[%s3771_s22 + $0xe8] sm:$0xff] %vm2442_vm5, %v2439_v38 }
 0x17c PF: > { %s14_s19 = sadd.s32 1, %s3097_s19   ;;  %s4002_s15 = smov %s3089_s17 }
 0x17d   : > { %p11_p7 = scmp.ge.s32.totalorder %s14_s19, 10   ;;  %s4003_s16 = smov %s3093_s18 }
 0x17e   : > { %s4004_s17 = smov %s4007_s20  ;;  %s4005_s18 = smov %s4011_s21 }
 0x17f   :  { %13 = sbr.rel (!%p11_p7) target bundleno = 3 (0x3), region = 73 }

</bundles_post_ra>
